<compile_context>
chip_gen: v5e
topology: v5e:2x2
jax: 0.10.0
libtpu: 0.0.40
codegen_flags: <defaults>
</compile_context>

<pallas_src>
import math

import jax
import jax.numpy as jnp
from jax.experimental import pallas as pl
from jax.experimental.pallas import tpu as pltpu

# ---- tiny RoBERTa-like config (small shapes consistent with the module) ----
VOCAB = 100
PAD_ID = 1
HIDDEN = 64
NUM_HEADS = 4
HEAD_DIM = HIDDEN // NUM_HEADS
INTERMEDIATE = 128
NUM_LAYERS = 2
SEQ = 8
BATCH = 2
MAX_POS = SEQ + 2          # roberta position ids start at padding_idx + 1
NUM_CLASSES = 7
CLS_PAD = 128              # classifier output padded to a full 128-lane slab
LN_EPS = 1e-5


# ------------------------- in-kernel helpers (operate on values) ------------

def _mxu_dot(a, b):
    """a @ b on the MXU: bf16 inputs, f32 accumulation."""
    return jnp.dot(a.astype(jnp.bfloat16), b.astype(jnp.bfloat16),
                   preferred_element_type=jnp.float32)


def _mxu_dot_nt(a, b):
    """a @ b.T (contract last dims of both): bf16 inputs, f32 accumulation."""
    return jax.lax.dot_general(
        a.astype(jnp.bfloat16), b.astype(jnp.bfloat16),
        (((1,), (1,)), ((), ())),
        preferred_element_type=jnp.float32)


def _layernorm(x, g, b):
    mean = jnp.mean(x, axis=-1, keepdims=True)
    xc = x - mean
    var = jnp.mean(xc * xc, axis=-1, keepdims=True)
    return xc * jax.lax.rsqrt(var + LN_EPS) * g + b


def _gelu(x):
    # TODO(synk): RoBERTa reference uses erf-GELU; tanh approximation kept for lowering safety.
    return 0.5 * x * (1.0 + jnp.tanh(0.7978845608028654 * (x + 0.044715 * x * x * x)))


# ------------------------- fused forward kernel -----------------------------

def _fused_forward_kernel(
        x_ref, mask_ref,
        emb_g_ref, emb_b_ref,
        qkv_w_ref, qkv_b_ref, o_w_ref, o_b_ref,
        ln1_g_ref, ln1_b_ref, fc1_w_ref, fc1_b_ref,
        fc2_w_ref, fc2_b_ref, ln2_g_ref, ln2_b_ref,
        pool_w_ref, pool_b_ref, cls_w_ref, cls_b_ref,
        out_ref):
    H, Dh, NH = HIDDEN, HEAD_DIM, NUM_HEADS
    B, S = BATCH, SEQ

    # embedding LayerNorm (gather + sum done in the JAX wrapper)
    x = _layernorm(x_ref[...], emb_g_ref[...], emb_b_ref[...])      # (B*S, H) f32
    mask = mask_ref[...]                                            # (B, S) additive f32

    for l in range(NUM_LAYERS):                                     # unrolled: weights VMEM-resident
        # ---- fused QKV projection (scale already folded into Q weights) ----
        qkv = _mxu_dot(x, qkv_w_ref[l]) + qkv_b_ref[l]              # (B*S, 3H)
        q = qkv[:, 0 * H:1 * H]
        k = qkv[:, 1 * H:2 * H]
        v = qkv[:, 2 * H:3 * H]

        o_w = o_w_ref[l]                                            # (H, H) bf16
        batch_rows = []
        for b in range(B):                                          # B = 2, static
            r0 = b * S
            qb = q[r0:r0 + S, :]
            kb = k[r0:r0 + S, :]
            vb = v[r0:r0 + S, :]
            mrow = mask[b:b + 1, :]                                 # (1, S)
            acc = jnp.zeros((S, H), jnp.float32)
            for h in range(NH):                                     # all heads inside one kernel
                cs = slice(h * Dh, (h + 1) * Dh)
                s = _mxu_dot_nt(qb[:, cs], kb[:, cs]) + mrow        # (S, S)
                s = s - jnp.max(s, axis=-1, keepdims=True)
                p = jnp.exp(s)
                p = p * pl.reciprocal(jnp.sum(p, axis=-1, keepdims=True), approx=True)
                ctx = _mxu_dot(p, vb[:, cs])                        # (S, Dh)
                # output projection folded per head:
                # concat_h(ctx_h) @ Wo == sum_h ctx_h @ Wo[h*Dh:(h+1)*Dh, :]
                acc = acc + _mxu_dot(ctx, o_w[cs, :])
            batch_rows.append(acc)
        ao = jnp.concatenate(batch_rows, axis=0) + o_b_ref[l]       # (B*S, H)

        x = _layernorm(ao + x, ln1_g_ref[l], ln1_b_ref[l])

        # ---- feed-forward ----
        ff = _gelu(_mxu_dot(x, fc1_w_ref[l]) + fc1_b_ref[l])
        ff = _mxu_dot(ff, fc2_w_ref[l]) + fc2_b_ref[l]
        x = _layernorm(ff + x, ln2_g_ref[l], ln2_b_ref[l])

    # ---- pooler (dense + tanh on [CLS]) + module-level ReLU ----
    cls_rows = jnp.concatenate([x[b * S:b * S + 1, :] for b in range(B)], axis=0)  # (B, H)
    pooled = jnp.tanh(_mxu_dot(cls_rows, pool_w_ref[...]) + pool_b_ref[...])
    pooled = jnp.maximum(pooled, 0.0)
    # nn.Dropout(0.3): identity at inference (eval mode).
    # TODO(synk): training-mode stochastic dropout mask not implemented.
    logits = _mxu_dot(pooled, cls_w_ref[...]) + cls_b_ref[...]      # (B, CLS_PAD) lane-dense
    out_ref[...] = logits.astype(out_ref.dtype)


# ------------------------- parameter init (deterministic) -------------------

def init_params(key):
    keys = iter(jax.random.split(key, 8 + NUM_LAYERS * 8))

    def w(shape, scale=0.02):
        return jax.random.normal(next(keys), shape, jnp.float32) * scale

    params = {
        "word_emb": w((VOCAB, HIDDEN)),
        "pos_emb": w((MAX_POS, HIDDEN)),
        "type_emb": w((1, HIDDEN)),
        "emb_ln_g": jnp.ones((HIDDEN,), jnp.float32),
        "emb_ln_b": jnp.zeros((HIDDEN,), jnp.float32),
        "pool_w": w((HIDDEN, HIDDEN)),
        "pool_b": jnp.zeros((HIDDEN,), jnp.float32),
        "cls_w": w((HIDDEN, NUM_CLASSES)),
        "cls_b": jnp.zeros((NUM_CLASSES,), jnp.float32),
        "layers": [],
    }
    for _ in range(NUM_LAYERS):
        params["layers"].append({
            "q_w": w((HIDDEN, HIDDEN)), "q_b": jnp.zeros((HIDDEN,), jnp.float32),
            "k_w": w((HIDDEN, HIDDEN)), "k_b": jnp.zeros((HIDDEN,), jnp.float32),
            "v_w": w((HIDDEN, HIDDEN)), "v_b": jnp.zeros((HIDDEN,), jnp.float32),
            "o_w": w((HIDDEN, HIDDEN)), "o_b": jnp.zeros((HIDDEN,), jnp.float32),
            "ln1_g": jnp.ones((HIDDEN,), jnp.float32),
            "ln1_b": jnp.zeros((HIDDEN,), jnp.float32),
            "fc1_w": w((HIDDEN, INTERMEDIATE)),
            "fc1_b": jnp.zeros((INTERMEDIATE,), jnp.float32),
            "fc2_w": w((INTERMEDIATE, HIDDEN)),
            "fc2_b": jnp.zeros((HIDDEN,), jnp.float32),
            "ln2_g": jnp.ones((HIDDEN,), jnp.float32),
            "ln2_b": jnp.zeros((HIDDEN,), jnp.float32),
        })
    return params


def prepare_fused_params(params):
    """Stack per-layer weights, fuse QKV, fold attention scale, pad classifier,
    cast matmul weights to bf16 (biases / LN params stay f32)."""
    scale = 1.0 / math.sqrt(HEAD_DIM)
    bf16 = jnp.bfloat16
    layers = params["layers"]

    def stack(fn):
        return jnp.stack([fn(lp) for lp in layers], axis=0)

    qkv_w = stack(lambda lp: jnp.concatenate(
        [lp["q_w"] * scale, lp["k_w"], lp["v_w"]], axis=1)).astype(bf16)       # (L, H, 3H)
    qkv_b = stack(lambda lp: jnp.concatenate(
        [lp["q_b"] * scale, lp["k_b"], lp["v_b"]])[None, :])                    # (L, 1, 3H)
    o_w = stack(lambda lp: lp["o_w"]).astype(bf16)                              # (L, H, H)
    o_b = stack(lambda lp: lp["o_b"][None, :])                                  # (L, 1, H)
    ln1_g = stack(lambda lp: lp["ln1_g"][None, :])
    ln1_b = stack(lambda lp: lp["ln1_b"][None, :])
    fc1_w = stack(lambda lp: lp["fc1_w"]).astype(bf16)                          # (L, H, I)
    fc1_b = stack(lambda lp: lp["fc1_b"][None, :])                              # (L, 1, I)
    fc2_w = stack(lambda lp: lp["fc2_w"]).astype(bf16)                          # (L, I, H)
    fc2_b = stack(lambda lp: lp["fc2_b"][None, :])
    ln2_g = stack(lambda lp: lp["ln2_g"][None, :])
    ln2_b = stack(lambda lp: lp["ln2_b"][None, :])

    cls_w = jnp.zeros((HIDDEN, CLS_PAD), jnp.float32)
    cls_w = cls_w.at[:, :NUM_CLASSES].set(params["cls_w"]).astype(bf16)         # (H, 128)
    cls_b = jnp.zeros((1, CLS_PAD), jnp.float32).at[0, :NUM_CLASSES].set(params["cls_b"])

    return dict(
        emb_ln_g=params["emb_ln_g"][None, :], emb_ln_b=params["emb_ln_b"][None, :],
        qkv_w=qkv_w, qkv_b=qkv_b, o_w=o_w, o_b=o_b,
        ln1_g=ln1_g, ln1_b=ln1_b, fc1_w=fc1_w, fc1_b=fc1_b,
        fc2_w=fc2_w, fc2_b=fc2_b, ln2_g=ln2_g, ln2_b=ln2_b,
        pool_w=params["pool_w"].astype(bf16), pool_b=params["pool_b"][None, :],
        cls_w=cls_w, cls_b=cls_b,
    )


# ------------------------- forward pass --------------------------------------

def emotion_classifier_forward(params, input_ids, attention_mask):
    B, S = input_ids.shape
    fp = prepare_fused_params(params)

    # --- RoBERTa embeddings (gathers are glue; LayerNorm runs inside the kernel) ---
    pad_mask = (input_ids != PAD_ID).astype(jnp.int32)
    position_ids = jnp.cumsum(pad_mask, axis=1) * pad_mask + PAD_ID
    x = (jnp.take(params["word_emb"], input_ids, axis=0)
         + jnp.take(params["pos_emb"], position_ids, axis=0)
         + params["type_emb"][0][None, None, :])
    x = x.reshape(B * S, HIDDEN).astype(jnp.float32)

    # additive attention mask, (B, S); per-head broadcast happens inside the kernel
    mask_add = (1.0 - attention_mask.astype(jnp.float32)) * -1e9

    logits_pad = pl.pallas_call(
        _fused_forward_kernel,
        out_shape=jax.ShapeDtypeStruct((B, CLS_PAD), jnp.float32),
        compiler_params=pltpu.CompilerParams(vmem_limit_bytes=32 * 1024 * 1024),
    )(x, mask_add,
      fp["emb_ln_g"], fp["emb_ln_b"],
      fp["qkv_w"], fp["qkv_b"], fp["o_w"], fp["o_b"],
      fp["ln1_g"], fp["ln1_b"], fp["fc1_w"], fp["fc1_b"],
      fp["fc2_w"], fp["fc2_b"], fp["ln2_g"], fp["ln2_b"],
      fp["pool_w"], fp["pool_b"], fp["cls_w"], fp["cls_b"])

    return logits_pad[:, :NUM_CLASSES]


# ------------------------- main ---------------------------------------------

if __name__ == "__main__":
    root = jax.random.PRNGKey(0)
    k_params, k_ids = jax.random.split(root)

    params = init_params(k_params)

    input_ids = jax.random.randint(k_ids, (BATCH, SEQ), 2, VOCAB, dtype=jnp.int32)
    attention_mask = jnp.ones((BATCH, SEQ), jnp.int32).at[1, 6:].set(0)
    # padded positions use the pad token id
    input_ids = jnp.where(attention_mask == 1, input_ids, PAD_ID)

    logits = emotion_classifier_forward(params, input_ids, attention_mask)
    jax.block_until_ready(logits)
    assert logits.shape == (BATCH, NUM_CLASSES)
    print("KERNEL_OK")
</pallas_src>

<mosaic_0001>
module attributes {stable_mosaic.version = 11 : i64} {
  func.func @_fused_forward_kernel(%arg0: memref<16x64xf32, #tpu.memory_space<vmem>>, %arg1: memref<2x8xf32, #tpu.memory_space<vmem>>, %arg2: memref<1x64xf32, #tpu.memory_space<vmem>>, %arg3: memref<1x64xf32, #tpu.memory_space<vmem>>, %arg4: memref<2x64x192xbf16, #tpu.memory_space<vmem>>, %arg5: memref<2x1x192xf32, #tpu.memory_space<vmem>>, %arg6: memref<2x64x64xbf16, #tpu.memory_space<vmem>>, %arg7: memref<2x1x64xf32, #tpu.memory_space<vmem>>, %arg8: memref<2x1x64xf32, #tpu.memory_space<vmem>>, %arg9: memref<2x1x64xf32, #tpu.memory_space<vmem>>, %arg10: memref<2x64x128xbf16, #tpu.memory_space<vmem>>, %arg11: memref<2x1x128xf32, #tpu.memory_space<vmem>>, %arg12: memref<2x128x64xbf16, #tpu.memory_space<vmem>>, %arg13: memref<2x1x64xf32, #tpu.memory_space<vmem>>, %arg14: memref<2x1x64xf32, #tpu.memory_space<vmem>>, %arg15: memref<2x1x64xf32, #tpu.memory_space<vmem>>, %arg16: memref<64x64xbf16, #tpu.memory_space<vmem>>, %arg17: memref<1x64xf32, #tpu.memory_space<vmem>>, %arg18: memref<64x128xbf16, #tpu.memory_space<vmem>>, %arg19: memref<1x128xf32, #tpu.memory_space<vmem>>, %arg20: memref<2x128xf32, #tpu.memory_space<vmem>>) attributes {dimension_semantics = [], scalar_prefetch = 0 : i64, scratch_operands = 0 : i64, tpu.core_type = #tpu.core_type<tc>} {
    %c0 = arith.constant 0 : index
    %c0_0 = arith.constant 0 : index
    %0 = vector.load %arg0[%c0, %c0_0] : memref<16x64xf32, #tpu.memory_space<vmem>>, vector<16x64xf32>
    %c0_1 = arith.constant 0 : index
    %c0_2 = arith.constant 0 : index
    %1 = vector.load %arg2[%c0_1, %c0_2] : memref<1x64xf32, #tpu.memory_space<vmem>>, vector<1x64xf32>
    %c0_3 = arith.constant 0 : index
    %c0_4 = arith.constant 0 : index
    %2 = vector.load %arg3[%c0_3, %c0_4] : memref<1x64xf32, #tpu.memory_space<vmem>>, vector<1x64xf32>
    %cst = arith.constant dense<0.000000e+00> : vector<16xf32>
    %3 = vector.multi_reduction <add>, %0, %cst [1] : vector<16x64xf32> to vector<16xf32>
    %4 = vector.shape_cast %3 : vector<16xf32> to vector<16x1xf32>
    %cst_5 = arith.constant 6.400000e+01 : f32
    %5 = vector.broadcast %cst_5 : f32 to vector<16x1xf32>
    %6 = arith.divf %4, %5 : vector<16x1xf32>
    %7 = vector.broadcast %6 : vector<16x1xf32> to vector<16x64xf32>
    %8 = arith.subf %0, %7 : vector<16x64xf32>
    %9 = arith.mulf %8, %8 : vector<16x64xf32>
    %cst_6 = arith.constant dense<0.000000e+00> : vector<16xf32>
    %10 = vector.multi_reduction <add>, %9, %cst_6 [1] : vector<16x64xf32> to vector<16xf32>
    %11 = vector.shape_cast %10 : vector<16xf32> to vector<16x1xf32>
    %cst_7 = arith.constant 6.400000e+01 : f32
    %12 = vector.broadcast %cst_7 : f32 to vector<16x1xf32>
    %13 = arith.divf %11, %12 : vector<16x1xf32>
    %cst_8 = arith.constant 9.99999974E-6 : f32
    %14 = vector.broadcast %cst_8 : f32 to vector<16x1xf32>
    %15 = arith.addf %13, %14 : vector<16x1xf32>
    %16 = math.rsqrt %15 : vector<16x1xf32>
    %17 = vector.broadcast %16 : vector<16x1xf32> to vector<16x64xf32>
    %18 = arith.mulf %8, %17 : vector<16x64xf32>
    %19 = vector.broadcast %1 : vector<1x64xf32> to vector<16x64xf32>
    %20 = arith.mulf %18, %19 : vector<16x64xf32>
    %21 = vector.broadcast %2 : vector<1x64xf32> to vector<16x64xf32>
    %22 = arith.addf %20, %21 : vector<16x64xf32>
    %c0_9 = arith.constant 0 : index
    %c0_10 = arith.constant 0 : index
    %23 = vector.load %arg1[%c0_9, %c0_10] : memref<2x8xf32, #tpu.memory_space<vmem>>, vector<2x8xf32>
    %c0_11 = arith.constant 0 : index
    %c0_12 = arith.constant 0 : index
    %c0_13 = arith.constant 0 : index
    %24 = vector.load %arg4[%c0_11, %c0_12, %c0_13] : memref<2x64x192xbf16, #tpu.memory_space<vmem>>, vector<1x64x192xbf16>
    %25 = vector.shape_cast %24 : vector<1x64x192xbf16> to vector<64x192xbf16>
    %26 = arith.truncf %22 : vector<16x64xf32> to vector<16x64xbf16>
    %cst_14 = arith.constant dense<0.000000e+00> : vector<16x192xf32>
    %27 = tpu.matmul %26, %25, %cst_14 {dimension_numbers = #tpu.dot_dimension_numbers<[1], [0], [0], [1], [0, 0, 1, 1], [], []>} : vector<16x64xbf16>, vector<64x192xbf16>, vector<16x192xf32> -> vector<16x192xf32>
    %c0_15 = arith.constant 0 : index
    %c0_16 = arith.constant 0 : index
    %c0_17 = arith.constant 0 : index
    %28 = vector.load %arg5[%c0_15, %c0_16, %c0_17] : memref<2x1x192xf32, #tpu.memory_space<vmem>>, vector<1x1x192xf32>
    %29 = vector.shape_cast %28 : vector<1x1x192xf32> to vector<1x192xf32>
    %30 = vector.broadcast %29 : vector<1x192xf32> to vector<16x192xf32>
    %31 = arith.addf %27, %30 : vector<16x192xf32>
    %32 = vector.extract_strided_slice %31 {offsets = [0, 0], sizes = [16, 64], strides = [1, 1]} : vector<16x192xf32> to vector<16x64xf32>
    %33 = vector.extract_strided_slice %31 {offsets = [0, 64], sizes = [16, 64], strides = [1, 1]} : vector<16x192xf32> to vector<16x64xf32>
    %34 = vector.extract_strided_slice %31 {offsets = [0, 128], sizes = [16, 64], strides = [1, 1]} : vector<16x192xf32> to vector<16x64xf32>
    %c0_18 = arith.constant 0 : index
    %c0_19 = arith.constant 0 : index
    %c0_20 = arith.constant 0 : index
    %35 = vector.load %arg6[%c0_18, %c0_19, %c0_20] : memref<2x64x64xbf16, #tpu.memory_space<vmem>>, vector<1x64x64xbf16>
    %36 = vector.shape_cast %35 : vector<1x64x64xbf16> to vector<64x64xbf16>
    %37 = vector.extract_strided_slice %32 {offsets = [0, 0], sizes = [8, 64], strides = [1, 1]} : vector<16x64xf32> to vector<8x64xf32>
    %38 = vector.extract_strided_slice %33 {offsets = [0, 0], sizes = [8, 64], strides = [1, 1]} : vector<16x64xf32> to vector<8x64xf32>
    %39 = vector.extract_strided_slice %34 {offsets = [0, 0], sizes = [8, 64], strides = [1, 1]} : vector<16x64xf32> to vector<8x64xf32>
    %40 = vector.extract_strided_slice %23 {offsets = [0, 0], sizes = [1, 8], strides = [1, 1]} : vector<2x8xf32> to vector<1x8xf32>
    %cst_21 = arith.constant 0.000000e+00 : f32
    %41 = vector.broadcast %cst_21 : f32 to vector<8x64xf32>
    %42 = vector.extract_strided_slice %37 {offsets = [0, 0], sizes = [8, 16], strides = [1, 1]} : vector<8x64xf32> to vector<8x16xf32>
    %43 = vector.extract_strided_slice %38 {offsets = [0, 0], sizes = [8, 16], strides = [1, 1]} : vector<8x64xf32> to vector<8x16xf32>
    %44 = arith.truncf %42 : vector<8x16xf32> to vector<8x16xbf16>
    %45 = arith.truncf %43 : vector<8x16xf32> to vector<8x16xbf16>
    %cst_22 = arith.constant dense<0.000000e+00> : vector<8x8xf32>
    %46 = tpu.matmul %44, %45, %cst_22 {dimension_numbers = #tpu.dot_dimension_numbers<[1], [1], [0], [0], [0, 0, 1, 0], [], []>} : vector<8x16xbf16>, vector<8x16xbf16>, vector<8x8xf32> -> vector<8x8xf32>
    %47 = vector.broadcast %40 : vector<1x8xf32> to vector<8x8xf32>
    %48 = arith.addf %46, %47 : vector<8x8xf32>
    %cst_23 = arith.constant dense<0xFF800000> : vector<8xf32>
    %49 = vector.multi_reduction <maximumf>, %48, %cst_23 [1] : vector<8x8xf32> to vector<8xf32>
    %50 = vector.shape_cast %49 : vector<8xf32> to vector<8x1xf32>
    %51 = vector.broadcast %50 : vector<8x1xf32> to vector<8x8xf32>
    %52 = arith.subf %48, %51 : vector<8x8xf32>
    %53 = math.exp %52 : vector<8x8xf32>
    %cst_24 = arith.constant dense<0.000000e+00> : vector<8xf32>
    %54 = vector.multi_reduction <add>, %53, %cst_24 [1] : vector<8x8xf32> to vector<8xf32>
    %55 = vector.shape_cast %54 : vector<8xf32> to vector<8x1xf32>
    %56 = tpu.reciprocal %55 {approx = true} : vector<8x1xf32> -> vector<8x1xf32>
    %57 = vector.broadcast %56 : vector<8x1xf32> to vector<8x8xf32>
    %58 = arith.mulf %53, %57 : vector<8x8xf32>
    %59 = vector.extract_strided_slice %39 {offsets = [0, 0], sizes = [8, 16], strides = [1, 1]} : vector<8x64xf32> to vector<8x16xf32>
    %60 = arith.truncf %58 : vector<8x8xf32> to vector<8x8xbf16>
    %61 = arith.truncf %59 : vector<8x16xf32> to vector<8x16xbf16>
    %cst_25 = arith.constant dense<0.000000e+00> : vector<8x16xf32>
    %62 = tpu.matmul %60, %61, %cst_25 {dimension_numbers = #tpu.dot_dimension_numbers<[1], [0], [0], [1], [0, 0, 1, 1], [], []>} : vector<8x8xbf16>, vector<8x16xbf16>, vector<8x16xf32> -> vector<8x16xf32>
    %63 = vector.extract_strided_slice %36 {offsets = [0, 0], sizes = [16, 64], strides = [1, 1]} : vector<64x64xbf16> to vector<16x64xbf16>
    %64 = arith.truncf %62 : vector<8x16xf32> to vector<8x16xbf16>
    %cst_26 = arith.constant dense<0.000000e+00> : vector<8x64xf32>
    %65 = tpu.matmul %64, %63, %cst_26 {dimension_numbers = #tpu.dot_dimension_numbers<[1], [0], [0], [1], [0, 0, 1, 1], [], []>} : vector<8x16xbf16>, vector<16x64xbf16>, vector<8x64xf32> -> vector<8x64xf32>
    %66 = arith.addf %41, %65 : vector<8x64xf32>
    %67 = vector.extract_strided_slice %37 {offsets = [0, 16], sizes = [8, 16], strides = [1, 1]} : vector<8x64xf32> to vector<8x16xf32>
    %68 = vector.extract_strided_slice %38 {offsets = [0, 16], sizes = [8, 16], strides = [1, 1]} : vector<8x64xf32> to vector<8x16xf32>
    %69 = arith.truncf %67 : vector<8x16xf32> to vector<8x16xbf16>
    %70 = arith.truncf %68 : vector<8x16xf32> to vector<8x16xbf16>
    %cst_27 = arith.constant dense<0.000000e+00> : vector<8x8xf32>
    %71 = tpu.matmul %69, %70, %cst_27 {dimension_numbers = #tpu.dot_dimension_numbers<[1], [1], [0], [0], [0, 0, 1, 0], [], []>} : vector<8x16xbf16>, vector<8x16xbf16>, vector<8x8xf32> -> vector<8x8xf32>
    %72 = vector.broadcast %40 : vector<1x8xf32> to vector<8x8xf32>
    %73 = arith.addf %71, %72 : vector<8x8xf32>
    %cst_28 = arith.constant dense<0xFF800000> : vector<8xf32>
    %74 = vector.multi_reduction <maximumf>, %73, %cst_28 [1] : vector<8x8xf32> to vector<8xf32>
    %75 = vector.shape_cast %74 : vector<8xf32> to vector<8x1xf32>
    %76 = vector.broadcast %75 : vector<8x1xf32> to vector<8x8xf32>
    %77 = arith.subf %73, %76 : vector<8x8xf32>
    %78 = math.exp %77 : vector<8x8xf32>
    %cst_29 = arith.constant dense<0.000000e+00> : vector<8xf32>
    %79 = vector.multi_reduction <add>, %78, %cst_29 [1] : vector<8x8xf32> to vector<8xf32>
    %80 = vector.shape_cast %79 : vector<8xf32> to vector<8x1xf32>
    %81 = tpu.reciprocal %80 {approx = true} : vector<8x1xf32> -> vector<8x1xf32>
    %82 = vector.broadcast %81 : vector<8x1xf32> to vector<8x8xf32>
    %83 = arith.mulf %78, %82 : vector<8x8xf32>
    %84 = vector.extract_strided_slice %39 {offsets = [0, 16], sizes = [8, 16], strides = [1, 1]} : vector<8x64xf32> to vector<8x16xf32>
    %85 = arith.truncf %83 : vector<8x8xf32> to vector<8x8xbf16>
    %86 = arith.truncf %84 : vector<8x16xf32> to vector<8x16xbf16>
    %cst_30 = arith.constant dense<0.000000e+00> : vector<8x16xf32>
    %87 = tpu.matmul %85, %86, %cst_30 {dimension_numbers = #tpu.dot_dimension_numbers<[1], [0], [0], [1], [0, 0, 1, 1], [], []>} : vector<8x8xbf16>, vector<8x16xbf16>, vector<8x16xf32> -> vector<8x16xf32>
    %88 = vector.extract_strided_slice %36 {offsets = [16, 0], sizes = [16, 64], strides = [1, 1]} : vector<64x64xbf16> to vector<16x64xbf16>
    %89 = arith.truncf %87 : vector<8x16xf32> to vector<8x16xbf16>
    %cst_31 = arith.constant dense<0.000000e+00> : vector<8x64xf32>
    %90 = tpu.matmul %89, %88, %cst_31 {dimension_numbers = #tpu.dot_dimension_numbers<[1], [0], [0], [1], [0, 0, 1, 1], [], []>} : vector<8x16xbf16>, vector<16x64xbf16>, vector<8x64xf32> -> vector<8x64xf32>
    %91 = arith.addf %66, %90 : vector<8x64xf32>
    %92 = vector.extract_strided_slice %37 {offsets = [0, 32], sizes = [8, 16], strides = [1, 1]} : vector<8x64xf32> to vector<8x16xf32>
    %93 = vector.extract_strided_slice %38 {offsets = [0, 32], sizes = [8, 16], strides = [1, 1]} : vector<8x64xf32> to vector<8x16xf32>
    %94 = arith.truncf %92 : vector<8x16xf32> to vector<8x16xbf16>
    %95 = arith.truncf %93 : vector<8x16xf32> to vector<8x16xbf16>
    %cst_32 = arith.constant dense<0.000000e+00> : vector<8x8xf32>
    %96 = tpu.matmul %94, %95, %cst_32 {dimension_numbers = #tpu.dot_dimension_numbers<[1], [1], [0], [0], [0, 0, 1, 0], [], []>} : vector<8x16xbf16>, vector<8x16xbf16>, vector<8x8xf32> -> vector<8x8xf32>
    %97 = vector.broadcast %40 : vector<1x8xf32> to vector<8x8xf32>
    %98 = arith.addf %96, %97 : vector<8x8xf32>
    %cst_33 = arith.constant dense<0xFF800000> : vector<8xf32>
    %99 = vector.multi_reduction <maximumf>, %98, %cst_33 [1] : vector<8x8xf32> to vector<8xf32>
    %100 = vector.shape_cast %99 : vector<8xf32> to vector<8x1xf32>
    %101 = vector.broadcast %100 : vector<8x1xf32> to vector<8x8xf32>
    %102 = arith.subf %98, %101 : vector<8x8xf32>
    %103 = math.exp %102 : vector<8x8xf32>
    %cst_34 = arith.constant dense<0.000000e+00> : vector<8xf32>
    %104 = vector.multi_reduction <add>, %103, %cst_34 [1] : vector<8x8xf32> to vector<8xf32>
    %105 = vector.shape_cast %104 : vector<8xf32> to vector<8x1xf32>
    %106 = tpu.reciprocal %105 {approx = true} : vector<8x1xf32> -> vector<8x1xf32>
    %107 = vector.broadcast %106 : vector<8x1xf32> to vector<8x8xf32>
    %108 = arith.mulf %103, %107 : vector<8x8xf32>
    %109 = vector.extract_strided_slice %39 {offsets = [0, 32], sizes = [8, 16], strides = [1, 1]} : vector<8x64xf32> to vector<8x16xf32>
    %110 = arith.truncf %108 : vector<8x8xf32> to vector<8x8xbf16>
    %111 = arith.truncf %109 : vector<8x16xf32> to vector<8x16xbf16>
    %cst_35 = arith.constant dense<0.000000e+00> : vector<8x16xf32>
    %112 = tpu.matmul %110, %111, %cst_35 {dimension_numbers = #tpu.dot_dimension_numbers<[1], [0], [0], [1], [0, 0, 1, 1], [], []>} : vector<8x8xbf16>, vector<8x16xbf16>, vector<8x16xf32> -> vector<8x16xf32>
    %113 = vector.extract_strided_slice %36 {offsets = [32, 0], sizes = [16, 64], strides = [1, 1]} : vector<64x64xbf16> to vector<16x64xbf16>
    %114 = arith.truncf %112 : vector<8x16xf32> to vector<8x16xbf16>
    %cst_36 = arith.constant dense<0.000000e+00> : vector<8x64xf32>
    %115 = tpu.matmul %114, %113, %cst_36 {dimension_numbers = #tpu.dot_dimension_numbers<[1], [0], [0], [1], [0, 0, 1, 1], [], []>} : vector<8x16xbf16>, vector<16x64xbf16>, vector<8x64xf32> -> vector<8x64xf32>
    %116 = arith.addf %91, %115 : vector<8x64xf32>
    %117 = vector.extract_strided_slice %37 {offsets = [0, 48], sizes = [8, 16], strides = [1, 1]} : vector<8x64xf32> to vector<8x16xf32>
    %118 = vector.extract_strided_slice %38 {offsets = [0, 48], sizes = [8, 16], strides = [1, 1]} : vector<8x64xf32> to vector<8x16xf32>
    %119 = arith.truncf %117 : vector<8x16xf32> to vector<8x16xbf16>
    %120 = arith.truncf %118 : vector<8x16xf32> to vector<8x16xbf16>
    %cst_37 = arith.constant dense<0.000000e+00> : vector<8x8xf32>
    %121 = tpu.matmul %119, %120, %cst_37 {dimension_numbers = #tpu.dot_dimension_numbers<[1], [1], [0], [0], [0, 0, 1, 0], [], []>} : vector<8x16xbf16>, vector<8x16xbf16>, vector<8x8xf32> -> vector<8x8xf32>
    %122 = vector.broadcast %40 : vector<1x8xf32> to vector<8x8xf32>
    %123 = arith.addf %121, %122 : vector<8x8xf32>
    %cst_38 = arith.constant dense<0xFF800000> : vector<8xf32>
    %124 = vector.multi_reduction <maximumf>, %123, %cst_38 [1] : vector<8x8xf32> to vector<8xf32>
    %125 = vector.shape_cast %124 : vector<8xf32> to vector<8x1xf32>
    %126 = vector.broadcast %125 : vector<8x1xf32> to vector<8x8xf32>
    %127 = arith.subf %123, %126 : vector<8x8xf32>
    %128 = math.exp %127 : vector<8x8xf32>
    %cst_39 = arith.constant dense<0.000000e+00> : vector<8xf32>
    %129 = vector.multi_reduction <add>, %128, %cst_39 [1] : vector<8x8xf32> to vector<8xf32>
    %130 = vector.shape_cast %129 : vector<8xf32> to vector<8x1xf32>
    %131 = tpu.reciprocal %130 {approx = true} : vector<8x1xf32> -> vector<8x1xf32>
    %132 = vector.broadcast %131 : vector<8x1xf32> to vector<8x8xf32>
    %133 = arith.mulf %128, %132 : vector<8x8xf32>
    %134 = vector.extract_strided_slice %39 {offsets = [0, 48], sizes = [8, 16], strides = [1, 1]} : vector<8x64xf32> to vector<8x16xf32>
    %135 = arith.truncf %133 : vector<8x8xf32> to vector<8x8xbf16>
    %136 = arith.truncf %134 : vector<8x16xf32> to vector<8x16xbf16>
    %cst_40 = arith.constant dense<0.000000e+00> : vector<8x16xf32>
    %137 = tpu.matmul %135, %136, %cst_40 {dimension_numbers = #tpu.dot_dimension_numbers<[1], [0], [0], [1], [0, 0, 1, 1], [], []>} : vector<8x8xbf16>, vector<8x16xbf16>, vector<8x16xf32> -> vector<8x16xf32>
    %138 = vector.extract_strided_slice %36 {offsets = [48, 0], sizes = [16, 64], strides = [1, 1]} : vector<64x64xbf16> to vector<16x64xbf16>
    %139 = arith.truncf %137 : vector<8x16xf32> to vector<8x16xbf16>
    %cst_41 = arith.constant dense<0.000000e+00> : vector<8x64xf32>
    %140 = tpu.matmul %139, %138, %cst_41 {dimension_numbers = #tpu.dot_dimension_numbers<[1], [0], [0], [1], [0, 0, 1, 1], [], []>} : vector<8x16xbf16>, vector<16x64xbf16>, vector<8x64xf32> -> vector<8x64xf32>
    %141 = arith.addf %116, %140 : vector<8x64xf32>
    %142 = vector.extract_strided_slice %32 {offsets = [8, 0], sizes = [8, 64], strides = [1, 1]} : vector<16x64xf32> to vector<8x64xf32>
    %143 = vector.extract_strided_slice %33 {offsets = [8, 0], sizes = [8, 64], strides = [1, 1]} : vector<16x64xf32> to vector<8x64xf32>
    %144 = vector.extract_strided_slice %34 {offsets = [8, 0], sizes = [8, 64], strides = [1, 1]} : vector<16x64xf32> to vector<8x64xf32>
    %145 = vector.extract_strided_slice %23 {offsets = [1, 0], sizes = [1, 8], strides = [1, 1]} : vector<2x8xf32> to vector<1x8xf32>
    %cst_42 = arith.constant 0.000000e+00 : f32
    %146 = vector.broadcast %cst_42 : f32 to vector<8x64xf32>
    %147 = vector.extract_strided_slice %142 {offsets = [0, 0], sizes = [8, 16], strides = [1, 1]} : vector<8x64xf32> to vector<8x16xf32>
    %148 = vector.extract_strided_slice %143 {offsets = [0, 0], sizes = [8, 16], strides = [1, 1]} : vector<8x64xf32> to vector<8x16xf32>
    %149 = arith.truncf %147 : vector<8x16xf32> to vector<8x16xbf16>
    %150 = arith.truncf %148 : vector<8x16xf32> to vector<8x16xbf16>
    %cst_43 = arith.constant dense<0.000000e+00> : vector<8x8xf32>
    %151 = tpu.matmul %149, %150, %cst_43 {dimension_numbers = #tpu.dot_dimension_numbers<[1], [1], [0], [0], [0, 0, 1, 0], [], []>} : vector<8x16xbf16>, vector<8x16xbf16>, vector<8x8xf32> -> vector<8x8xf32>
    %152 = vector.broadcast %145 : vector<1x8xf32> to vector<8x8xf32>
    %153 = arith.addf %151, %152 : vector<8x8xf32>
    %cst_44 = arith.constant dense<0xFF800000> : vector<8xf32>
    %154 = vector.multi_reduction <maximumf>, %153, %cst_44 [1] : vector<8x8xf32> to vector<8xf32>
    %155 = vector.shape_cast %154 : vector<8xf32> to vector<8x1xf32>
    %156 = vector.broadcast %155 : vector<8x1xf32> to vector<8x8xf32>
    %157 = arith.subf %153, %156 : vector<8x8xf32>
    %158 = math.exp %157 : vector<8x8xf32>
    %cst_45 = arith.constant dense<0.000000e+00> : vector<8xf32>
    %159 = vector.multi_reduction <add>, %158, %cst_45 [1] : vector<8x8xf32> to vector<8xf32>
    %160 = vector.shape_cast %159 : vector<8xf32> to vector<8x1xf32>
    %161 = tpu.reciprocal %160 {approx = true} : vector<8x1xf32> -> vector<8x1xf32>
    %162 = vector.broadcast %161 : vector<8x1xf32> to vector<8x8xf32>
    %163 = arith.mulf %158, %162 : vector<8x8xf32>
    %164 = vector.extract_strided_slice %144 {offsets = [0, 0], sizes = [8, 16], strides = [1, 1]} : vector<8x64xf32> to vector<8x16xf32>
    %165 = arith.truncf %163 : vector<8x8xf32> to vector<8x8xbf16>
    %166 = arith.truncf %164 : vector<8x16xf32> to vector<8x16xbf16>
    %cst_46 = arith.constant dense<0.000000e+00> : vector<8x16xf32>
    %167 = tpu.matmul %165, %166, %cst_46 {dimension_numbers = #tpu.dot_dimension_numbers<[1], [0], [0], [1], [0, 0, 1, 1], [], []>} : vector<8x8xbf16>, vector<8x16xbf16>, vector<8x16xf32> -> vector<8x16xf32>
    %168 = vector.extract_strided_slice %36 {offsets = [0, 0], sizes = [16, 64], strides = [1, 1]} : vector<64x64xbf16> to vector<16x64xbf16>
    %169 = arith.truncf %167 : vector<8x16xf32> to vector<8x16xbf16>
    %cst_47 = arith.constant dense<0.000000e+00> : vector<8x64xf32>
    %170 = tpu.matmul %169, %168, %cst_47 {dimension_numbers = #tpu.dot_dimension_numbers<[1], [0], [0], [1], [0, 0, 1, 1], [], []>} : vector<8x16xbf16>, vector<16x64xbf16>, vector<8x64xf32> -> vector<8x64xf32>
    %171 = arith.addf %146, %170 : vector<8x64xf32>
    %172 = vector.extract_strided_slice %142 {offsets = [0, 16], sizes = [8, 16], strides = [1, 1]} : vector<8x64xf32> to vector<8x16xf32>
    %173 = vector.extract_strided_slice %143 {offsets = [0, 16], sizes = [8, 16], strides = [1, 1]} : vector<8x64xf32> to vector<8x16xf32>
    %174 = arith.truncf %172 : vector<8x16xf32> to vector<8x16xbf16>
    %175 = arith.truncf %173 : vector<8x16xf32> to vector<8x16xbf16>
    %cst_48 = arith.constant dense<0.000000e+00> : vector<8x8xf32>
    %176 = tpu.matmul %174, %175, %cst_48 {dimension_numbers = #tpu.dot_dimension_numbers<[1], [1], [0], [0], [0, 0, 1, 0], [], []>} : vector<8x16xbf16>, vector<8x16xbf16>, vector<8x8xf32> -> vector<8x8xf32>
    %177 = vector.broadcast %145 : vector<1x8xf32> to vector<8x8xf32>
    %178 = arith.addf %176, %177 : vector<8x8xf32>
    %cst_49 = arith.constant dense<0xFF800000> : vector<8xf32>
    %179 = vector.multi_reduction <maximumf>, %178, %cst_49 [1] : vector<8x8xf32> to vector<8xf32>
    %180 = vector.shape_cast %179 : vector<8xf32> to vector<8x1xf32>
    %181 = vector.broadcast %180 : vector<8x1xf32> to vector<8x8xf32>
    %182 = arith.subf %178, %181 : vector<8x8xf32>
    %183 = math.exp %182 : vector<8x8xf32>
    %cst_50 = arith.constant dense<0.000000e+00> : vector<8xf32>
    %184 = vector.multi_reduction <add>, %183, %cst_50 [1] : vector<8x8xf32> to vector<8xf32>
    %185 = vector.shape_cast %184 : vector<8xf32> to vector<8x1xf32>
    %186 = tpu.reciprocal %185 {approx = true} : vector<8x1xf32> -> vector<8x1xf32>
    %187 = vector.broadcast %186 : vector<8x1xf32> to vector<8x8xf32>
    %188 = arith.mulf %183, %187 : vector<8x8xf32>
    %189 = vector.extract_strided_slice %144 {offsets = [0, 16], sizes = [8, 16], strides = [1, 1]} : vector<8x64xf32> to vector<8x16xf32>
    %190 = arith.truncf %188 : vector<8x8xf32> to vector<8x8xbf16>
    %191 = arith.truncf %189 : vector<8x16xf32> to vector<8x16xbf16>
    %cst_51 = arith.constant dense<0.000000e+00> : vector<8x16xf32>
    %192 = tpu.matmul %190, %191, %cst_51 {dimension_numbers = #tpu.dot_dimension_numbers<[1], [0], [0], [1], [0, 0, 1, 1], [], []>} : vector<8x8xbf16>, vector<8x16xbf16>, vector<8x16xf32> -> vector<8x16xf32>
    %193 = vector.extract_strided_slice %36 {offsets = [16, 0], sizes = [16, 64], strides = [1, 1]} : vector<64x64xbf16> to vector<16x64xbf16>
    %194 = arith.truncf %192 : vector<8x16xf32> to vector<8x16xbf16>
    %cst_52 = arith.constant dense<0.000000e+00> : vector<8x64xf32>
    %195 = tpu.matmul %194, %193, %cst_52 {dimension_numbers = #tpu.dot_dimension_numbers<[1], [0], [0], [1], [0, 0, 1, 1], [], []>} : vector<8x16xbf16>, vector<16x64xbf16>, vector<8x64xf32> -> vector<8x64xf32>
    %196 = arith.addf %171, %195 : vector<8x64xf32>
    %197 = vector.extract_strided_slice %142 {offsets = [0, 32], sizes = [8, 16], strides = [1, 1]} : vector<8x64xf32> to vector<8x16xf32>
    %198 = vector.extract_strided_slice %143 {offsets = [0, 32], sizes = [8, 16], strides = [1, 1]} : vector<8x64xf32> to vector<8x16xf32>
    %199 = arith.truncf %197 : vector<8x16xf32> to vector<8x16xbf16>
    %200 = arith.truncf %198 : vector<8x16xf32> to vector<8x16xbf16>
    %cst_53 = arith.constant dense<0.000000e+00> : vector<8x8xf32>
    %201 = tpu.matmul %199, %200, %cst_53 {dimension_numbers = #tpu.dot_dimension_numbers<[1], [1], [0], [0], [0, 0, 1, 0], [], []>} : vector<8x16xbf16>, vector<8x16xbf16>, vector<8x8xf32> -> vector<8x8xf32>
    %202 = vector.broadcast %145 : vector<1x8xf32> to vector<8x8xf32>
    %203 = arith.addf %201, %202 : vector<8x8xf32>
    %cst_54 = arith.constant dense<0xFF800000> : vector<8xf32>
    %204 = vector.multi_reduction <maximumf>, %203, %cst_54 [1] : vector<8x8xf32> to vector<8xf32>
    %205 = vector.shape_cast %204 : vector<8xf32> to vector<8x1xf32>
    %206 = vector.broadcast %205 : vector<8x1xf32> to vector<8x8xf32>
    %207 = arith.subf %203, %206 : vector<8x8xf32>
    %208 = math.exp %207 : vector<8x8xf32>
    %cst_55 = arith.constant dense<0.000000e+00> : vector<8xf32>
    %209 = vector.multi_reduction <add>, %208, %cst_55 [1] : vector<8x8xf32> to vector<8xf32>
    %210 = vector.shape_cast %209 : vector<8xf32> to vector<8x1xf32>
    %211 = tpu.reciprocal %210 {approx = true} : vector<8x1xf32> -> vector<8x1xf32>
    %212 = vector.broadcast %211 : vector<8x1xf32> to vector<8x8xf32>
    %213 = arith.mulf %208, %212 : vector<8x8xf32>
    %214 = vector.extract_strided_slice %144 {offsets = [0, 32], sizes = [8, 16], strides = [1, 1]} : vector<8x64xf32> to vector<8x16xf32>
    %215 = arith.truncf %213 : vector<8x8xf32> to vector<8x8xbf16>
    %216 = arith.truncf %214 : vector<8x16xf32> to vector<8x16xbf16>
    %cst_56 = arith.constant dense<0.000000e+00> : vector<8x16xf32>
    %217 = tpu.matmul %215, %216, %cst_56 {dimension_numbers = #tpu.dot_dimension_numbers<[1], [0], [0], [1], [0, 0, 1, 1], [], []>} : vector<8x8xbf16>, vector<8x16xbf16>, vector<8x16xf32> -> vector<8x16xf32>
    %218 = vector.extract_strided_slice %36 {offsets = [32, 0], sizes = [16, 64], strides = [1, 1]} : vector<64x64xbf16> to vector<16x64xbf16>
    %219 = arith.truncf %217 : vector<8x16xf32> to vector<8x16xbf16>
    %cst_57 = arith.constant dense<0.000000e+00> : vector<8x64xf32>
    %220 = tpu.matmul %219, %218, %cst_57 {dimension_numbers = #tpu.dot_dimension_numbers<[1], [0], [0], [1], [0, 0, 1, 1], [], []>} : vector<8x16xbf16>, vector<16x64xbf16>, vector<8x64xf32> -> vector<8x64xf32>
    %221 = arith.addf %196, %220 : vector<8x64xf32>
    %222 = vector.extract_strided_slice %142 {offsets = [0, 48], sizes = [8, 16], strides = [1, 1]} : vector<8x64xf32> to vector<8x16xf32>
    %223 = vector.extract_strided_slice %143 {offsets = [0, 48], sizes = [8, 16], strides = [1, 1]} : vector<8x64xf32> to vector<8x16xf32>
    %224 = arith.truncf %222 : vector<8x16xf32> to vector<8x16xbf16>
    %225 = arith.truncf %223 : vector<8x16xf32> to vector<8x16xbf16>
    %cst_58 = arith.constant dense<0.000000e+00> : vector<8x8xf32>
    %226 = tpu.matmul %224, %225, %cst_58 {dimension_numbers = #tpu.dot_dimension_numbers<[1], [1], [0], [0], [0, 0, 1, 0], [], []>} : vector<8x16xbf16>, vector<8x16xbf16>, vector<8x8xf32> -> vector<8x8xf32>
    %227 = vector.broadcast %145 : vector<1x8xf32> to vector<8x8xf32>
    %228 = arith.addf %226, %227 : vector<8x8xf32>
    %cst_59 = arith.constant dense<0xFF800000> : vector<8xf32>
    %229 = vector.multi_reduction <maximumf>, %228, %cst_59 [1] : vector<8x8xf32> to vector<8xf32>
    %230 = vector.shape_cast %229 : vector<8xf32> to vector<8x1xf32>
    %231 = vector.broadcast %230 : vector<8x1xf32> to vector<8x8xf32>
    %232 = arith.subf %228, %231 : vector<8x8xf32>
    %233 = math.exp %232 : vector<8x8xf32>
    %cst_60 = arith.constant dense<0.000000e+00> : vector<8xf32>
    %234 = vector.multi_reduction <add>, %233, %cst_60 [1] : vector<8x8xf32> to vector<8xf32>
    %235 = vector.shape_cast %234 : vector<8xf32> to vector<8x1xf32>
    %236 = tpu.reciprocal %235 {approx = true} : vector<8x1xf32> -> vector<8x1xf32>
    %237 = vector.broadcast %236 : vector<8x1xf32> to vector<8x8xf32>
    %238 = arith.mulf %233, %237 : vector<8x8xf32>
    %239 = vector.extract_strided_slice %144 {offsets = [0, 48], sizes = [8, 16], strides = [1, 1]} : vector<8x64xf32> to vector<8x16xf32>
    %240 = arith.truncf %238 : vector<8x8xf32> to vector<8x8xbf16>
    %241 = arith.truncf %239 : vector<8x16xf32> to vector<8x16xbf16>
    %cst_61 = arith.constant dense<0.000000e+00> : vector<8x16xf32>
    %242 = tpu.matmul %240, %241, %cst_61 {dimension_numbers = #tpu.dot_dimension_numbers<[1], [0], [0], [1], [0, 0, 1, 1], [], []>} : vector<8x8xbf16>, vector<8x16xbf16>, vector<8x16xf32> -> vector<8x16xf32>
    %243 = vector.extract_strided_slice %36 {offsets = [48, 0], sizes = [16, 64], strides = [1, 1]} : vector<64x64xbf16> to vector<16x64xbf16>
    %244 = arith.truncf %242 : vector<8x16xf32> to vector<8x16xbf16>
    %cst_62 = arith.constant dense<0.000000e+00> : vector<8x64xf32>
    %245 = tpu.matmul %244, %243, %cst_62 {dimension_numbers = #tpu.dot_dimension_numbers<[1], [0], [0], [1], [0, 0, 1, 1], [], []>} : vector<8x16xbf16>, vector<16x64xbf16>, vector<8x64xf32> -> vector<8x64xf32>
    %246 = arith.addf %221, %245 : vector<8x64xf32>
    %247 = tpu.concatenate %141, %246 in 0 : vector<8x64xf32>, vector<8x64xf32> -> vector<16x64xf32>
    %c0_63 = arith.constant 0 : index
    %c0_64 = arith.constant 0 : index
    %c0_65 = arith.constant 0 : index
    %248 = vector.load %arg7[%c0_63, %c0_64, %c0_65] : memref<2x1x64xf32, #tpu.memory_space<vmem>>, vector<1x1x64xf32>
    %249 = vector.shape_cast %248 : vector<1x1x64xf32> to vector<1x64xf32>
    %250 = vector.broadcast %249 : vector<1x64xf32> to vector<16x64xf32>
    %251 = arith.addf %247, %250 : vector<16x64xf32>
    %252 = arith.addf %251, %22 : vector<16x64xf32>
    %c0_66 = arith.constant 0 : index
    %c0_67 = arith.constant 0 : index
    %c0_68 = arith.constant 0 : index
    %253 = vector.load %arg8[%c0_66, %c0_67, %c0_68] : memref<2x1x64xf32, #tpu.memory_space<vmem>>, vector<1x1x64xf32>
    %254 = vector.shape_cast %253 : vector<1x1x64xf32> to vector<1x64xf32>
    %c0_69 = arith.constant 0 : index
    %c0_70 = arith.constant 0 : index
    %c0_71 = arith.constant 0 : index
    %255 = vector.load %arg9[%c0_69, %c0_70, %c0_71] : memref<2x1x64xf32, #tpu.memory_space<vmem>>, vector<1x1x64xf32>
    %256 = vector.shape_cast %255 : vector<1x1x64xf32> to vector<1x64xf32>
    %cst_72 = arith.constant dense<0.000000e+00> : vector<16xf32>
    %257 = vector.multi_reduction <add>, %252, %cst_72 [1] : vector<16x64xf32> to vector<16xf32>
    %258 = vector.shape_cast %257 : vector<16xf32> to vector<16x1xf32>
    %cst_73 = arith.constant 6.400000e+01 : f32
    %259 = vector.broadcast %cst_73 : f32 to vector<16x1xf32>
    %260 = arith.divf %258, %259 : vector<16x1xf32>
    %261 = vector.broadcast %260 : vector<16x1xf32> to vector<16x64xf32>
    %262 = arith.subf %252, %261 : vector<16x64xf32>
    %263 = arith.mulf %262, %262 : vector<16x64xf32>
    %cst_74 = arith.constant dense<0.000000e+00> : vector<16xf32>
    %264 = vector.multi_reduction <add>, %263, %cst_74 [1] : vector<16x64xf32> to vector<16xf32>
    %265 = vector.shape_cast %264 : vector<16xf32> to vector<16x1xf32>
    %cst_75 = arith.constant 6.400000e+01 : f32
    %266 = vector.broadcast %cst_75 : f32 to vector<16x1xf32>
    %267 = arith.divf %265, %266 : vector<16x1xf32>
    %cst_76 = arith.constant 9.99999974E-6 : f32
    %268 = vector.broadcast %cst_76 : f32 to vector<16x1xf32>
    %269 = arith.addf %267, %268 : vector<16x1xf32>
    %270 = math.rsqrt %269 : vector<16x1xf32>
    %271 = vector.broadcast %270 : vector<16x1xf32> to vector<16x64xf32>
    %272 = arith.mulf %262, %271 : vector<16x64xf32>
    %273 = vector.broadcast %254 : vector<1x64xf32> to vector<16x64xf32>
    %274 = arith.mulf %272, %273 : vector<16x64xf32>
    %275 = vector.broadcast %256 : vector<1x64xf32> to vector<16x64xf32>
    %276 = arith.addf %274, %275 : vector<16x64xf32>
    %c0_77 = arith.constant 0 : index
    %c0_78 = arith.constant 0 : index
    %c0_79 = arith.constant 0 : index
    %277 = vector.load %arg10[%c0_77, %c0_78, %c0_79] : memref<2x64x128xbf16, #tpu.memory_space<vmem>>, vector<1x64x128xbf16>
    %278 = vector.shape_cast %277 : vector<1x64x128xbf16> to vector<64x128xbf16>
    %279 = arith.truncf %276 : vector<16x64xf32> to vector<16x64xbf16>
    %cst_80 = arith.constant dense<0.000000e+00> : vector<16x128xf32>
    %280 = tpu.matmul %279, %278, %cst_80 {dimension_numbers = #tpu.dot_dimension_numbers<[1], [0], [0], [1], [0, 0, 1, 1], [], []>} : vector<16x64xbf16>, vector<64x128xbf16>, vector<16x128xf32> -> vector<16x128xf32>
    %c0_81 = arith.constant 0 : index
    %c0_82 = arith.constant 0 : index
    %c0_83 = arith.constant 0 : index
    %281 = vector.load %arg11[%c0_81, %c0_82, %c0_83] : memref<2x1x128xf32, #tpu.memory_space<vmem>>, vector<1x1x128xf32>
    %282 = vector.shape_cast %281 : vector<1x1x128xf32> to vector<1x128xf32>
    %283 = vector.broadcast %282 : vector<1x128xf32> to vector<16x128xf32>
    %284 = arith.addf %280, %283 : vector<16x128xf32>
    %cst_84 = arith.constant 5.000000e-01 : f32
    %285 = vector.broadcast %cst_84 : f32 to vector<16x128xf32>
    %286 = arith.mulf %285, %284 : vector<16x128xf32>
    %cst_85 = arith.constant 4.471500e-02 : f32
    %287 = vector.broadcast %cst_85 : f32 to vector<16x128xf32>
    %288 = arith.mulf %287, %284 : vector<16x128xf32>
    %289 = arith.mulf %288, %284 : vector<16x128xf32>
    %290 = arith.mulf %289, %284 : vector<16x128xf32>
    %291 = arith.addf %284, %290 : vector<16x128xf32>
    %cst_86 = arith.constant 0.797884583 : f32
    %292 = vector.broadcast %cst_86 : f32 to vector<16x128xf32>
    %293 = arith.mulf %292, %291 : vector<16x128xf32>
    %294 = math.tanh %293 : vector<16x128xf32>
    %cst_87 = arith.constant 1.000000e+00 : f32
    %295 = vector.broadcast %cst_87 : f32 to vector<16x128xf32>
    %296 = arith.addf %295, %294 : vector<16x128xf32>
    %297 = arith.mulf %286, %296 : vector<16x128xf32>
    %c0_88 = arith.constant 0 : index
    %c0_89 = arith.constant 0 : index
    %c0_90 = arith.constant 0 : index
    %298 = vector.load %arg12[%c0_88, %c0_89, %c0_90] : memref<2x128x64xbf16, #tpu.memory_space<vmem>>, vector<1x128x64xbf16>
    %299 = vector.shape_cast %298 : vector<1x128x64xbf16> to vector<128x64xbf16>
    %300 = arith.truncf %297 : vector<16x128xf32> to vector<16x128xbf16>
    %cst_91 = arith.constant dense<0.000000e+00> : vector<16x64xf32>
    %301 = tpu.matmul %300, %299, %cst_91 {dimension_numbers = #tpu.dot_dimension_numbers<[1], [0], [0], [1], [0, 0, 1, 1], [], []>} : vector<16x128xbf16>, vector<128x64xbf16>, vector<16x64xf32> -> vector<16x64xf32>
    %c0_92 = arith.constant 0 : index
    %c0_93 = arith.constant 0 : index
    %c0_94 = arith.constant 0 : index
    %302 = vector.load %arg13[%c0_92, %c0_93, %c0_94] : memref<2x1x64xf32, #tpu.memory_space<vmem>>, vector<1x1x64xf32>
    %303 = vector.shape_cast %302 : vector<1x1x64xf32> to vector<1x64xf32>
    %304 = vector.broadcast %303 : vector<1x64xf32> to vector<16x64xf32>
    %305 = arith.addf %301, %304 : vector<16x64xf32>
    %306 = arith.addf %305, %276 : vector<16x64xf32>
    %c0_95 = arith.constant 0 : index
    %c0_96 = arith.constant 0 : index
    %c0_97 = arith.constant 0 : index
    %307 = vector.load %arg14[%c0_95, %c0_96, %c0_97] : memref<2x1x64xf32, #tpu.memory_space<vmem>>, vector<1x1x64xf32>
    %308 = vector.shape_cast %307 : vector<1x1x64xf32> to vector<1x64xf32>
    %c0_98 = arith.constant 0 : index
    %c0_99 = arith.constant 0 : index
    %c0_100 = arith.constant 0 : index
    %309 = vector.load %arg15[%c0_98, %c0_99, %c0_100] : memref<2x1x64xf32, #tpu.memory_space<vmem>>, vector<1x1x64xf32>
    %310 = vector.shape_cast %309 : vector<1x1x64xf32> to vector<1x64xf32>
    %cst_101 = arith.constant dense<0.000000e+00> : vector<16xf32>
    %311 = vector.multi_reduction <add>, %306, %cst_101 [1] : vector<16x64xf32> to vector<16xf32>
    %312 = vector.shape_cast %311 : vector<16xf32> to vector<16x1xf32>
    %cst_102 = arith.constant 6.400000e+01 : f32
    %313 = vector.broadcast %cst_102 : f32 to vector<16x1xf32>
    %314 = arith.divf %312, %313 : vector<16x1xf32>
    %315 = vector.broadcast %314 : vector<16x1xf32> to vector<16x64xf32>
    %316 = arith.subf %306, %315 : vector<16x64xf32>
    %317 = arith.mulf %316, %316 : vector<16x64xf32>
    %cst_103 = arith.constant dense<0.000000e+00> : vector<16xf32>
    %318 = vector.multi_reduction <add>, %317, %cst_103 [1] : vector<16x64xf32> to vector<16xf32>
    %319 = vector.shape_cast %318 : vector<16xf32> to vector<16x1xf32>
    %cst_104 = arith.constant 6.400000e+01 : f32
    %320 = vector.broadcast %cst_104 : f32 to vector<16x1xf32>
    %321 = arith.divf %319, %320 : vector<16x1xf32>
    %cst_105 = arith.constant 9.99999974E-6 : f32
    %322 = vector.broadcast %cst_105 : f32 to vector<16x1xf32>
    %323 = arith.addf %321, %322 : vector<16x1xf32>
    %324 = math.rsqrt %323 : vector<16x1xf32>
    %325 = vector.broadcast %324 : vector<16x1xf32> to vector<16x64xf32>
    %326 = arith.mulf %316, %325 : vector<16x64xf32>
    %327 = vector.broadcast %308 : vector<1x64xf32> to vector<16x64xf32>
    %328 = arith.mulf %326, %327 : vector<16x64xf32>
    %329 = vector.broadcast %310 : vector<1x64xf32> to vector<16x64xf32>
    %330 = arith.addf %328, %329 : vector<16x64xf32>
    %c1 = arith.constant 1 : index
    %c0_106 = arith.constant 0 : index
    %c0_107 = arith.constant 0 : index
    %331 = vector.load %arg4[%c1, %c0_106, %c0_107] : memref<2x64x192xbf16, #tpu.memory_space<vmem>>, vector<1x64x192xbf16>
    %332 = vector.shape_cast %331 : vector<1x64x192xbf16> to vector<64x192xbf16>
    %333 = arith.truncf %330 : vector<16x64xf32> to vector<16x64xbf16>
    %cst_108 = arith.constant dense<0.000000e+00> : vector<16x192xf32>
    %334 = tpu.matmul %333, %332, %cst_108 {dimension_numbers = #tpu.dot_dimension_numbers<[1], [0], [0], [1], [0, 0, 1, 1], [], []>} : vector<16x64xbf16>, vector<64x192xbf16>, vector<16x192xf32> -> vector<16x192xf32>
    %c1_109 = arith.constant 1 : index
    %c0_110 = arith.constant 0 : index
    %c0_111 = arith.constant 0 : index
    %335 = vector.load %arg5[%c1_109, %c0_110, %c0_111] : memref<2x1x192xf32, #tpu.memory_space<vmem>>, vector<1x1x192xf32>
    %336 = vector.shape_cast %335 : vector<1x1x192xf32> to vector<1x192xf32>
    %337 = vector.broadcast %336 : vector<1x192xf32> to vector<16x192xf32>
    %338 = arith.addf %334, %337 : vector<16x192xf32>
    %339 = vector.extract_strided_slice %338 {offsets = [0, 0], sizes = [16, 64], strides = [1, 1]} : vector<16x192xf32> to vector<16x64xf32>
    %340 = vector.extract_strided_slice %338 {offsets = [0, 64], sizes = [16, 64], strides = [1, 1]} : vector<16x192xf32> to vector<16x64xf32>
    %341 = vector.extract_strided_slice %338 {offsets = [0, 128], sizes = [16, 64], strides = [1, 1]} : vector<16x192xf32> to vector<16x64xf32>
    %c1_112 = arith.constant 1 : index
    %c0_113 = arith.constant 0 : index
    %c0_114 = arith.constant 0 : index
    %342 = vector.load %arg6[%c1_112, %c0_113, %c0_114] : memref<2x64x64xbf16, #tpu.memory_space<vmem>>, vector<1x64x64xbf16>
    %343 = vector.shape_cast %342 : vector<1x64x64xbf16> to vector<64x64xbf16>
    %344 = vector.extract_strided_slice %339 {offsets = [0, 0], sizes = [8, 64], strides = [1, 1]} : vector<16x64xf32> to vector<8x64xf32>
    %345 = vector.extract_strided_slice %340 {offsets = [0, 0], sizes = [8, 64], strides = [1, 1]} : vector<16x64xf32> to vector<8x64xf32>
    %346 = vector.extract_strided_slice %341 {offsets = [0, 0], sizes = [8, 64], strides = [1, 1]} : vector<16x64xf32> to vector<8x64xf32>
    %347 = vector.extract_strided_slice %23 {offsets = [0, 0], sizes = [1, 8], strides = [1, 1]} : vector<2x8xf32> to vector<1x8xf32>
    %cst_115 = arith.constant 0.000000e+00 : f32
    %348 = vector.broadcast %cst_115 : f32 to vector<8x64xf32>
    %349 = vector.extract_strided_slice %344 {offsets = [0, 0], sizes = [8, 16], strides = [1, 1]} : vector<8x64xf32> to vector<8x16xf32>
    %350 = vector.extract_strided_slice %345 {offsets = [0, 0], sizes = [8, 16], strides = [1, 1]} : vector<8x64xf32> to vector<8x16xf32>
    %351 = arith.truncf %349 : vector<8x16xf32> to vector<8x16xbf16>
    %352 = arith.truncf %350 : vector<8x16xf32> to vector<8x16xbf16>
    %cst_116 = arith.constant dense<0.000000e+00> : vector<8x8xf32>
    %353 = tpu.matmul %351, %352, %cst_116 {dimension_numbers = #tpu.dot_dimension_numbers<[1], [1], [0], [0], [0, 0, 1, 0], [], []>} : vector<8x16xbf16>, vector<8x16xbf16>, vector<8x8xf32> -> vector<8x8xf32>
    %354 = vector.broadcast %347 : vector<1x8xf32> to vector<8x8xf32>
    %355 = arith.addf %353, %354 : vector<8x8xf32>
    %cst_117 = arith.constant dense<0xFF800000> : vector<8xf32>
    %356 = vector.multi_reduction <maximumf>, %355, %cst_117 [1] : vector<8x8xf32> to vector<8xf32>
    %357 = vector.shape_cast %356 : vector<8xf32> to vector<8x1xf32>
    %358 = vector.broadcast %357 : vector<8x1xf32> to vector<8x8xf32>
    %359 = arith.subf %355, %358 : vector<8x8xf32>
    %360 = math.exp %359 : vector<8x8xf32>
    %cst_118 = arith.constant dense<0.000000e+00> : vector<8xf32>
    %361 = vector.multi_reduction <add>, %360, %cst_118 [1] : vector<8x8xf32> to vector<8xf32>
    %362 = vector.shape_cast %361 : vector<8xf32> to vector<8x1xf32>
    %363 = tpu.reciprocal %362 {approx = true} : vector<8x1xf32> -> vector<8x1xf32>
    %364 = vector.broadcast %363 : vector<8x1xf32> to vector<8x8xf32>
    %365 = arith.mulf %360, %364 : vector<8x8xf32>
    %366 = vector.extract_strided_slice %346 {offsets = [0, 0], sizes = [8, 16], strides = [1, 1]} : vector<8x64xf32> to vector<8x16xf32>
    %367 = arith.truncf %365 : vector<8x8xf32> to vector<8x8xbf16>
    %368 = arith.truncf %366 : vector<8x16xf32> to vector<8x16xbf16>
    %cst_119 = arith.constant dense<0.000000e+00> : vector<8x16xf32>
    %369 = tpu.matmul %367, %368, %cst_119 {dimension_numbers = #tpu.dot_dimension_numbers<[1], [0], [0], [1], [0, 0, 1, 1], [], []>} : vector<8x8xbf16>, vector<8x16xbf16>, vector<8x16xf32> -> vector<8x16xf32>
    %370 = vector.extract_strided_slice %343 {offsets = [0, 0], sizes = [16, 64], strides = [1, 1]} : vector<64x64xbf16> to vector<16x64xbf16>
    %371 = arith.truncf %369 : vector<8x16xf32> to vector<8x16xbf16>
    %cst_120 = arith.constant dense<0.000000e+00> : vector<8x64xf32>
    %372 = tpu.matmul %371, %370, %cst_120 {dimension_numbers = #tpu.dot_dimension_numbers<[1], [0], [0], [1], [0, 0, 1, 1], [], []>} : vector<8x16xbf16>, vector<16x64xbf16>, vector<8x64xf32> -> vector<8x64xf32>
    %373 = arith.addf %348, %372 : vector<8x64xf32>
    %374 = vector.extract_strided_slice %344 {offsets = [0, 16], sizes = [8, 16], strides = [1, 1]} : vector<8x64xf32> to vector<8x16xf32>
    %375 = vector.extract_strided_slice %345 {offsets = [0, 16], sizes = [8, 16], strides = [1, 1]} : vector<8x64xf32> to vector<8x16xf32>
    %376 = arith.truncf %374 : vector<8x16xf32> to vector<8x16xbf16>
    %377 = arith.truncf %375 : vector<8x16xf32> to vector<8x16xbf16>
    %cst_121 = arith.constant dense<0.000000e+00> : vector<8x8xf32>
    %378 = tpu.matmul %376, %377, %cst_121 {dimension_numbers = #tpu.dot_dimension_numbers<[1], [1], [0], [0], [0, 0, 1, 0], [], []>} : vector<8x16xbf16>, vector<8x16xbf16>, vector<8x8xf32> -> vector<8x8xf32>
    %379 = vector.broadcast %347 : vector<1x8xf32> to vector<8x8xf32>
    %380 = arith.addf %378, %379 : vector<8x8xf32>
    %cst_122 = arith.constant dense<0xFF800000> : vector<8xf32>
    %381 = vector.multi_reduction <maximumf>, %380, %cst_122 [1] : vector<8x8xf32> to vector<8xf32>
    %382 = vector.shape_cast %381 : vector<8xf32> to vector<8x1xf32>
    %383 = vector.broadcast %382 : vector<8x1xf32> to vector<8x8xf32>
    %384 = arith.subf %380, %383 : vector<8x8xf32>
    %385 = math.exp %384 : vector<8x8xf32>
    %cst_123 = arith.constant dense<0.000000e+00> : vector<8xf32>
    %386 = vector.multi_reduction <add>, %385, %cst_123 [1] : vector<8x8xf32> to vector<8xf32>
    %387 = vector.shape_cast %386 : vector<8xf32> to vector<8x1xf32>
    %388 = tpu.reciprocal %387 {approx = true} : vector<8x1xf32> -> vector<8x1xf32>
    %389 = vector.broadcast %388 : vector<8x1xf32> to vector<8x8xf32>
    %390 = arith.mulf %385, %389 : vector<8x8xf32>
    %391 = vector.extract_strided_slice %346 {offsets = [0, 16], sizes = [8, 16], strides = [1, 1]} : vector<8x64xf32> to vector<8x16xf32>
    %392 = arith.truncf %390 : vector<8x8xf32> to vector<8x8xbf16>
    %393 = arith.truncf %391 : vector<8x16xf32> to vector<8x16xbf16>
    %cst_124 = arith.constant dense<0.000000e+00> : vector<8x16xf32>
    %394 = tpu.matmul %392, %393, %cst_124 {dimension_numbers = #tpu.dot_dimension_numbers<[1], [0], [0], [1], [0, 0, 1, 1], [], []>} : vector<8x8xbf16>, vector<8x16xbf16>, vector<8x16xf32> -> vector<8x16xf32>
    %395 = vector.extract_strided_slice %343 {offsets = [16, 0], sizes = [16, 64], strides = [1, 1]} : vector<64x64xbf16> to vector<16x64xbf16>
    %396 = arith.truncf %394 : vector<8x16xf32> to vector<8x16xbf16>
    %cst_125 = arith.constant dense<0.000000e+00> : vector<8x64xf32>
    %397 = tpu.matmul %396, %395, %cst_125 {dimension_numbers = #tpu.dot_dimension_numbers<[1], [0], [0], [1], [0, 0, 1, 1], [], []>} : vector<8x16xbf16>, vector<16x64xbf16>, vector<8x64xf32> -> vector<8x64xf32>
    %398 = arith.addf %373, %397 : vector<8x64xf32>
    %399 = vector.extract_strided_slice %344 {offsets = [0, 32], sizes = [8, 16], strides = [1, 1]} : vector<8x64xf32> to vector<8x16xf32>
    %400 = vector.extract_strided_slice %345 {offsets = [0, 32], sizes = [8, 16], strides = [1, 1]} : vector<8x64xf32> to vector<8x16xf32>
    %401 = arith.truncf %399 : vector<8x16xf32> to vector<8x16xbf16>
    %402 = arith.truncf %400 : vector<8x16xf32> to vector<8x16xbf16>
    %cst_126 = arith.constant dense<0.000000e+00> : vector<8x8xf32>
    %403 = tpu.matmul %401, %402, %cst_126 {dimension_numbers = #tpu.dot_dimension_numbers<[1], [1], [0], [0], [0, 0, 1, 0], [], []>} : vector<8x16xbf16>, vector<8x16xbf16>, vector<8x8xf32> -> vector<8x8xf32>
    %404 = vector.broadcast %347 : vector<1x8xf32> to vector<8x8xf32>
    %405 = arith.addf %403, %404 : vector<8x8xf32>
    %cst_127 = arith.constant dense<0xFF800000> : vector<8xf32>
    %406 = vector.multi_reduction <maximumf>, %405, %cst_127 [1] : vector<8x8xf32> to vector<8xf32>
    %407 = vector.shape_cast %406 : vector<8xf32> to vector<8x1xf32>
    %408 = vector.broadcast %407 : vector<8x1xf32> to vector<8x8xf32>
    %409 = arith.subf %405, %408 : vector<8x8xf32>
    %410 = math.exp %409 : vector<8x8xf32>
    %cst_128 = arith.constant dense<0.000000e+00> : vector<8xf32>
    %411 = vector.multi_reduction <add>, %410, %cst_128 [1] : vector<8x8xf32> to vector<8xf32>
    %412 = vector.shape_cast %411 : vector<8xf32> to vector<8x1xf32>
    %413 = tpu.reciprocal %412 {approx = true} : vector<8x1xf32> -> vector<8x1xf32>
    %414 = vector.broadcast %413 : vector<8x1xf32> to vector<8x8xf32>
    %415 = arith.mulf %410, %414 : vector<8x8xf32>
    %416 = vector.extract_strided_slice %346 {offsets = [0, 32], sizes = [8, 16], strides = [1, 1]} : vector<8x64xf32> to vector<8x16xf32>
    %417 = arith.truncf %415 : vector<8x8xf32> to vector<8x8xbf16>
    %418 = arith.truncf %416 : vector<8x16xf32> to vector<8x16xbf16>
    %cst_129 = arith.constant dense<0.000000e+00> : vector<8x16xf32>
    %419 = tpu.matmul %417, %418, %cst_129 {dimension_numbers = #tpu.dot_dimension_numbers<[1], [0], [0], [1], [0, 0, 1, 1], [], []>} : vector<8x8xbf16>, vector<8x16xbf16>, vector<8x16xf32> -> vector<8x16xf32>
    %420 = vector.extract_strided_slice %343 {offsets = [32, 0], sizes = [16, 64], strides = [1, 1]} : vector<64x64xbf16> to vector<16x64xbf16>
    %421 = arith.truncf %419 : vector<8x16xf32> to vector<8x16xbf16>
    %cst_130 = arith.constant dense<0.000000e+00> : vector<8x64xf32>
    %422 = tpu.matmul %421, %420, %cst_130 {dimension_numbers = #tpu.dot_dimension_numbers<[1], [0], [0], [1], [0, 0, 1, 1], [], []>} : vector<8x16xbf16>, vector<16x64xbf16>, vector<8x64xf32> -> vector<8x64xf32>
    %423 = arith.addf %398, %422 : vector<8x64xf32>
    %424 = vector.extract_strided_slice %344 {offsets = [0, 48], sizes = [8, 16], strides = [1, 1]} : vector<8x64xf32> to vector<8x16xf32>
    %425 = vector.extract_strided_slice %345 {offsets = [0, 48], sizes = [8, 16], strides = [1, 1]} : vector<8x64xf32> to vector<8x16xf32>
    %426 = arith.truncf %424 : vector<8x16xf32> to vector<8x16xbf16>
    %427 = arith.truncf %425 : vector<8x16xf32> to vector<8x16xbf16>
    %cst_131 = arith.constant dense<0.000000e+00> : vector<8x8xf32>
    %428 = tpu.matmul %426, %427, %cst_131 {dimension_numbers = #tpu.dot_dimension_numbers<[1], [1], [0], [0], [0, 0, 1, 0], [], []>} : vector<8x16xbf16>, vector<8x16xbf16>, vector<8x8xf32> -> vector<8x8xf32>
    %429 = vector.broadcast %347 : vector<1x8xf32> to vector<8x8xf32>
    %430 = arith.addf %428, %429 : vector<8x8xf32>
    %cst_132 = arith.constant dense<0xFF800000> : vector<8xf32>
    %431 = vector.multi_reduction <maximumf>, %430, %cst_132 [1] : vector<8x8xf32> to vector<8xf32>
    %432 = vector.shape_cast %431 : vector<8xf32> to vector<8x1xf32>
    %433 = vector.broadcast %432 : vector<8x1xf32> to vector<8x8xf32>
    %434 = arith.subf %430, %433 : vector<8x8xf32>
    %435 = math.exp %434 : vector<8x8xf32>
    %cst_133 = arith.constant dense<0.000000e+00> : vector<8xf32>
    %436 = vector.multi_reduction <add>, %435, %cst_133 [1] : vector<8x8xf32> to vector<8xf32>
    %437 = vector.shape_cast %436 : vector<8xf32> to vector<8x1xf32>
    %438 = tpu.reciprocal %437 {approx = true} : vector<8x1xf32> -> vector<8x1xf32>
    %439 = vector.broadcast %438 : vector<8x1xf32> to vector<8x8xf32>
    %440 = arith.mulf %435, %439 : vector<8x8xf32>
    %441 = vector.extract_strided_slice %346 {offsets = [0, 48], sizes = [8, 16], strides = [1, 1]} : vector<8x64xf32> to vector<8x16xf32>
    %442 = arith.truncf %440 : vector<8x8xf32> to vector<8x8xbf16>
    %443 = arith.truncf %441 : vector<8x16xf32> to vector<8x16xbf16>
    %cst_134 = arith.constant dense<0.000000e+00> : vector<8x16xf32>
    %444 = tpu.matmul %442, %443, %cst_134 {dimension_numbers = #tpu.dot_dimension_numbers<[1], [0], [0], [1], [0, 0, 1, 1], [], []>} : vector<8x8xbf16>, vector<8x16xbf16>, vector<8x16xf32> -> vector<8x16xf32>
    %445 = vector.extract_strided_slice %343 {offsets = [48, 0], sizes = [16, 64], strides = [1, 1]} : vector<64x64xbf16> to vector<16x64xbf16>
    %446 = arith.truncf %444 : vector<8x16xf32> to vector<8x16xbf16>
    %cst_135 = arith.constant dense<0.000000e+00> : vector<8x64xf32>
    %447 = tpu.matmul %446, %445, %cst_135 {dimension_numbers = #tpu.dot_dimension_numbers<[1], [0], [0], [1], [0, 0, 1, 1], [], []>} : vector<8x16xbf16>, vector<16x64xbf16>, vector<8x64xf32> -> vector<8x64xf32>
    %448 = arith.addf %423, %447 : vector<8x64xf32>
    %449 = vector.extract_strided_slice %339 {offsets = [8, 0], sizes = [8, 64], strides = [1, 1]} : vector<16x64xf32> to vector<8x64xf32>
    %450 = vector.extract_strided_slice %340 {offsets = [8, 0], sizes = [8, 64], strides = [1, 1]} : vector<16x64xf32> to vector<8x64xf32>
    %451 = vector.extract_strided_slice %341 {offsets = [8, 0], sizes = [8, 64], strides = [1, 1]} : vector<16x64xf32> to vector<8x64xf32>
    %452 = vector.extract_strided_slice %23 {offsets = [1, 0], sizes = [1, 8], strides = [1, 1]} : vector<2x8xf32> to vector<1x8xf32>
    %cst_136 = arith.constant 0.000000e+00 : f32
    %453 = vector.broadcast %cst_136 : f32 to vector<8x64xf32>
    %454 = vector.extract_strided_slice %449 {offsets = [0, 0], sizes = [8, 16], strides = [1, 1]} : vector<8x64xf32> to vector<8x16xf32>
    %455 = vector.extract_strided_slice %450 {offsets = [0, 0], sizes = [8, 16], strides = [1, 1]} : vector<8x64xf32> to vector<8x16xf32>
    %456 = arith.truncf %454 : vector<8x16xf32> to vector<8x16xbf16>
    %457 = arith.truncf %455 : vector<8x16xf32> to vector<8x16xbf16>
    %cst_137 = arith.constant dense<0.000000e+00> : vector<8x8xf32>
    %458 = tpu.matmul %456, %457, %cst_137 {dimension_numbers = #tpu.dot_dimension_numbers<[1], [1], [0], [0], [0, 0, 1, 0], [], []>} : vector<8x16xbf16>, vector<8x16xbf16>, vector<8x8xf32> -> vector<8x8xf32>
    %459 = vector.broadcast %452 : vector<1x8xf32> to vector<8x8xf32>
    %460 = arith.addf %458, %459 : vector<8x8xf32>
    %cst_138 = arith.constant dense<0xFF800000> : vector<8xf32>
    %461 = vector.multi_reduction <maximumf>, %460, %cst_138 [1] : vector<8x8xf32> to vector<8xf32>
    %462 = vector.shape_cast %461 : vector<8xf32> to vector<8x1xf32>
    %463 = vector.broadcast %462 : vector<8x1xf32> to vector<8x8xf32>
    %464 = arith.subf %460, %463 : vector<8x8xf32>
    %465 = math.exp %464 : vector<8x8xf32>
    %cst_139 = arith.constant dense<0.000000e+00> : vector<8xf32>
    %466 = vector.multi_reduction <add>, %465, %cst_139 [1] : vector<8x8xf32> to vector<8xf32>
    %467 = vector.shape_cast %466 : vector<8xf32> to vector<8x1xf32>
    %468 = tpu.reciprocal %467 {approx = true} : vector<8x1xf32> -> vector<8x1xf32>
    %469 = vector.broadcast %468 : vector<8x1xf32> to vector<8x8xf32>
    %470 = arith.mulf %465, %469 : vector<8x8xf32>
    %471 = vector.extract_strided_slice %451 {offsets = [0, 0], sizes = [8, 16], strides = [1, 1]} : vector<8x64xf32> to vector<8x16xf32>
    %472 = arith.truncf %470 : vector<8x8xf32> to vector<8x8xbf16>
    %473 = arith.truncf %471 : vector<8x16xf32> to vector<8x16xbf16>
    %cst_140 = arith.constant dense<0.000000e+00> : vector<8x16xf32>
    %474 = tpu.matmul %472, %473, %cst_140 {dimension_numbers = #tpu.dot_dimension_numbers<[1], [0], [0], [1], [0, 0, 1, 1], [], []>} : vector<8x8xbf16>, vector<8x16xbf16>, vector<8x16xf32> -> vector<8x16xf32>
    %475 = vector.extract_strided_slice %343 {offsets = [0, 0], sizes = [16, 64], strides = [1, 1]} : vector<64x64xbf16> to vector<16x64xbf16>
    %476 = arith.truncf %474 : vector<8x16xf32> to vector<8x16xbf16>
    %cst_141 = arith.constant dense<0.000000e+00> : vector<8x64xf32>
    %477 = tpu.matmul %476, %475, %cst_141 {dimension_numbers = #tpu.dot_dimension_numbers<[1], [0], [0], [1], [0, 0, 1, 1], [], []>} : vector<8x16xbf16>, vector<16x64xbf16>, vector<8x64xf32> -> vector<8x64xf32>
    %478 = arith.addf %453, %477 : vector<8x64xf32>
    %479 = vector.extract_strided_slice %449 {offsets = [0, 16], sizes = [8, 16], strides = [1, 1]} : vector<8x64xf32> to vector<8x16xf32>
    %480 = vector.extract_strided_slice %450 {offsets = [0, 16], sizes = [8, 16], strides = [1, 1]} : vector<8x64xf32> to vector<8x16xf32>
    %481 = arith.truncf %479 : vector<8x16xf32> to vector<8x16xbf16>
    %482 = arith.truncf %480 : vector<8x16xf32> to vector<8x16xbf16>
    %cst_142 = arith.constant dense<0.000000e+00> : vector<8x8xf32>
    %483 = tpu.matmul %481, %482, %cst_142 {dimension_numbers = #tpu.dot_dimension_numbers<[1], [1], [0], [0], [0, 0, 1, 0], [], []>} : vector<8x16xbf16>, vector<8x16xbf16>, vector<8x8xf32> -> vector<8x8xf32>
    %484 = vector.broadcast %452 : vector<1x8xf32> to vector<8x8xf32>
    %485 = arith.addf %483, %484 : vector<8x8xf32>
    %cst_143 = arith.constant dense<0xFF800000> : vector<8xf32>
    %486 = vector.multi_reduction <maximumf>, %485, %cst_143 [1] : vector<8x8xf32> to vector<8xf32>
    %487 = vector.shape_cast %486 : vector<8xf32> to vector<8x1xf32>
    %488 = vector.broadcast %487 : vector<8x1xf32> to vector<8x8xf32>
    %489 = arith.subf %485, %488 : vector<8x8xf32>
    %490 = math.exp %489 : vector<8x8xf32>
    %cst_144 = arith.constant dense<0.000000e+00> : vector<8xf32>
    %491 = vector.multi_reduction <add>, %490, %cst_144 [1] : vector<8x8xf32> to vector<8xf32>
    %492 = vector.shape_cast %491 : vector<8xf32> to vector<8x1xf32>
    %493 = tpu.reciprocal %492 {approx = true} : vector<8x1xf32> -> vector<8x1xf32>
    %494 = vector.broadcast %493 : vector<8x1xf32> to vector<8x8xf32>
    %495 = arith.mulf %490, %494 : vector<8x8xf32>
    %496 = vector.extract_strided_slice %451 {offsets = [0, 16], sizes = [8, 16], strides = [1, 1]} : vector<8x64xf32> to vector<8x16xf32>
    %497 = arith.truncf %495 : vector<8x8xf32> to vector<8x8xbf16>
    %498 = arith.truncf %496 : vector<8x16xf32> to vector<8x16xbf16>
    %cst_145 = arith.constant dense<0.000000e+00> : vector<8x16xf32>
    %499 = tpu.matmul %497, %498, %cst_145 {dimension_numbers = #tpu.dot_dimension_numbers<[1], [0], [0], [1], [0, 0, 1, 1], [], []>} : vector<8x8xbf16>, vector<8x16xbf16>, vector<8x16xf32> -> vector<8x16xf32>
    %500 = vector.extract_strided_slice %343 {offsets = [16, 0], sizes = [16, 64], strides = [1, 1]} : vector<64x64xbf16> to vector<16x64xbf16>
    %501 = arith.truncf %499 : vector<8x16xf32> to vector<8x16xbf16>
    %cst_146 = arith.constant dense<0.000000e+00> : vector<8x64xf32>
    %502 = tpu.matmul %501, %500, %cst_146 {dimension_numbers = #tpu.dot_dimension_numbers<[1], [0], [0], [1], [0, 0, 1, 1], [], []>} : vector<8x16xbf16>, vector<16x64xbf16>, vector<8x64xf32> -> vector<8x64xf32>
    %503 = arith.addf %478, %502 : vector<8x64xf32>
    %504 = vector.extract_strided_slice %449 {offsets = [0, 32], sizes = [8, 16], strides = [1, 1]} : vector<8x64xf32> to vector<8x16xf32>
    %505 = vector.extract_strided_slice %450 {offsets = [0, 32], sizes = [8, 16], strides = [1, 1]} : vector<8x64xf32> to vector<8x16xf32>
    %506 = arith.truncf %504 : vector<8x16xf32> to vector<8x16xbf16>
    %507 = arith.truncf %505 : vector<8x16xf32> to vector<8x16xbf16>
    %cst_147 = arith.constant dense<0.000000e+00> : vector<8x8xf32>
    %508 = tpu.matmul %506, %507, %cst_147 {dimension_numbers = #tpu.dot_dimension_numbers<[1], [1], [0], [0], [0, 0, 1, 0], [], []>} : vector<8x16xbf16>, vector<8x16xbf16>, vector<8x8xf32> -> vector<8x8xf32>
    %509 = vector.broadcast %452 : vector<1x8xf32> to vector<8x8xf32>
    %510 = arith.addf %508, %509 : vector<8x8xf32>
    %cst_148 = arith.constant dense<0xFF800000> : vector<8xf32>
    %511 = vector.multi_reduction <maximumf>, %510, %cst_148 [1] : vector<8x8xf32> to vector<8xf32>
    %512 = vector.shape_cast %511 : vector<8xf32> to vector<8x1xf32>
    %513 = vector.broadcast %512 : vector<8x1xf32> to vector<8x8xf32>
    %514 = arith.subf %510, %513 : vector<8x8xf32>
    %515 = math.exp %514 : vector<8x8xf32>
    %cst_149 = arith.constant dense<0.000000e+00> : vector<8xf32>
    %516 = vector.multi_reduction <add>, %515, %cst_149 [1] : vector<8x8xf32> to vector<8xf32>
    %517 = vector.shape_cast %516 : vector<8xf32> to vector<8x1xf32>
    %518 = tpu.reciprocal %517 {approx = true} : vector<8x1xf32> -> vector<8x1xf32>
    %519 = vector.broadcast %518 : vector<8x1xf32> to vector<8x8xf32>
    %520 = arith.mulf %515, %519 : vector<8x8xf32>
    %521 = vector.extract_strided_slice %451 {offsets = [0, 32], sizes = [8, 16], strides = [1, 1]} : vector<8x64xf32> to vector<8x16xf32>
    %522 = arith.truncf %520 : vector<8x8xf32> to vector<8x8xbf16>
    %523 = arith.truncf %521 : vector<8x16xf32> to vector<8x16xbf16>
    %cst_150 = arith.constant dense<0.000000e+00> : vector<8x16xf32>
    %524 = tpu.matmul %522, %523, %cst_150 {dimension_numbers = #tpu.dot_dimension_numbers<[1], [0], [0], [1], [0, 0, 1, 1], [], []>} : vector<8x8xbf16>, vector<8x16xbf16>, vector<8x16xf32> -> vector<8x16xf32>
    %525 = vector.extract_strided_slice %343 {offsets = [32, 0], sizes = [16, 64], strides = [1, 1]} : vector<64x64xbf16> to vector<16x64xbf16>
    %526 = arith.truncf %524 : vector<8x16xf32> to vector<8x16xbf16>
    %cst_151 = arith.constant dense<0.000000e+00> : vector<8x64xf32>
    %527 = tpu.matmul %526, %525, %cst_151 {dimension_numbers = #tpu.dot_dimension_numbers<[1], [0], [0], [1], [0, 0, 1, 1], [], []>} : vector<8x16xbf16>, vector<16x64xbf16>, vector<8x64xf32> -> vector<8x64xf32>
    %528 = arith.addf %503, %527 : vector<8x64xf32>
    %529 = vector.extract_strided_slice %449 {offsets = [0, 48], sizes = [8, 16], strides = [1, 1]} : vector<8x64xf32> to vector<8x16xf32>
    %530 = vector.extract_strided_slice %450 {offsets = [0, 48], sizes = [8, 16], strides = [1, 1]} : vector<8x64xf32> to vector<8x16xf32>
    %531 = arith.truncf %529 : vector<8x16xf32> to vector<8x16xbf16>
    %532 = arith.truncf %530 : vector<8x16xf32> to vector<8x16xbf16>
    %cst_152 = arith.constant dense<0.000000e+00> : vector<8x8xf32>
    %533 = tpu.matmul %531, %532, %cst_152 {dimension_numbers = #tpu.dot_dimension_numbers<[1], [1], [0], [0], [0, 0, 1, 0], [], []>} : vector<8x16xbf16>, vector<8x16xbf16>, vector<8x8xf32> -> vector<8x8xf32>
    %534 = vector.broadcast %452 : vector<1x8xf32> to vector<8x8xf32>
    %535 = arith.addf %533, %534 : vector<8x8xf32>
    %cst_153 = arith.constant dense<0xFF800000> : vector<8xf32>
    %536 = vector.multi_reduction <maximumf>, %535, %cst_153 [1] : vector<8x8xf32> to vector<8xf32>
    %537 = vector.shape_cast %536 : vector<8xf32> to vector<8x1xf32>
    %538 = vector.broadcast %537 : vector<8x1xf32> to vector<8x8xf32>
    %539 = arith.subf %535, %538 : vector<8x8xf32>
    %540 = math.exp %539 : vector<8x8xf32>
    %cst_154 = arith.constant dense<0.000000e+00> : vector<8xf32>
    %541 = vector.multi_reduction <add>, %540, %cst_154 [1] : vector<8x8xf32> to vector<8xf32>
    %542 = vector.shape_cast %541 : vector<8xf32> to vector<8x1xf32>
    %543 = tpu.reciprocal %542 {approx = true} : vector<8x1xf32> -> vector<8x1xf32>
    %544 = vector.broadcast %543 : vector<8x1xf32> to vector<8x8xf32>
    %545 = arith.mulf %540, %544 : vector<8x8xf32>
    %546 = vector.extract_strided_slice %451 {offsets = [0, 48], sizes = [8, 16], strides = [1, 1]} : vector<8x64xf32> to vector<8x16xf32>
    %547 = arith.truncf %545 : vector<8x8xf32> to vector<8x8xbf16>
    %548 = arith.truncf %546 : vector<8x16xf32> to vector<8x16xbf16>
    %cst_155 = arith.constant dense<0.000000e+00> : vector<8x16xf32>
    %549 = tpu.matmul %547, %548, %cst_155 {dimension_numbers = #tpu.dot_dimension_numbers<[1], [0], [0], [1], [0, 0, 1, 1], [], []>} : vector<8x8xbf16>, vector<8x16xbf16>, vector<8x16xf32> -> vector<8x16xf32>
    %550 = vector.extract_strided_slice %343 {offsets = [48, 0], sizes = [16, 64], strides = [1, 1]} : vector<64x64xbf16> to vector<16x64xbf16>
    %551 = arith.truncf %549 : vector<8x16xf32> to vector<8x16xbf16>
    %cst_156 = arith.constant dense<0.000000e+00> : vector<8x64xf32>
    %552 = tpu.matmul %551, %550, %cst_156 {dimension_numbers = #tpu.dot_dimension_numbers<[1], [0], [0], [1], [0, 0, 1, 1], [], []>} : vector<8x16xbf16>, vector<16x64xbf16>, vector<8x64xf32> -> vector<8x64xf32>
    %553 = arith.addf %528, %552 : vector<8x64xf32>
    %554 = tpu.concatenate %448, %553 in 0 : vector<8x64xf32>, vector<8x64xf32> -> vector<16x64xf32>
    %c1_157 = arith.constant 1 : index
    %c0_158 = arith.constant 0 : index
    %c0_159 = arith.constant 0 : index
    %555 = vector.load %arg7[%c1_157, %c0_158, %c0_159] : memref<2x1x64xf32, #tpu.memory_space<vmem>>, vector<1x1x64xf32>
    %556 = vector.shape_cast %555 : vector<1x1x64xf32> to vector<1x64xf32>
    %557 = vector.broadcast %556 : vector<1x64xf32> to vector<16x64xf32>
    %558 = arith.addf %554, %557 : vector<16x64xf32>
    %559 = arith.addf %558, %330 : vector<16x64xf32>
    %c1_160 = arith.constant 1 : index
    %c0_161 = arith.constant 0 : index
    %c0_162 = arith.constant 0 : index
    %560 = vector.load %arg8[%c1_160, %c0_161, %c0_162] : memref<2x1x64xf32, #tpu.memory_space<vmem>>, vector<1x1x64xf32>
    %561 = vector.shape_cast %560 : vector<1x1x64xf32> to vector<1x64xf32>
    %c1_163 = arith.constant 1 : index
    %c0_164 = arith.constant 0 : index
    %c0_165 = arith.constant 0 : index
    %562 = vector.load %arg9[%c1_163, %c0_164, %c0_165] : memref<2x1x64xf32, #tpu.memory_space<vmem>>, vector<1x1x64xf32>
    %563 = vector.shape_cast %562 : vector<1x1x64xf32> to vector<1x64xf32>
    %cst_166 = arith.constant dense<0.000000e+00> : vector<16xf32>
    %564 = vector.multi_reduction <add>, %559, %cst_166 [1] : vector<16x64xf32> to vector<16xf32>
    %565 = vector.shape_cast %564 : vector<16xf32> to vector<16x1xf32>
    %cst_167 = arith.constant 6.400000e+01 : f32
    %566 = vector.broadcast %cst_167 : f32 to vector<16x1xf32>
    %567 = arith.divf %565, %566 : vector<16x1xf32>
    %568 = vector.broadcast %567 : vector<16x1xf32> to vector<16x64xf32>
    %569 = arith.subf %559, %568 : vector<16x64xf32>
    %570 = arith.mulf %569, %569 : vector<16x64xf32>
    %cst_168 = arith.constant dense<0.000000e+00> : vector<16xf32>
    %571 = vector.multi_reduction <add>, %570, %cst_168 [1] : vector<16x64xf32> to vector<16xf32>
    %572 = vector.shape_cast %571 : vector<16xf32> to vector<16x1xf32>
    %cst_169 = arith.constant 6.400000e+01 : f32
    %573 = vector.broadcast %cst_169 : f32 to vector<16x1xf32>
    %574 = arith.divf %572, %573 : vector<16x1xf32>
    %cst_170 = arith.constant 9.99999974E-6 : f32
    %575 = vector.broadcast %cst_170 : f32 to vector<16x1xf32>
    %576 = arith.addf %574, %575 : vector<16x1xf32>
    %577 = math.rsqrt %576 : vector<16x1xf32>
    %578 = vector.broadcast %577 : vector<16x1xf32> to vector<16x64xf32>
    %579 = arith.mulf %569, %578 : vector<16x64xf32>
    %580 = vector.broadcast %561 : vector<1x64xf32> to vector<16x64xf32>
    %581 = arith.mulf %579, %580 : vector<16x64xf32>
    %582 = vector.broadcast %563 : vector<1x64xf32> to vector<16x64xf32>
    %583 = arith.addf %581, %582 : vector<16x64xf32>
    %c1_171 = arith.constant 1 : index
    %c0_172 = arith.constant 0 : index
    %c0_173 = arith.constant 0 : index
    %584 = vector.load %arg10[%c1_171, %c0_172, %c0_173] : memref<2x64x128xbf16, #tpu.memory_space<vmem>>, vector<1x64x128xbf16>
    %585 = vector.shape_cast %584 : vector<1x64x128xbf16> to vector<64x128xbf16>
    %586 = arith.truncf %583 : vector<16x64xf32> to vector<16x64xbf16>
    %cst_174 = arith.constant dense<0.000000e+00> : vector<16x128xf32>
    %587 = tpu.matmul %586, %585, %cst_174 {dimension_numbers = #tpu.dot_dimension_numbers<[1], [0], [0], [1], [0, 0, 1, 1], [], []>} : vector<16x64xbf16>, vector<64x128xbf16>, vector<16x128xf32> -> vector<16x128xf32>
    %c1_175 = arith.constant 1 : index
    %c0_176 = arith.constant 0 : index
    %c0_177 = arith.constant 0 : index
    %588 = vector.load %arg11[%c1_175, %c0_176, %c0_177] : memref<2x1x128xf32, #tpu.memory_space<vmem>>, vector<1x1x128xf32>
    %589 = vector.shape_cast %588 : vector<1x1x128xf32> to vector<1x128xf32>
    %590 = vector.broadcast %589 : vector<1x128xf32> to vector<16x128xf32>
    %591 = arith.addf %587, %590 : vector<16x128xf32>
    %cst_178 = arith.constant 5.000000e-01 : f32
    %592 = vector.broadcast %cst_178 : f32 to vector<16x128xf32>
    %593 = arith.mulf %592, %591 : vector<16x128xf32>
    %cst_179 = arith.constant 4.471500e-02 : f32
    %594 = vector.broadcast %cst_179 : f32 to vector<16x128xf32>
    %595 = arith.mulf %594, %591 : vector<16x128xf32>
    %596 = arith.mulf %595, %591 : vector<16x128xf32>
    %597 = arith.mulf %596, %591 : vector<16x128xf32>
    %598 = arith.addf %591, %597 : vector<16x128xf32>
    %cst_180 = arith.constant 0.797884583 : f32
    %599 = vector.broadcast %cst_180 : f32 to vector<16x128xf32>
    %600 = arith.mulf %599, %598 : vector<16x128xf32>
    %601 = math.tanh %600 : vector<16x128xf32>
    %cst_181 = arith.constant 1.000000e+00 : f32
    %602 = vector.broadcast %cst_181 : f32 to vector<16x128xf32>
    %603 = arith.addf %602, %601 : vector<16x128xf32>
    %604 = arith.mulf %593, %603 : vector<16x128xf32>
    %c1_182 = arith.constant 1 : index
    %c0_183 = arith.constant 0 : index
    %c0_184 = arith.constant 0 : index
    %605 = vector.load %arg12[%c1_182, %c0_183, %c0_184] : memref<2x128x64xbf16, #tpu.memory_space<vmem>>, vector<1x128x64xbf16>
    %606 = vector.shape_cast %605 : vector<1x128x64xbf16> to vector<128x64xbf16>
    %607 = arith.truncf %604 : vector<16x128xf32> to vector<16x128xbf16>
    %cst_185 = arith.constant dense<0.000000e+00> : vector<16x64xf32>
    %608 = tpu.matmul %607, %606, %cst_185 {dimension_numbers = #tpu.dot_dimension_numbers<[1], [0], [0], [1], [0, 0, 1, 1], [], []>} : vector<16x128xbf16>, vector<128x64xbf16>, vector<16x64xf32> -> vector<16x64xf32>
    %c1_186 = arith.constant 1 : index
    %c0_187 = arith.constant 0 : index
    %c0_188 = arith.constant 0 : index
    %609 = vector.load %arg13[%c1_186, %c0_187, %c0_188] : memref<2x1x64xf32, #tpu.memory_space<vmem>>, vector<1x1x64xf32>
    %610 = vector.shape_cast %609 : vector<1x1x64xf32> to vector<1x64xf32>
    %611 = vector.broadcast %610 : vector<1x64xf32> to vector<16x64xf32>
    %612 = arith.addf %608, %611 : vector<16x64xf32>
    %613 = arith.addf %612, %583 : vector<16x64xf32>
    %c1_189 = arith.constant 1 : index
    %c0_190 = arith.constant 0 : index
    %c0_191 = arith.constant 0 : index
    %614 = vector.load %arg14[%c1_189, %c0_190, %c0_191] : memref<2x1x64xf32, #tpu.memory_space<vmem>>, vector<1x1x64xf32>
    %615 = vector.shape_cast %614 : vector<1x1x64xf32> to vector<1x64xf32>
    %c1_192 = arith.constant 1 : index
    %c0_193 = arith.constant 0 : index
    %c0_194 = arith.constant 0 : index
    %616 = vector.load %arg15[%c1_192, %c0_193, %c0_194] : memref<2x1x64xf32, #tpu.memory_space<vmem>>, vector<1x1x64xf32>
    %617 = vector.shape_cast %616 : vector<1x1x64xf32> to vector<1x64xf32>
    %cst_195 = arith.constant dense<0.000000e+00> : vector<16xf32>
    %618 = vector.multi_reduction <add>, %613, %cst_195 [1] : vector<16x64xf32> to vector<16xf32>
    %619 = vector.shape_cast %618 : vector<16xf32> to vector<16x1xf32>
    %cst_196 = arith.constant 6.400000e+01 : f32
    %620 = vector.broadcast %cst_196 : f32 to vector<16x1xf32>
    %621 = arith.divf %619, %620 : vector<16x1xf32>
    %622 = vector.broadcast %621 : vector<16x1xf32> to vector<16x64xf32>
    %623 = arith.subf %613, %622 : vector<16x64xf32>
    %624 = arith.mulf %623, %623 : vector<16x64xf32>
    %cst_197 = arith.constant dense<0.000000e+00> : vector<16xf32>
    %625 = vector.multi_reduction <add>, %624, %cst_197 [1] : vector<16x64xf32> to vector<16xf32>
    %626 = vector.shape_cast %625 : vector<16xf32> to vector<16x1xf32>
    %cst_198 = arith.constant 6.400000e+01 : f32
    %627 = vector.broadcast %cst_198 : f32 to vector<16x1xf32>
    %628 = arith.divf %626, %627 : vector<16x1xf32>
    %cst_199 = arith.constant 9.99999974E-6 : f32
    %629 = vector.broadcast %cst_199 : f32 to vector<16x1xf32>
    %630 = arith.addf %628, %629 : vector<16x1xf32>
    %631 = math.rsqrt %630 : vector<16x1xf32>
    %632 = vector.broadcast %631 : vector<16x1xf32> to vector<16x64xf32>
    %633 = arith.mulf %623, %632 : vector<16x64xf32>
    %634 = vector.broadcast %615 : vector<1x64xf32> to vector<16x64xf32>
    %635 = arith.mulf %633, %634 : vector<16x64xf32>
    %636 = vector.broadcast %617 : vector<1x64xf32> to vector<16x64xf32>
    %637 = arith.addf %635, %636 : vector<16x64xf32>
    %638 = vector.extract_strided_slice %637 {offsets = [0, 0], sizes = [1, 64], strides = [1, 1]} : vector<16x64xf32> to vector<1x64xf32>
    %639 = vector.extract_strided_slice %637 {offsets = [8, 0], sizes = [1, 64], strides = [1, 1]} : vector<16x64xf32> to vector<1x64xf32>
    %640 = tpu.concatenate %638, %639 in 0 : vector<1x64xf32>, vector<1x64xf32> -> vector<2x64xf32>
    %c0_200 = arith.constant 0 : index
    %c0_201 = arith.constant 0 : index
    %641 = vector.load %arg16[%c0_200, %c0_201] : memref<64x64xbf16, #tpu.memory_space<vmem>>, vector<64x64xbf16>
    %642 = arith.truncf %640 : vector<2x64xf32> to vector<2x64xbf16>
    %cst_202 = arith.constant dense<0.000000e+00> : vector<2x64xf32>
    %643 = tpu.matmul %642, %641, %cst_202 {dimension_numbers = #tpu.dot_dimension_numbers<[1], [0], [0], [1], [0, 0, 1, 1], [], []>} : vector<2x64xbf16>, vector<64x64xbf16>, vector<2x64xf32> -> vector<2x64xf32>
    %c0_203 = arith.constant 0 : index
    %c0_204 = arith.constant 0 : index
    %644 = vector.load %arg17[%c0_203, %c0_204] : memref<1x64xf32, #tpu.memory_space<vmem>>, vector<1x64xf32>
    %645 = vector.broadcast %644 : vector<1x64xf32> to vector<2x64xf32>
    %646 = arith.addf %643, %645 : vector<2x64xf32>
    %647 = math.tanh %646 : vector<2x64xf32>
    %cst_205 = arith.constant 0.000000e+00 : f32
    %648 = vector.broadcast %cst_205 : f32 to vector<2x64xf32>
    %649 = arith.maximumf %647, %648 : vector<2x64xf32>
    %c0_206 = arith.constant 0 : index
    %c0_207 = arith.constant 0 : index
    %650 = vector.load %arg18[%c0_206, %c0_207] : memref<64x128xbf16, #tpu.memory_space<vmem>>, vector<64x128xbf16>
    %651 = arith.truncf %649 : vector<2x64xf32> to vector<2x64xbf16>
    %cst_208 = arith.constant dense<0.000000e+00> : vector<2x128xf32>
    %652 = tpu.matmul %651, %650, %cst_208 {dimension_numbers = #tpu.dot_dimension_numbers<[1], [0], [0], [1], [0, 0, 1, 1], [], []>} : vector<2x64xbf16>, vector<64x128xbf16>, vector<2x128xf32> -> vector<2x128xf32>
    %c0_209 = arith.constant 0 : index
    %c0_210 = arith.constant 0 : index
    %653 = vector.load %arg19[%c0_209, %c0_210] : memref<1x128xf32, #tpu.memory_space<vmem>>, vector<1x128xf32>
    %654 = vector.broadcast %653 : vector<1x128xf32> to vector<2x128xf32>
    %655 = arith.addf %652, %654 : vector<2x128xf32>
    %c0_211 = arith.constant 0 : index
    %c0_212 = arith.constant 0 : index
    %656 = vector.load %arg20[%c0_211, %c0_212] : memref<2x128xf32, #tpu.memory_space<vmem>>, vector<2x128xf32>
    tpu.vector_store %arg20[%c0_211, %c0_212], %655 {strides = array<i32>} : memref<2x128xf32, #tpu.memory_space<vmem>>, vector<2x128xf32>,
    return
  }
}

</mosaic_0001>

<bundles_post_ra>
// kernel: tpu_custom_call.1
= control target key start
LH: loop header
LB: loop body
LE: loop exit
PB: predicated region body
PF: predicated region fallthrough
CT: control target
= control target key end

     0   :  { %s3929_s0 = inlined_call_operand.hbm [shape: f32[16,64], index: 0, kind: input, shape index: {}]   ;;  %s3930_s1 = inlined_call_operand.vmem [shape: f32[2,8], index: 1, kind: input, shape index: {}]   ;;  %s3931_s2 = inlined_call_operand.hbm [shape: f32[1,64], index: 2, kind: input, shape index: {}]   ;;  %s3932_s3 = inlined_call_operand.hbm [shape: f32[1,64], index: 3, kind: input, shape index: {}]   ;;  %s3933_s4 = inlined_call_operand.vmem [shape: bf16[2,64,192], index: 4, kind: input, shape index: {}]   ;;  %s3934_s5 = inlined_call_operand.hbm [shape: f32[2,1,192], index: 5, kind: input, shape index: {}]   ;;  %s3935_s6 = inlined_call_operand.vmem [shape: bf16[2,64,64], index: 6, kind: input, shape index: {}]   ;;  %s3936_s7 = inlined_call_operand.vmem [shape: f32[2,1,64], index: 7, kind: input, shape index: {}]   ;;  %s3937_s8 = inlined_call_operand.hbm [shape: f32[2,1,64], index: 8, kind: input, shape index: {}]   ;;  %s3938_s9 = inlined_call_operand.vmem [shape: f32[2,1,64], index: 9, kind: input, shape index: {}]   ;;  %s3939_s10 = inlined_call_operand.hbm [shape: bf16[2,64,128], index: 10, kind: input, shape index: {}]   ;;  %s3940_s11 = inlined_call_operand.vmem [shape: f32[2,1,128], index: 11, kind: input, shape index: {}]   ;;  %s3941_s12 = inlined_call_operand.vmem [shape: bf16[2,128,64], index: 12, kind: input, shape index: {}]   ;;  %s3942_s13 = inlined_call_operand.vmem [shape: f32[2,1,64], index: 13, kind: input, shape index: {}]   ;;  %s3943_s14 = inlined_call_operand.hbm [shape: f32[2,1,64], index: 14, kind: input, shape index: {}]   ;;  %s3944_s15 = inlined_call_operand.vmem [shape: f32[2,1,64], index: 15, kind: input, shape index: {}]   ;;  %s3945_s16 = inlined_call_operand.hbm [shape: bf16[64,64], index: 16, kind: input, shape index: {}]   ;;  %s3946_s17 = inlined_call_operand.vmem [shape: f32[1,64], index: 17, kind: input, shape index: {}]   ;;  %s3947_s18 = inlined_call_operand.hbm [shape: bf16[64,128], index: 18, kind: input, shape index: {}]   ;;  %s3948_s19 = inlined_call_operand.vmem [shape: f32[1,128], index: 19, kind: input, shape index: {}]   ;;  %s3949_s20 = inlined_call_operand.hbm [shape: f32[2,128], index: 20, kind: output, shape index: {}]  }
   0x1   :  { %3955 = sst [smem:[#allocation24_spill]] %s3929_s0 }
   0x2   :  { %3956 = sst [smem:[#allocation25_spill]] %s3930_s1 }
   0x3   :  { %3957 = sst [smem:[#allocation26_spill]] %s3931_s2 }
   0x4   :  { %3958 = sst [smem:[#allocation27_spill]] %s3932_s3 }
   0x5   :  { %3959 = sst [smem:[#allocation28_spill]] %s3933_s4 }
   0x6   :  { %25 = vsyncpa [#allocation3], 0 }
   0x7   :  { %26 = vsyncpa [#allocation6], 0 }
   0x8   :  { %27 = vsyncpa [#allocation9], 0 }
   0x9   :  { %28 = vsyncpa [#allocation12], 0 }
   0xa   :  { %29 = vsyncpa [#allocation15], 0  ;;  %s3960_s23 = sld [smem:[#allocation26_spill]] }
  0x10   :  { %s51_s24 = sshll.u32 %s3960_s23, 4  ;;  %s52_s24 = int_to_ptr.hbm [resolvable:$true] %s51_s24 }
  0x11   :  { %30 = vsyncpa [#allocation4], 0  ;;  %s3150_s2 = smov [#allocation5]   ;;  %s74_s27 = sshll.u32 %s3934_s5, 4  ;;  %s75_s27 = int_to_ptr.hbm [resolvable:$true] %s74_s27 }
  0x12   :  { %s53_s25 = sshll.u32 %s3150_s2, 4  ;;  %s3151_s28 = smov [#allocation8]   ;;  %s54_s25 = int_to_ptr.vmem [resolvable:$true] %s53_s25 }
  0x13   :  { %56 = dma.hbm_to_vmem [thread:$0]  %s52_s24, 16, %s54_s25, [#allocation6]  }
  0x14   :  { %s76_s4 = sshll.u32 %s3151_s28, 4  ;;  %s3951_s29 = smov 32   ;;  %s77_s4 = int_to_ptr.vmem [resolvable:$true] %s76_s4 }
  0x15   :  { %s3153_s30 = smov 2   ;;  %s106_s1 = sshll.u32 %s3939_s10, 4  ;;  %s107_s1 = int_to_ptr.hbm [resolvable:$true] %s106_s1 }
  0x16   :  { %82 = dma.hbm_to_vmem [thread:$0]  %s75_s27, 64, %s77_s4, [#allocation9], %s3951_s29, %s3951_s29, %s3153_s30  }
  0x17   :  { %s3154_s22 = smov [#allocation11]   ;;  %s140_s24 = sshll.u32 %s3945_s16, 4  ;;  %s141_s24 = int_to_ptr.hbm [resolvable:$true] %s140_s24 }
  0x18   :  { %s108_s23 = sshll.u32 %s3154_s22, 4  ;;  %s3953_s25 = smov 64   ;;  %s109_s23 = int_to_ptr.vmem [resolvable:$true] %s108_s23 }
  0x19   :  { %s3156_s3 = smov 4   ;;  %s3157_s26 = smov [#allocation14]  }
  0x1a   :  { %114 = dma.hbm_to_vmem [thread:$0]  %s107_s1, 1024, %s109_s23, [#allocation12], %s3953_s25, %s3953_s25, %s3156_s3  }
  0x1b   :  { %s142_s27 = sshll.u32 %s3157_s26, 4  ;;  %s3961_s10 = sld [smem:[#allocation24_spill]]  ;;  %s143_s27 = int_to_ptr.vmem [resolvable:$true] %s142_s27 }
  0x1c   :  { %148 = dma.hbm_to_vmem [thread:$0]  %s141_s24, 512, %s143_s27, [#allocation15], %s3953_s25, %s3953_s25, %s3156_s3  }
  0x1d   :  { %s3158_s16 = smov [#allocation2]   ;;  %s3962_s2 = sld [smem:[#allocation27_spill]] }
  0x1e   :  { %s37_s0 = sshll.u32 %s3158_s16, 4  ;;  %s3159_s23 = smov 128   ;;  %s38_s0 = int_to_ptr.vmem [resolvable:$true] %s37_s0 }
  0x1f   :  { %s3160_s5 = smov 8   ;;  %s3161_s26 = smov [#allocation7]  }
  0x20   :  { %s64_s28 = sshll.u32 %s3161_s26, 4  ;;  %s91_s29 = sshll.u32 %s3937_s8, 4  ;;  %s65_s28 = int_to_ptr.vmem [resolvable:$true] %s64_s28  ;;  %s92_s29 = int_to_ptr.hbm [resolvable:$true] %s91_s29 }
  0x21   :  { %s35_s30 = sshll.u32 %s3961_s10, 4  ;;  %s3162_s24 = smov [#allocation10]   ;;  %s36_s30 = int_to_ptr.hbm [resolvable:$true] %s35_s30 }
  0x22   :  { %43 = dma.hbm_to_vmem [thread:$0]  %s36_s30, 256, %s38_s0, [#allocation3], %s3159_s23, %s3159_s23, %s3160_s5  }
  0x23   :  { %s62_s1 = sshll.u32 %s3962_s2, 4  ;;  %s93_s27 = sshll.u32 %s3162_s24, 4  ;;  %s63_s1 = int_to_ptr.hbm [resolvable:$true] %s62_s1  ;;  %s94_s27 = int_to_ptr.vmem [resolvable:$true] %s93_s27 }
  0x24   :  { %67 = dma.hbm_to_vmem [thread:$0]  %s63_s1, 16, %s65_s28, [#allocation6]  }
  0x25   :  { %s125_s21 = sshll.u32 %s3943_s14, 4  ;;  %s3163_s22 = smov 16   ;;  %s126_s21 = int_to_ptr.hbm [resolvable:$true] %s125_s21 }
  0x26   :  { %s3164_s2 = smov 1   ;;  %s3165_s30 = smov [#allocation13]  }
  0x27   :  { %99 = dma.hbm_to_vmem [thread:$0]  %s92_s29, 32, %s94_s27, [#allocation9], %s3163_s22, %s3163_s22, %s3164_s2  }
  0x28   :  { %s127_s0 = sshll.u32 %s3165_s30, 4  ;;  %s155_s5 = sshll.u32 %s3947_s18, 4  ;;  %s128_s0 = int_to_ptr.vmem [resolvable:$true] %s127_s0  ;;  %s156_s5 = int_to_ptr.hbm [resolvable:$true] %s155_s5 }
  0x29   :  { %133 = dma.hbm_to_vmem [thread:$0]  %s126_s21, 32, %s128_s0, [#allocation12], %s3163_s22, %s3163_s22, %s3164_s2  }
  0x2a   :  { %s3166_s1 = smov [#allocation16]   ;;  %s3963_s14 = smov 64  }
  0x2b   :  { %s157_s25 = sshll.u32 %s3166_s1, 4  ;;  %s158_s25 = int_to_ptr.vmem [resolvable:$true] %s157_s25 }
  0x2c   :  { %163 = dma.hbm_to_vmem [thread:$0]  %s156_s5, 512, %s158_s25, [#allocation15], %s3963_s14, %s3963_s14, %s3156_s3  }
  0x2d   :  { %3138 = dma.done.wait [#allocation3], 256  }
  0x2e   :  { %3139 = vsyncadd [#allocation3], 4294967040 }
  0x2f   :  { %3140 = dma.done.wait [#allocation6], 32  }
  0x30   :  { %3141 = vsyncadd [#allocation6], 4294967264 }
  0x31   :  { %3142 = dma.done.wait [#allocation9], 96  }
  0x32   :  { %3143 = vsyncadd [#allocation9], 4294967200 }
  0x33   :  { %3144 = dma.done.wait [#allocation12], 1056  }
  0x34   :  { %3145 = vsyncadd [#allocation12], 4294966240 }
  0x35   :  { %3146 = dma.done.wait [#allocation15], 1024  }
  0x36   :  { %3147 = vsyncadd [#allocation15], 4294966272  ;;  %vm207_vm0 = vcmask 523264   ;;  %v203_v0 = vld [vmem:[#allocation2] sm:$0xff]  ;;  %v204_v2 = vld [vmem:[#allocation2 + $0x8] sm:$0xff]  ;;  %v3167_v4 = vmov 64.0  }
  0x37   :  { %v208_v1 = vsel %vm207_vm0, %v203_v0, 0.0  ;;  %v211_v3 = vsel %vm207_vm0, %v204_v2, 0.0  ;;  %2802 = vrcp.f32 %v3167_v4  ;;  %s3964_s3 = sld [smem:[#allocation28_spill]]  ;;  %vm406_vm8 = vcmask 1043456   ;;  %s3168_s8 = smov 96  }
  0x38   :  { %209 = vadd.xlane.f32.xlu0 %v208_v1  ;;  %s3965_s5 = smov 32   ;;  %s3169_s1 = smov 48   ;;  %vm369_vm9 = vcmask 130048   ;;  %vm389_vm10 = vcmask 64512  }
  0x39   :  { %s3170_s25 = smov 112   ;;  %s3966_s26 = sld [smem:[#allocation25_spill]] }
  0x3a   :  { %s3171_s28 = smov 80   ;;  %s2374_s21 = sshll.u32 %s3949_s20, 4  ;;  %s2375_s21 = int_to_ptr.hbm [resolvable:$true] %s2374_s21 }
  0x3d   :  { %v2803_v5 = vpop.eup %2802  ;;  %v2414_v21 = vld [vmem:[%s3964_s3 + $0x30] sm:$0xf]  ;;  %v2712_v22 = vld [vmem:[%s3964_s3 + $0x34] sm:$0xf0]  ;;  %v2711_v23 = vld [vmem:[%s3964_s3 + $0x34] sm:$0xf] }
  0x3e   :  { %v215_v6 = vmul.f32 64.0, %v2803_v5  ;;  %vm219_vm1 = vweird.f32 %v2803_v5  ;;  %v2415_v24 = vor.u32 %v2712_v22, %v2414_v21  ;;  %v2416_v25 = vld [vmem:[%s3964_s3 + $0x38] sm:$0xf0]  ;;  %v2406_v27 = vld [vmem:[%s3964_s3 + $0x20] sm:$0xf] }
  0x3f   :  { %v2419_v26 = vor.u32 %v2711_v23, %v2416_v25  ;;  %v2710_v28 = vld [vmem:[%s3964_s3 + $0x24] sm:$0xf0]  ;;  %v2709_v29 = vld [vmem:[%s3964_s3 + $0x24] sm:$0xf]  ;;  %v2408_v31 = vld [vmem:[%s3964_s3 + $0x28] sm:$0xf0] }
  0x40   :  { %212 = vadd.xlane.f32.xlu0 %v211_v3  ;;  %v216_v7 = vsub.f32 1.0, %v215_v6  ;;  %332 = vmatpush.bf16.msra.mxu0 %v2415_v24  ;;  %v2407_v30 = vor.u32 %v2710_v28, %v2406_v27  ;;  %v2411_v32 = vor.u32 %v2709_v29, %v2408_v31  ;;  %v2398_v33 = vld [vmem:[%s3964_s3 + $0x10] sm:$0xf]  ;;  %v2708_v34 = vld [vmem:[%s3964_s3 + $0x14] sm:$0xf0] }
  0x41   :  { %346 = vmatpush.bf16.msra.mxu1 %v2419_v26  ;;  %v2707_v35 = vld [vmem:[%s3964_s3 + $0x14] sm:$0xf]  ;;  %v2399_v36 = vor.u32 %v2708_v34, %v2398_v33  ;;  %v2400_v37 = vld [vmem:[%s3964_s3 + $0x18] sm:$0xf0]  ;;  %v2390_v39 = vld [vmem:[%s3964_s3] sm:$0xf] }
  0x42   :  { %v217_v8 = vmul.f32 %v2803_v5, %v216_v7  ;;  %v2403_v38 = vor.u32 %v2707_v35, %v2400_v37  ;;  %v2706_v40 = vld [vmem:[%s3964_s3 + $0x4] sm:$0xf0]  ;;  %v2705_v41 = vld [vmem:[%s3964_s3 + $0x4] sm:$0xf]  ;;  %v2392_v44 = vld [vmem:[%s3964_s3 + $0x8] sm:$0xf0] }
  0x43   :  { %v2391_v43 = vor.u32 %v2706_v40, %v2390_v39  ;;  %v2395_v46 = vor.u32 %v2705_v41, %v2392_v44  ;;  %v3430_v29 = vld [vmem:[%s3966_s26] sm:$0x3] }
  0x44   :  { %v218_v9 = vadd.f32 %v2803_v5, %v217_v8  ;;  %333 = vmatpush.bf16.msra.mxu0 %v2407_v30  ;;  %v3433_v30 = vperm.slane %v3430_v29, 0 }
  0x45   :  { %347 = vmatpush.bf16.msra.mxu1 %v2411_v32 }
  0x46   :  { %v3322_v10 = vsel %vm219_vm1, %v2803_v5, %v218_v9  ;;  %v2785_v5 = vld [vmem:[#allocation7] ss:$0 sm:$0xff] }
  0x48   :  { %334 = vmatpush.bf16.msra.mxu0 %v2399_v36 }
  0x49   :  { %348 = vmatpush.bf16.msra.mxu1 %v2403_v38 }
  0x4c   :  { %335 = vmatpush.bf16.msra.mxu0 %v2391_v43 }
  0x4d   :  { %349 = vmatpush.bf16.msra.mxu1 %v2395_v46 }
  0xab   :  { %v210_v11 = vpop.xlane.xlu0 %209 }
  0xac   :  { %v221_v12 = vmul.f32 %v3322_v10, %v210_v11  ;;  %v3396_v11 = vld [vmem:[#allocation8] sm:$0x3] }
  0xae   :  { %v3325_v13 = vsub.f32 %v203_v0, %v221_v12  ;;  %v2784_v0 = vld [vmem:[#allocation5] ss:$0 sm:$0xff]  ;;  %v281_v12 = vperm.slane %v3396_v11, 0 }
  0xb0   :  { %v225_v14 = vmul.f32 %v3325_v13, %v3325_v13 }
  0xb2   :  { %v227_v15 = vsel %vm207_vm0, %v225_v14, 0.0 }
  0xb3   :  { %228 = vadd.xlane.f32.xlu1 %v227_v15  ;;  %v213_v16 = vpop.xlane.xlu0 %212 }
  0xb4   :  { %v222_v17 = vmul.f32 %v3322_v10, %v213_v16 }
  0xb6   :  { %v3331_v18 = vsub.f32 %v204_v2, %v222_v17 }
  0xb8   :  { %v226_v19 = vmul.f32 %v3331_v18, %v3331_v18 }
  0xba   :  { %v230_v20 = vsel %vm207_vm0, %v226_v19, 0.0 }
  0xbb   :  { %231 = vadd.xlane.f32.xlu1 %v230_v20 }
 0x126   :  { %v229_v42 = vpop.xlane.xlu1 %228 }
 0x127   :  { %v233_v45 = vmul.f32 %v229_v42, %v3322_v10 }
 0x129   :  { %v235_v47 = vadd.f32 1e-05, %v233_v45 }
 0x12b   :  { %2804 = vrsqrt.f32 %v235_v47  ;;  %vm243_vm3 = vweird.f32 %v235_v47 }
 0x12e   :  { %v232_v48 = vpop.xlane.xlu1 %231 }
 0x12f   :  { %v234_v49 = vmul.f32 %v232_v48, %v3322_v10 }
 0x131   :  { %v2805_v50 = vpop.eup %2804  ;;  %v236_v51 = vadd.f32 1e-05, %v234_v49 }
 0x132   :  { %v238_v52 = vmul.f32 %v2805_v50, %v235_v47  ;;  %vm244_vm2 = vweird.f32 %v2805_v50 }
 0x133   :  { %2806 = vrsqrt.f32 %v236_v51  ;;  %vm245_vm4 = vmor %vm243_vm3, %vm244_vm2  ;;  %vm253_vm6 = vweird.f32 %v236_v51 }
 0x134   :  { %v239_v53 = vmul.f32 %v2805_v50, %v238_v52 }
 0x136   :  { %v240_v54 = vmul.f32 0.5, %v239_v53 }
 0x138   :  { %v241_v55 = vsub.f32 1.5, %v240_v54 }
 0x139   :  { %v2807_v56 = vpop.eup %2806 }
 0x13a   :  { %v242_v57 = vmul.f32 %v2805_v50, %v241_v55  ;;  %v248_v58 = vmul.f32 %v2807_v56, %v236_v51  ;;  %vm254_vm5 = vweird.f32 %v2807_v56 }
 0x13b   :  { %vm255_vm7 = vmor %vm253_vm6, %vm254_vm5 }
 0x13c   :  { %v249_v59 = vmul.f32 %v2807_v56, %v248_v58  ;;  %v246_v60 = vsel %vm245_vm4, %v2805_v50, %v242_v57 }
 0x13d   :  { %v257_v63 = vmul.f32 %v246_v60, %v3325_v13  ;;  %v282_v13 = vperm.slane %v3396_v11, 1 }
 0x13e   :  { %v250_v61 = vmul.f32 0.5, %v249_v59 }
 0x13f   :  { %v262_v4 = vmul.f32 %v2784_v0, %v257_v63 }
 0x140   :  { %v251_v62 = vsub.f32 1.5, %v250_v61 }
 0x141   :  { %v3388_v7 = vadd.f32 %v2785_v5, %v262_v4 }
 0x142   :  { %v252_v1 = vmul.f32 %v2807_v56, %v251_v62 }
 0x144   :  { %v256_v2 = vsel %vm255_vm7, %v2807_v56, %v252_v1  ;;  %v2714_v1 = vld [vmem:[%s3935_s6 + $0x8] sm:$0xff] }
 0x145   :  { %v258_v3 = vmul.f32 %v256_v2, %v3331_v18  ;;  %498 = vmatpush.bf16.msrb.mxu0 %v2714_v1 }
 0x147   :  { %v263_v6 = vmul.f32 %v2784_v0, %v258_v3 }
 0x149   :  { %v3390_v8 = vadd.f32 %v2785_v5, %v263_v6 }
 0x14b   :  { %v278_v9 = vpack.c.bf16 %v3390_v8, %v3388_v7 }
 0x14d   :  { %2420 = vmatmul.msk.bf16.vlgmr.msra.gmra.mxu0 %vm207_vm0, %v278_v9  ;;  %2421 = vmatmul.msk.bf16.vlgmr.msra.gmra.mxu1 %vm207_vm0, %v278_v9 }
 0x1ca   :  { %v337_v14 = vpop.f32.mrf.mxu0  ;;  %v351_v15 = vpop.f32.mrf.mxu1 }
 0x1cb   :  { %v338_v16 = vadd.f32 %v337_v14, %v281_v12  ;;  %v352_v17 = vadd.f32 %v351_v15, %v282_v13  ;;  %v2715_v15 = vld [vmem:[%s3935_s6 + $0x10] sm:$0xff] }
 0x1cc   :  { %599 = vmatpush.bf16.msra.mxu0 %v2715_v15 }
 0x1cd   :  { %v3404_v18 = vpack.c.bf16 %v338_v16, %v338_v16  ;;  %v3406_v19 = vpack.c.bf16 %v352_v17, %v352_v17  ;;  %v2713_v16 = vld [vmem:[%s3935_s6] sm:$0xff] }
 0x1cf   :  { %526 = vrot.lane.b32.xlu1 %v3404_v18, %s3168_s8  ;;  %528 = vrot.lane.b32.xlu0 %v3404_v18, %s3965_s5  ;;  %v408_v20 = vsel %vm406_vm8, %v3406_v19, 0 }
 0x1d0   :  { %426 = vrot.lane.b32.xlu2 %v3404_v18, %s3169_s1  ;;  %417 = vmatpush.bf16.msrb.mxu1 %v408_v20 }
 0x1d2   :  { %v339_v55 = vpop.f32.mrf.mxu0 }
 0x1d3   :  { %v340_v56 = vadd.f32 %v339_v55, %v281_v12 }
 0x1d4   :  { %520 = vmatpush.bf16.msra.mxu1 %v2713_v16 }
 0x1d5   :  { %v3452_v57 = vpack.c.bf16 %v340_v56, %v340_v56 }
 0x1d8   :  { %424 = vrot.lane.b32.xlu2 %v3404_v18, %s3170_s25 }
 0x1e0   :  { %367 = vrot.lane.b32.xlu2 %v3404_v18, %s3963_s14 }
 0x22a   :  { %v427_v21 = vpop.permute.xlu2 %426 }
 0x22b   :  { %v432_v22 = vsel %vm369_vm9, %v427_v21, 0 }
 0x22c   :  { %441 = vmatpush.bf16.xpose.msra.mxu3 %v432_v22 }
 0x232   :  { %v425_v23 = vpop.permute.xlu2 %424 }
 0x233   :  { %2424 = vmatmul.msk.bf16.vlgmr.msra.gmra.mxu3 %vm369_vm9, %v425_v23 }
 0x23a   :  { %v368_v24 = vpop.permute.xlu2 %367 }
 0x23b   :  { %v374_v25 = vsel %vm369_vm9, %v368_v24, 0 }
 0x23c   :  { %383 = vmatpush.bf16.xpose.msra.mxu2 %v374_v25 }
 0x241   :  { %v529_v26 = vpop.permute.xlu0 %528  ;;  %v527_v28 = vpop.permute.xlu1 %526 }
 0x242   :  { %v534_v27 = vsel %vm369_vm9, %v529_v26, 0 }
 0x243   :  { %2422 = vmatmul.msk.bf16.vlgmr.msra.gmra.mxu2 %vm369_vm9, %v3404_v18  ;;  %543 = vmatpush.bf16.xpose.msrb.mxu3 %v534_v27 }
 0x24a   :  { %2436 = vmatmul.msk.bf16.vlgmr.msrb.gmra.mxu3 %vm369_vm9, %v527_v28 }
 0x2b6   :  { %v443_v31 = vpop.f32.mrf.mxu3 }
 0x2b7   :  { %v444_v32 = vadd.f32 %v443_v31, %v3433_v30 }
 0x2b9   :  { %v447_v33 = vsel %vm389_vm10, %v444_v32, -inf }
 0x2ba   :  { %448 = vmax.xlane.f32.xlu2 %v447_v33 }
 0x2be   :  { %v445_v34 = vpop.f32.mrf.mxu3 }
 0x2c6   :  { %v385_v35 = vpop.f32.mrf.mxu2 }
 0x2c7   :  { %v386_v53 = vadd.f32 %v385_v35, %v3433_v30 }
 0x2c9   :  { %v390_v54 = vsel %vm389_vm10, %v386_v53, -inf }
 0x2cd   :  { %v545_v36 = vpop.f32.mrf.mxu3 }
 0x2ce   :  { %v387_v37 = vpop.f32.mrf.mxu2  ;;  %v546_v38 = vadd.f32 %v545_v36, %v3433_v30  ;;  %v353_v36 = vpop.f32.mrf.mxu1 }
 0x2cf   :  { %v354_v37 = vadd.f32 %v353_v36, %v282_v13 }
 0x2d0   :  { %v549_v39 = vsel %vm389_vm10, %v546_v38, -inf }
 0x2d1   :  { %550 = vmax.xlane.f32.xlu0 %v549_v39  ;;  %v3484_v39 = vpack.c.bf16 %v354_v37, %v354_v37 }
 0x2d2   :  { %460 = vrot.lane.b32.xlu2 %v3406_v19, %s3170_s25 }
 0x2d5   :  { %v547_v40 = vpop.f32.mrf.mxu3 }
 0x32d   :  { %v449_v41 = vpop.xlane.xlu2 %448 }
 0x32e   :  { %v450_v42 = vsub.f32 %v444_v32, %v449_v41 }
 0x330   :  { %v451_v43 = vmul.f32 1.442695, %v450_v42  ;;  %v727_v42 = vsel %vm406_vm8, %v3484_v39, 0 }
 0x332   :  { %2808 = vpow2.f32 %v451_v43 }
 0x335   :  { %v461_v44 = vpop.permute.xlu2 %460 }
 0x336   :  { %v466_v45 = vsel %vm406_vm8, %v461_v44, 0 }
 0x337   :  { %475 = vmatpush.bf16.msrb.mxu2 %v466_v45  ;;  %v3490_v45 = vperm.slane %v3430_v29, 1 }
 0x338   :  { %v2809_v46 = vpop.eup %2808 }
 0x339   :  { %v453_v47 = vsel %vm389_vm10, %v2809_v46, 0.0 }
 0x33a   :  { %454 = vadd.xlane.f32.xlu1 %v453_v47 }
 0x344   :  { %v551_v48 = vpop.xlane.xlu0 %550 }
 0x345   :  { %v552_v49 = vsub.f32 %v546_v38, %v551_v48 }
 0x347   :  { %v553_v50 = vmul.f32 1.442695, %v552_v49 }
 0x349   :  { %2810 = vpow2.f32 %v553_v50 }
 0x34f   :  { %v2811_v51 = vpop.eup %2810 }
 0x350   :  { %v555_v52 = vsel %vm389_vm10, %v2811_v51, 0.0 }
 0x351   :  { %556 = vadd.xlane.f32.xlu0 %v555_v52 }
 0x353   :  { %561 = vrot.lane.b32.xlu1 %v3406_v19, %s3168_s8 }
 0x359   :  { %391 = vmax.xlane.f32.xlu0 %v390_v54 }
 0x35b   :  { %608 = vrot.lane.b32.xlu1 %v3404_v18, %s3163_s22 }
 0x36d   :  { %689 = vrot.lane.b32.xlu0 %v3452_v57, %s3963_s14 }
 0x375   :  { %606 = vrot.lane.b32.xlu0 %v3404_v18, %s3171_s28 }
 0x3ad   :  { %v455_v58 = vpop.xlane.xlu1 %454 }
 0x3ae   :  { %2812 = vrcp.f32 %v455_v58 }
 0x3b4   :  { %v2813_v59 = vpop.eup %2812 }
 0x3b5   :  { %v457_v60 = vmul.f32 %v2813_v59, %v2809_v46 }
 0x3b7   :  { %v458_v61 = vpack.c.bf16 %v457_v60, %v457_v60 }
 0x3b9   :  { %2425 = vmatmul.msk.bf16.vlgmr.msrb.gmra.mxu2 %vm389_vm10, %v458_v61 }
 0x3c4   :  { %v557_v62 = vpop.xlane.xlu0 %556 }
 0x3c5   :  { %2814 = vrcp.f32 %v557_v62  ;;  %v562_v63 = vpop.permute.xlu1 %561 }
 0x3c6   :  { %v567_v0 = vsel %vm406_vm8, %v562_v63, 0 }
 0x3c7   :  { %576 = vmatpush.bf16.msra.mxu2 %v567_v0 }
 0x3cb   :  { %v2815_v2 = vpop.eup %2814 }
 0x3cc   :  { %v559_v3 = vmul.f32 %v2815_v2, %v2811_v51  ;;  %v392_v4 = vpop.xlane.xlu0 %391 }
 0x3cd   :  { %v393_v5 = vsub.f32 %v386_v53, %v392_v4  ;;  %v609_v28 = vpop.permute.xlu1 %608 }
 0x3ce   :  { %v560_v6 = vpack.c.bf16 %v559_v3, %v559_v3  ;;  %v614_v32 = vsel %vm369_vm9, %v609_v28, 0 }
 0x3cf   :  { %v394_v9 = vmul.f32 1.442695, %v393_v5 }
 0x3d0   :  { %2437 = vmatmul.msk.bf16.vlgmr.msra.gmra.mxu2 %vm389_vm10, %v560_v6 }
 0x3d1   :  { %2816 = vpow2.f32 %v394_v9 }
 0x3d7   :  { %v2817_v12 = vpop.eup %2816 }
 0x3d8   :  { %v396_v14 = vsel %vm389_vm10, %v2817_v12, 0.0 }
 0x3d9   :  { %397 = vadd.xlane.f32.xlu2 %v396_v14 }
 0x3df   :  { %v690_v17 = vpop.permute.xlu0 %689 }
 0x3e0   :  { %v695_v21 = vsel %vm369_vm9, %v690_v17, 0 }
 0x3e7   :  { %v607_v47 = vpop.permute.xlu0 %606 }
 0x43c   :  { %v477_v18 = vpop.f32.mrf.mxu2 }
 0x43d   :  { %v481_v20 = vpack.c.bf16 %v477_v18, %v477_v18 }
 0x43f   :  { %2430 = vmatmul.msk.bf16.vlgmr.msrb.gmra.mxu0 %vm369_vm9, %v481_v20 }
 0x440   :  { %704 = vmatpush.bf16.xpose.msrb.mxu0 %v695_v21 }
 0x444   :  { %v479_v22 = vpop.f32.mrf.mxu2 }
 0x44c   :  { %v398_v23 = vpop.xlane.xlu2 %397 }
 0x44d   :  { %2818 = vrcp.f32 %v398_v23 }
 0x453   :  { %v2819_v24 = vpop.eup %2818  ;;  %v578_v25 = vpop.f32.mrf.mxu2 }
 0x454   :  { %v400_v26 = vmul.f32 %v2819_v24, %v2817_v12  ;;  %v582_v27 = vpack.c.bf16 %v578_v25, %v578_v25 }
 0x456   :  { %2442 = vmatmul.msk.bf16.vlgmr.msra.gmra.mxu0 %vm369_vm9, %v582_v27  ;;  %v401_v31 = vpack.c.bf16 %v400_v26, %v400_v26  ;;  %v3528_v27 = vld [vmem:[%s3935_s6 + $0x18] sm:$0xff] }
 0x457   :  { %811 = vmatpush.bf16.msra.mxu0 %v2714_v1  ;;  %679 = vmatpush.bf16.msrb.mxu2 %v3528_v27 }
 0x458   :  { %2423 = vmatmul.msk.bf16.vlgmr.msrb.gmra.mxu1 %vm389_vm10, %v401_v31 }
 0x459   :  { %623 = vmatpush.bf16.xpose.msrb.mxu1 %v614_v32 }
 0x45b   :  { %v580_v33 = vpop.f32.mrf.mxu2 }
 0x466   :  { %2450 = vmatmul.msk.bf16.vlgmr.msrb.gmra.mxu0 %vm369_vm9, %v3452_v57 }
 0x467   :  { %900 = vmatpush.bf16.msrb.mxu0 %v2715_v15 }
 0x4bc   :  { %v3478_v34 = vpop.f32.mrf.mxu0 }
 0x4c4   :  { %v502_v35 = vpop.f32.mrf.mxu0 }
 0x4d3   :  { %v3482_v38 = vpop.f32.mrf.mxu0 }
 0x4d5   :  { %v419_v40 = vpop.f32.mrf.mxu1 }
 0x4d6   :  { %v423_v41 = vpack.c.bf16 %v419_v40, %v419_v40 }
 0x4d8   :  { %2435 = vmatmul.msk.bf16.vlgmr.msra.gmra.mxu1 %vm369_vm9, %v423_v41 }
 0x4d9   :  { %736 = vmatpush.bf16.msra.mxu1 %v727_v42 }
 0x4db   :  { %v603_v43 = vpop.f32.mrf.mxu0 }
 0x4dd   :  { %v421_v44 = vpop.f32.mrf.mxu1 }
 0x4e3   :  { %v706_v46 = vpop.f32.mrf.mxu0 }
 0x4e4   :  { %v707_v11 = vadd.f32 %v706_v46, %v3490_v45 }
 0x4e6   :  { %v710_v13 = vsel %vm389_vm10, %v707_v11, -inf }
 0x4e7   :  { %711 = vmax.xlane.f32.xlu1 %v710_v13 }
 0x4e8   :  { %2443 = vmatmul.msk.bf16.vlgmr.msrb.gmra.mxu1 %vm369_vm9, %v607_v47 }
 0x4e9   :  { %827 = vmatpush.bf16.msrb.mxu1 %v2713_v16 }
 0x4eb   :  { %v708_v48 = vpop.f32.mrf.mxu0 }
 0x500   :  { %745 = vrot.lane.b32.xlu1 %v3452_v57, %s3169_s1 }
 0x508   :  { %833 = vrot.lane.b32.xlu1 %v3452_v57, %s3168_s8 }
 0x555   :  { %v3499_v49 = vpop.f32.mrf.mxu1 }
 0x55a   :  { %v712_v29 = vpop.xlane.xlu1 %711 }
 0x55b   :  { %v713_v50 = vsub.f32 %v707_v11, %v712_v29  ;;  %v523_v29 = vadd.f32 %v3499_v49, %v3478_v34 }
 0x55d   :  { %v714_v51 = vmul.f32 1.442695, %v713_v50  ;;  %v524_v52 = vpop.f32.mrf.mxu1 }
 0x55e   :  { %v3548_v52 = vld [vmem:[%s3936_s7] ss:$0 sm:$0xff] }
 0x55f   :  { %2820 = vpow2.f32 %v714_v51  ;;  %v605_v51 = vadd.f32 %v3482_v38, %v523_v29 }
 0x565   :  { %v2821_v53 = vpop.eup %2820  ;;  %v625_v54 = vpop.f32.mrf.mxu1 }
 0x566   :  { %v626_v55 = vadd.f32 %v625_v54, %v3433_v30  ;;  %v716_v56 = vsel %vm389_vm10, %v2821_v53, 0.0 }
 0x567   :  { %717 = vadd.xlane.f32.xlu0 %v716_v56 }
 0x568   :  { %v629_v58 = vsel %vm389_vm10, %v626_v55, -inf }
 0x569   :  { %630 = vmax.xlane.f32.xlu2 %v629_v58 }
 0x56d   :  { %v627_v59 = vpop.f32.mrf.mxu1 }
 0x572   :  { %v746_v9 = vpop.permute.xlu1 %745 }
 0x573   :  { %v751_v18 = vsel %vm369_vm9, %v746_v9, 0 }
 0x57a   :  { %v834_v26 = vpop.permute.xlu1 %833 }
 0x57b   :  { %743 = vrot.lane.b32.xlu0 %v3452_v57, %s3170_s25 }
 0x583   :  { %907 = vrot.lane.b32.xlu0 %v3452_v57, %s3171_s28 }
 0x5da   :  { %v718_v60 = vpop.xlane.xlu0 %717 }
 0x5db   :  { %2822 = vrcp.f32 %v718_v60 }
 0x5dc   :  { %v631_v61 = vpop.xlane.xlu2 %630 }
 0x5dd   :  { %v632_v62 = vsub.f32 %v626_v55, %v631_v61 }
 0x5df   :  { %v633_v63 = vmul.f32 1.442695, %v632_v62 }
 0x5e1   :  { %v2823_v0 = vpop.eup %2822  ;;  %2824 = vpow2.f32 %v633_v63 }
 0x5e2   :  { %v720_v1 = vmul.f32 %v2823_v0, %v2821_v53 }
 0x5e4   :  { %v721_v2 = vpack.c.bf16 %v720_v1, %v720_v1 }
 0x5e6   :  { %2451 = vmatmul.msk.bf16.vlgmr.msra.gmra.mxu1 %vm389_vm10, %v721_v2 }
 0x5e7   :  { %v2825_v3 = vpop.eup %2824 }
 0x5e8   :  { %v635_v4 = vsel %vm389_vm10, %v2825_v3, 0.0 }
 0x5e9   :  { %636 = vadd.xlane.f32.xlu2 %v635_v4 }
 0x5ed   :  { %v744_v22 = vpop.permute.xlu0 %743 }
 0x5f5   :  { %v908_v25 = vpop.permute.xlu0 %907 }
 0x601   :  { %641 = vrot.lane.b32.xlu2 %v3406_v19, %s3171_s28 }
 0x609   :  { %835 = vrot.lane.b32.xlu2 %v3452_v57, %s3965_s5 }
 0x611   :  { %909 = vrot.lane.b32.xlu2 %v3452_v57, %s3163_s22 }
 0x65c   :  { %v637_v5 = vpop.xlane.xlu2 %636 }
 0x65d   :  { %2826 = vrcp.f32 %v637_v5 }
 0x663   :  { %v2827_v6 = vpop.eup %2826  ;;  %v738_v12 = vpop.f32.mrf.mxu1 }
 0x664   :  { %v639_v14 = vmul.f32 %v2827_v6, %v2825_v3  ;;  %v742_v15 = vpack.c.bf16 %v738_v12, %v738_v12  ;;  %v642_v16 = vpop.permute.xlu2 %641 }
 0x665   :  { %v647_v17 = vsel %vm406_vm8, %v642_v16, 0 }
 0x666   :  { %v640_v20 = vpack.c.bf16 %v639_v14, %v639_v14  ;;  %656 = vmatpush.bf16.msra.mxu3 %v647_v17  ;;  %2455 = vmatmul.msk.bf16.vlgmr.msrb.gmra.mxu1 %vm369_vm9, %v742_v15 }
 0x669   :  { %2444 = vmatmul.msk.bf16.vlgmr.msra.gmra.mxu3 %vm389_vm10, %v640_v20 }
 0x66a   :  { %760 = vmatpush.bf16.xpose.msrb.mxu3 %v751_v18 }
 0x66b   :  { %v740_v19 = vpop.f32.mrf.mxu1 }
 0x66c   :  { %v836_v57 = vpop.permute.xlu2 %835 }
 0x66d   :  { %v841_v21 = vsel %vm369_vm9, %v836_v57, 0 }
 0x672   :  { %850 = vmatpush.bf16.xpose.msra.mxu3 %v841_v21 }
 0x674   :  { %v910_v23 = vpop.permute.xlu2 %909 }
 0x675   :  { %v915_v24 = vsel %vm369_vm9, %v910_v23, 0 }
 0x676   :  { %924 = vmatpush.bf16.xpose.msra.mxu1 %v915_v24 }
 0x679   :  { %2452 = vmatmul.msk.bf16.vlgmr.msrb.gmra.mxu3 %vm369_vm9, %v744_v22 }
 0x67d   :  { %2459 = vmatmul.msk.bf16.vlgmr.msra.gmra.mxu1 %vm369_vm9, %v908_v25 }
 0x689   :  { %2456 = vmatmul.msk.bf16.vlgmr.msra.gmra.mxu3 %vm369_vm9, %v834_v26 }
 0x6e3   :  { %v3531_v28 = vpop.f32.mrf.mxu1 }
 0x6eb   :  { %v831_v31 = vpop.f32.mrf.mxu1 }
 0x6ec   :  { %v658_v32 = vpop.f32.mrf.mxu3 }
 0x6ed   :  { %v662_v33 = vpack.c.bf16 %v658_v32, %v658_v32 }
 0x6ef   :  { %2449 = vmatmul.msk.bf16.vlgmr.msrb.gmra.mxu2 %vm369_vm9, %v662_v33 }
 0x6f4   :  { %v660_v35 = vpop.f32.mrf.mxu3 }
 0x6fa   :  { %v926_v36 = vpop.f32.mrf.mxu1 }
 0x6fb   :  { %v927_v37 = vadd.f32 %v926_v36, %v3490_v45 }
 0x6fc   :  { %v762_v40 = vpop.f32.mrf.mxu3 }
 0x6fd   :  { %v763_v41 = vadd.f32 %v762_v40, %v3490_v45  ;;  %v930_v42 = vsel %vm389_vm10, %v927_v37, -inf }
 0x6fe   :  { %931 = vmax.xlane.f32.xlu1 %v930_v42 }
 0x6ff   :  { %v766_v43 = vsel %vm389_vm10, %v763_v41, -inf }
 0x700   :  { %767 = vmax.xlane.f32.xlu2 %v766_v43 }
 0x702   :  { %v928_v44 = vpop.f32.mrf.mxu1 }
 0x704   :  { %v764_v46 = vpop.f32.mrf.mxu3 }
 0x70c   :  { %v852_v11 = vpop.f32.mrf.mxu3 }
 0x70d   :  { %v853_v13 = vadd.f32 %v852_v11, %v3490_v45 }
 0x70f   :  { %v856_v47 = vsel %vm389_vm10, %v853_v13, -inf }
 0x710   :  { %857 = vmax.xlane.f32.xlu0 %v856_v47 }
 0x714   :  { %v854_v48 = vpop.f32.mrf.mxu3 }
 0x717   :  { %779 = vrot.lane.b32.xlu1 %v3484_v39, %s3170_s25 }
 0x771   :  { %v932_v50 = vpop.xlane.xlu1 %931 }
 0x772   :  { %v933_v53 = vsub.f32 %v927_v37, %v932_v50  ;;  %v681_v54 = vpop.f32.mrf.mxu2 }
 0x773   :  { %v685_v55 = vadd.f32 %v681_v54, %v605_v51  ;;  %v768_v56 = vpop.xlane.xlu2 %767 }
 0x774   :  { %v934_v58 = vmul.f32 1.442695, %v933_v53  ;;  %v769_v59 = vsub.f32 %v763_v41, %v768_v56 }
 0x775   :  { %v985_v60 = vadd.f32 %v3548_v52, %v685_v55 }
 0x776   :  { %2828 = vpow2.f32 %v934_v58  ;;  %v770_v61 = vmul.f32 1.442695, %v769_v59 }
 0x777   :  { %v987_v34 = vadd.f32 %v985_v60, %v3388_v7 }
 0x778   :  { %2830 = vpow2.f32 %v770_v61 }
 0x779   :  { %v991_v38 = vsel %vm207_vm0, %v987_v34, 0.0 }
 0x77a   :  { %v683_v49 = vpop.f32.mrf.mxu2  ;;  %992 = vadd.xlane.f32.xlu1 %v991_v38 }
 0x77c   :  { %v2829_v62 = vpop.eup %2828 }
 0x77d   :  { %v936_v63 = vsel %vm389_vm10, %v2829_v62, 0.0 }
 0x77e   :  { %v2831_v0 = vpop.eup %2830  ;;  %937 = vadd.xlane.f32.xlu0 %v936_v63 }
 0x77f   :  { %v772_v1 = vsel %vm389_vm10, %v2831_v0, 0.0 }
 0x780   :  { %773 = vadd.xlane.f32.xlu2 %v772_v1 }
 0x783   :  { %v858_v2 = vpop.xlane.xlu0 %857 }
 0x784   :  { %v859_v3 = vsub.f32 %v853_v13, %v858_v2  ;;  %v2717_v2 = vld [vmem:[#allocation11] sm:$0xff] }
 0x786   :  { %v860_v4 = vmul.f32 1.442695, %v859_v3 }
 0x788   :  { %2832 = vpow2.f32 %v860_v4 }
 0x789   :  { %v780_v5 = vpop.permute.xlu1 %779 }
 0x78a   :  { %v785_v7 = vsel %vm406_vm8, %v780_v5, 0 }
 0x78b   :  { %794 = vmatpush.bf16.msra.mxu2 %v785_v7 }
 0x78e   :  { %v2833_v6 = vpop.eup %2832 }
 0x78f   :  { %v862_v9 = vsel %vm389_vm10, %v2833_v6, 0.0 }
 0x790   :  { %863 = vadd.xlane.f32.xlu2 %v862_v9 }
 0x792   :  { %942 = vrot.lane.b32.xlu0 %v3484_v39, %s3171_s28 }
 0x7a8   :  { %868 = vrot.lane.b32.xlu2 %v3484_v39, %s3168_s8 }
 0x7ed   :  { %v993_v12 = vpop.xlane.xlu1 %992 }
 0x7ee   :  { %v997_v14 = vmul.f32 %v993_v12, %v3322_v10 }
 0x7f0   :  { %v3562_v15 = vsub.f32 %v987_v34, %v997_v14 }
 0x7f1   :  { %v938_v20 = vpop.xlane.xlu0 %937 }
 0x7f2   :  { %v1001_v16 = vmul.f32 %v3562_v15, %v3562_v15 }
 0x7f3   :  { %v774_v17 = vpop.xlane.xlu2 %773 }
 0x7f4   :  { %2834 = vrcp.f32 %v774_v17  ;;  %v1003_v18 = vsel %vm207_vm0, %v1001_v16, 0.0 }
 0x7f5   :  { %1004 = vadd.xlane.f32.xlu2 %v1003_v18  ;;  %2836 = vrcp.f32 %v938_v20 }
 0x7fa   :  { %v2835_v19 = vpop.eup %2834 }
 0x7fb   :  { %v776_v57 = vmul.f32 %v2835_v19, %v2831_v0  ;;  %v2837_v39 = vpop.eup %2836  ;;  %v2718_v0 = vld [vmem:[#allocation11 + $0x8] sm:$0xff] }
 0x7fc   :  { %v940_v22 = vmul.f32 %v2837_v39, %v2829_v62 }
 0x7fd   :  { %v777_v21 = vpack.c.bf16 %v776_v57, %v776_v57 }
 0x7fe   :  { %v941_v26 = vpack.c.bf16 %v940_v22, %v940_v22 }
 0x7ff   :  { %2453 = vmatmul.msk.bf16.vlgmr.msra.gmra.mxu2 %vm389_vm10, %v777_v21  ;;  %v2787_v21 = vld [vmem:[#allocation10] ss:$0 sm:$0xff] }
 0x803   :  { %v864_v23 = vpop.xlane.xlu2 %863 }
 0x804   :  { %2838 = vrcp.f32 %v864_v23  ;;  %v943_v24 = vpop.permute.xlu0 %942 }
 0x805   :  { %v948_v25 = vsel %vm406_vm8, %v943_v24, 0  ;;  %v2788_v24 = vld [vmem:[%s3938_s9] ss:$0 sm:$0xff] }
 0x806   :  { %957 = vmatpush.bf16.msrb.mxu3 %v948_v25 }
 0x809   :  { %2460 = vmatmul.msk.bf16.vlgmr.msrb.gmra.mxu3 %vm389_vm10, %v941_v26 }
 0x80a   :  { %v2839_v31 = vpop.eup %2838 }
 0x80b   :  { %v866_v32 = vmul.f32 %v2839_v31, %v2833_v6  ;;  %v869_v33 = vpop.permute.xlu2 %868 }
 0x80c   :  { %v874_v35 = vsel %vm406_vm8, %v869_v33, 0 }
 0x80d   :  { %v867_v36 = vpack.c.bf16 %v866_v32, %v866_v32  ;;  %883 = vmatpush.bf16.msrb.mxu2 %v874_v35 }
 0x810   :  { %2457 = vmatmul.msk.bf16.vlgmr.msrb.gmra.mxu2 %vm389_vm10, %v867_v36  ;;  %v2727_v36 = vld [vmem:[%s3941_s12 + $0x30] sm:$0xff] }
 0x811   :  { %974 = vmatpush.bf16.msra.mxu2 %v3528_v27 }
 0x868   :  { %v1005_v49 = vpop.xlane.xlu2 %1004 }
 0x869   :  { %v1009_v62 = vmul.f32 %v1005_v49, %v3322_v10 }
 0x86b   :  { %v1011_v63 = vadd.f32 1e-05, %v1009_v62 }
 0x86d   :  { %2840 = vrsqrt.f32 %v1011_v63  ;;  %vm1019_vm12 = vweird.f32 %v1011_v63 }
 0x873   :  { %v2841_v1 = vpop.eup %2840 }
 0x874   :  { %v1014_v3 = vmul.f32 %v2841_v1, %v1011_v63  ;;  %vm1020_vm11 = vweird.f32 %v2841_v1 }
 0x875   :  { %vm1021_vm13 = vmor %vm1019_vm12, %vm1020_vm11 }
 0x876   :  { %v1015_v4 = vmul.f32 %v2841_v1, %v1014_v3 }
 0x878   :  { %v1016_v9 = vmul.f32 0.5, %v1015_v4 }
 0x87a   :  { %v1017_v12 = vsub.f32 1.5, %v1016_v9 }
 0x87c   :  { %v1018_v16 = vmul.f32 %v2841_v1, %v1017_v12 }
 0x87e   :  { %v1022_v20 = vsel %vm1021_vm13, %v2841_v1, %v1018_v16 }
 0x87f   :  { %v1033_v39 = vmul.f32 %v1022_v20, %v3562_v15  ;;  %v2728_v15 = vld [vmem:[%s3941_s12 + $0x38] sm:$0xff] }
 0x880   :  { %1186 = vmatpush.bf16.msrb.mxu1 %v2728_v15  ;;  %v2539_v15 = vld [vmem:[%s3964_s3 + $0x68] sm:$0xf0] }
 0x881   :  { %v1038_v25 = vmul.f32 %v2787_v21, %v1033_v39  ;;  %v2545_v39 = vld [vmem:[%s3964_s3 + $0x70] sm:$0xf] }
 0x882   :  { %v796_v37 = vpop.f32.mrf.mxu2 }
 0x883   :  { %v800_v40 = vpack.c.bf16 %v796_v37, %v796_v37  ;;  %v1043_v32 = vadd.f32 %v2788_v24, %v1038_v25  ;;  %v2726_v37 = vld [vmem:[%s3941_s12 + $0x28] sm:$0xff]  ;;  %v2547_v25 = vld [vmem:[%s3964_s3 + $0x78] sm:$0xf0] }
 0x884   :  { %1187 = vmatpush.bf16.msrb.mxu1 %v2727_v36 }
 0x885   :  { %2454 = vmatmul.msk.bf16.vlgmr.msra.gmra.mxu0 %vm369_vm9, %v800_v40  ;;  %v2725_v40 = vld [vmem:[%s3941_s12 + $0x20] sm:$0xff] }
 0x888   :  { %1188 = vmatpush.bf16.msrb.mxu1 %v2726_v37  ;;  %v2529_v37 = vld [vmem:[%s3964_s3 + $0x50] sm:$0xf] }
 0x88a   :  { %v798_v41 = vpop.f32.mrf.mxu2 }
 0x88b   :  { %v2724_v41 = vld [vmem:[%s3941_s12 + $0x18] sm:$0xff] }
 0x88c   :  { %v959_v42 = vpop.f32.mrf.mxu3  ;;  %1189 = vmatpush.bf16.msrb.mxu1 %v2725_v40  ;;  %v2732_v40 = vld [vmem:[%s3964_s3 + $0x54] sm:$0xf0] }
 0x88d   :  { %v963_v43 = vpack.c.bf16 %v959_v42, %v959_v42  ;;  %v2723_v42 = vld [vmem:[%s3941_s12 + $0x10] sm:$0xff] }
 0x88f   :  { %2461 = vmatmul.msk.bf16.vlgmr.msra.gmra.mxu2 %vm369_vm9, %v963_v43  ;;  %v2722_v43 = vld [vmem:[%s3941_s12 + $0x8] sm:$0xff] }
 0x890   :  { %1190 = vmatpush.bf16.msrb.mxu1 %v2724_v41  ;;  %v2731_v41 = vld [vmem:[%s3964_s3 + $0x54] sm:$0xf] }
 0x893   :  { %v885_v44 = vpop.f32.mrf.mxu2 }
 0x894   :  { %v889_v46 = vpack.c.bf16 %v885_v44, %v885_v44  ;;  %v961_v11 = vpop.f32.mrf.mxu3  ;;  %1191 = vmatpush.bf16.msrb.mxu1 %v2723_v42  ;;  %v2789_v44 = vld [vmem:[%s3940_s11] ss:$0 sm:$0xff] }
 0x896   :  { %2458 = vmatmul.msk.bf16.vlgmr.msrb.gmra.mxu0 %vm369_vm9, %v889_v46  ;;  %v2721_v46 = vld [vmem:[%s3941_s12] sm:$0xff] }
 0x898   :  { %1192 = vmatpush.bf16.msrb.mxu1 %v2722_v43  ;;  %v2530_v43 = vor.u32 %v2732_v40, %v2529_v37 }
 0x89b   :  { %v887_v13 = vpop.f32.mrf.mxu2 }
 0x89c   :  { %1193 = vmatpush.bf16.msrb.mxu1 %v2721_v46 }
 0x902   :  { %v813_v47 = vpop.f32.mrf.mxu0 }
 0x903   :  { %v830_v27 = vadd.f32 %v3531_v28, %v813_v47 }
 0x90a   :  { %v815_v48 = vpop.f32.mrf.mxu0 }
 0x912   :  { %v976_v29 = vpop.f32.mrf.mxu2 }
 0x913   :  { %v902_v50 = vpop.f32.mrf.mxu0 }
 0x914   :  { %v906_v51 = vadd.f32 %v902_v50, %v830_v27 }
 0x916   :  { %v980_v53 = vadd.f32 %v976_v29, %v906_v51 }
 0x918   :  { %v986_v54 = vadd.f32 %v3548_v52, %v980_v53  ;;  %v2720_v52 = vld [vmem:[#allocation11 + $0x18] sm:$0xff] }
 0x919   :  { %1089 = vmatpush.bf16.msra.mxu0 %v2720_v52 }
 0x91a   :  { %v978_v55 = vpop.f32.mrf.mxu2  ;;  %v988_v56 = vadd.f32 %v986_v54, %v3390_v8  ;;  %v2719_v8 = vld [vmem:[#allocation11 + $0x10] sm:$0xff] }
 0x91b   :  { %v904_v58 = vpop.f32.mrf.mxu0 }
 0x91c   :  { %v994_v59 = vsel %vm207_vm0, %v988_v56, 0.0 }
 0x91d   :  { %995 = vadd.xlane.f32.xlu0 %v994_v59  ;;  %1090 = vmatpush.bf16.msra.mxu0 %v2719_v8  ;;  %v2790_v8 = vld [vmem:[%s3942_s13] ss:$0 sm:$0xff] }
 0x921   :  { %1091 = vmatpush.bf16.msra.mxu0 %v2718_v0 }
 0x925   :  { %1092 = vmatpush.bf16.msra.mxu0 %v2717_v2 }
 0x990   :  { %v996_v60 = vpop.xlane.xlu0 %995 }
 0x991   :  { %v998_v61 = vmul.f32 %v996_v60, %v3322_v10 }
 0x993   :  { %v1000_v34 = vsub.f32 %v988_v56, %v998_v61 }
 0x995   :  { %v1002_v38 = vmul.f32 %v1000_v34, %v1000_v34 }
 0x997   :  { %v1006_v28 = vsel %vm207_vm0, %v1002_v38, 0.0 }
 0x998   :  { %1007 = vadd.xlane.f32.xlu1 %v1006_v28 }
 0xa0b   :  { %v1008_v5 = vpop.xlane.xlu1 %1007 }
 0xa0c   :  { %v1010_v7 = vmul.f32 %v1008_v5, %v3322_v10 }
 0xa0e   :  { %v1012_v6 = vadd.f32 1e-05, %v1010_v7 }
 0xa10   :  { %2842 = vrsqrt.f32 %v1012_v6  ;;  %vm1029_vm15 = vweird.f32 %v1012_v6 }
 0xa16   :  { %v2843_v14 = vpop.eup %2842 }
 0xa17   :  { %v1024_v17 = vmul.f32 %v2843_v14, %v1012_v6  ;;  %vm1030_vm14 = vweird.f32 %v2843_v14 }
 0xa18   :  { %vm1031_vm1 = vmor %vm1029_vm15, %vm1030_vm14 }
 0xa19   :  { %v1025_v18 = vmul.f32 %v2843_v14, %v1024_v17 }
 0xa1b   :  { %v1026_v19 = vmul.f32 0.5, %v1025_v18 }
 0xa1d   :  { %v1027_v57 = vsub.f32 1.5, %v1026_v19 }
 0xa1f   :  { %v1028_v22 = vmul.f32 %v2843_v14, %v1027_v57 }
 0xa21   :  { %v1032_v23 = vsel %vm1031_vm1, %v2843_v14, %v1028_v22  ;;  %v2736_v22 = vld [vmem:[%s3964_s3 + $0x74] sm:$0xf0] }
 0xa22   :  { %v1034_v26 = vmul.f32 %v1032_v23, %v1000_v34  ;;  %v2735_v23 = vld [vmem:[%s3964_s3 + $0x74] sm:$0xf] }
 0xa24   :  { %v1039_v31 = vmul.f32 %v2787_v21, %v1034_v26  ;;  %v2550_v26 = vor.u32 %v2735_v23, %v2547_v25 }
 0xa26   :  { %v1044_v33 = vadd.f32 %v2788_v24, %v1039_v31  ;;  %v2546_v24 = vor.u32 %v2736_v22, %v2545_v39  ;;  %1336 = vmatpush.bf16.msrb.mxu2 %v2550_v26  ;;  %v2537_v31 = vld [vmem:[%s3964_s3 + $0x60] sm:$0xf] }
 0xa28   :  { %v1053_v35 = vpack.c.bf16 %v1044_v33, %v1043_v32  ;;  %1322 = vmatpush.bf16.msra.mxu3 %v2546_v24 }
 0xa2a   :  { %2478 = vmatmul.msk.bf16.vlgmr.msra.gmra.mxu0 %vm207_vm0, %v1053_v35 }
 0xaa7   :  { %v1094_v11 = vpop.f32.mrf.mxu0 }
 0xaa8   :  { %v1095_v13 = vadd.f32 %v2789_v44, %v1094_v11 }
 0xaaa   :  { %v1101_v47 = vmul.f32 0.044715, %v1095_v13  ;;  %v1099_v38 = vmul.f32 0.5, %v1095_v13 }
 0xaac   :  { %v1103_v48 = vmul.f32 %v1101_v47, %v1095_v13  ;;  %v2521_v47 = vld [vmem:[%s3964_s3 + $0x40] sm:$0xf] }
 0xaae   :  { %v1105_v27 = vmul.f32 %v1103_v48, %v1095_v13  ;;  %v2730_v48 = vld [vmem:[%s3964_s3 + $0x44] sm:$0xf0] }
 0xaaf   :  { %v1096_v29 = vpop.f32.mrf.mxu0 }
 0xab0   :  { %v1107_v50 = vadd.f32 %v1105_v27, %v1095_v13  ;;  %v1097_v51 = vadd.f32 %v2789_v44, %v1096_v29  ;;  %v2531_v44 = vld [vmem:[%s3964_s3 + $0x58] sm:$0xf0]  ;;  %v2522_v27 = vor.u32 %v2730_v48, %v2521_v47  ;;  %v2729_v29 = vld [vmem:[%s3964_s3 + $0x44] sm:$0xf] }
 0xab1   :  { %v2534_v11 = vor.u32 %v2731_v41, %v2531_v44 }
 0xab2   :  { %v1102_v53 = vmul.f32 0.044715, %v1097_v51  ;;  %v1109_v54 = vmul.f32 0.7978846, %v1107_v50  ;;  %v1100_v28 = vmul.f32 0.5, %v1097_v51 }
 0xab3   :  { %v2523_v50 = vld [vmem:[%s3964_s3 + $0x48] sm:$0xf0] }
 0xab4   :  { %v1104_v55 = vmul.f32 %v1102_v53, %v1097_v51  ;;  %2844 = vtanh.f32 %v1109_v54 }
 0xab6   :  { %v1106_v56 = vmul.f32 %v1104_v55, %v1097_v51 }
 0xab8   :  { %v1108_v58 = vadd.f32 %v1106_v56, %v1097_v51  ;;  %v2526_v51 = vor.u32 %v2729_v29, %v2523_v50 }
 0xaba   :  { %v1110_v59 = vmul.f32 0.7978846, %v1108_v58  ;;  %v2845_v60 = vpop.eup %2844 }
 0xabb   :  { %v1113_v61 = vadd.f32 1.0, %v2845_v60 }
 0xabc   :  { %2846 = vtanh.f32 %v1110_v59 }
 0xabd   :  { %v1115_v62 = vmul.f32 %v1113_v61, %v1099_v38 }
 0xac2   :  { %v2847_v34 = vpop.eup %2846 }
 0xac3   :  { %v1114_v49 = vadd.f32 1.0, %v2847_v34 }
 0xac5   :  { %v1116_v63 = vmul.f32 %v1114_v49, %v1100_v28 }
 0xac7   :  { %v1133_v52 = vpack.c.bf16 %v1116_v63, %v1115_v62 }
 0xac9   :  { %1194 = vmatmul.bf16.vlgmr.msrb.gmra.mxu1 %v1133_v52 }
 0xb46   :  { %v1195_v0 = vpop.f32.mrf.mxu1 }
 0xb47   :  { %v1196_v1 = vadd.f32 %v2790_v8, %v1195_v0 }
 0xb49   :  { %v1200_v2 = vadd.f32 %v1196_v1, %v1043_v32  ;;  %v2734_v32 = vld [vmem:[%s3964_s3 + $0x64] sm:$0xf0] }
 0xb4a   :  { %v2538_v35 = vor.u32 %v2734_v32, %v2537_v31 }
 0xb4b   :  { %v1204_v3 = vsel %vm207_vm0, %v1200_v2, 0.0 }
 0xb4c   :  { %1205 = vadd.xlane.f32.xlu0 %v1204_v3  ;;  %1323 = vmatpush.bf16.msra.mxu3 %v2538_v35  ;;  %v2792_v3 = vld [vmem:[%s3944_s15] ss:$0 sm:$0xff] }
 0xb4e   :  { %v1197_v4 = vpop.f32.mrf.mxu1 }
 0xb4f   :  { %v1198_v5 = vadd.f32 %v2790_v8, %v1197_v4  ;;  %v2791_v8 = vld [vmem:[#allocation13] ss:$0 sm:$0xff] }
 0xb50   :  { %1324 = vmatpush.bf16.msra.mxu3 %v2530_v43 }
 0xb51   :  { %v1201_v7 = vadd.f32 %v1198_v5, %v1044_v33  ;;  %v2733_v33 = vld [vmem:[%s3964_s3 + $0x64] sm:$0xf] }
 0xb52   :  { %v2542_v36 = vor.u32 %v2733_v33, %v2539_v15 }
 0xb53   :  { %v1207_v6 = vsel %vm207_vm0, %v1201_v7, 0.0 }
 0xb54   :  { %1208 = vadd.xlane.f32.xlu1 %v1207_v6  ;;  %1337 = vmatpush.bf16.msrb.mxu2 %v2542_v36 }
 0xb55   :  { %1325 = vmatpush.bf16.msra.mxu3 %v2522_v27 }
 0xb58   :  { %1338 = vmatpush.bf16.msrb.mxu2 %v2534_v11 }
 0xb5c   :  { %1339 = vmatpush.bf16.msrb.mxu2 %v2526_v51 }
 0xbbf   :  { %v1206_v9 = vpop.xlane.xlu0 %1205 }
 0xbc0   :  { %v1210_v12 = vmul.f32 %v1206_v9, %v3322_v10 }
 0xbc2   :  { %v3622_v14 = vsub.f32 %v1200_v2, %v1210_v12 }
 0xbc4   :  { %v1214_v16 = vmul.f32 %v3622_v14, %v3622_v14 }
 0xbc6   :  { %v1216_v17 = vsel %vm207_vm0, %v1214_v16, 0.0 }
 0xbc7   :  { %v1209_v18 = vpop.xlane.xlu1 %1208  ;;  %1217 = vadd.xlane.f32.xlu2 %v1216_v17 }
 0xbc8   :  { %v1211_v20 = vmul.f32 %v1209_v18, %v3322_v10 }
 0xbca   :  { %v3628_v19 = vsub.f32 %v1201_v7, %v1211_v20 }
 0xbcc   :  { %v1215_v57 = vmul.f32 %v3628_v19, %v3628_v19 }
 0xbce   :  { %v1219_v21 = vsel %vm207_vm0, %v1215_v57, 0.0 }
 0xbcf   :  { %1220 = vadd.xlane.f32.xlu0 %v1219_v21 }
 0xc3a   :  { %v1218_v42 = vpop.xlane.xlu2 %1217 }
 0xc3b   :  { %v1222_v46 = vmul.f32 %v1218_v42, %v3322_v10 }
 0xc3d   :  { %v1224_v13 = vadd.f32 1e-05, %v1222_v46 }
 0xc3f   :  { %2848 = vrsqrt.f32 %v1224_v13  ;;  %vm1232_vm3 = vweird.f32 %v1224_v13 }
 0xc42   :  { %v1221_v53 = vpop.xlane.xlu0 %1220 }
 0xc43   :  { %v1223_v54 = vmul.f32 %v1221_v53, %v3322_v10 }
 0xc45   :  { %v2849_v55 = vpop.eup %2848  ;;  %v1225_v56 = vadd.f32 1e-05, %v1223_v54 }
 0xc46   :  { %v1227_v58 = vmul.f32 %v2849_v55, %v1224_v13  ;;  %vm1233_vm2 = vweird.f32 %v2849_v55 }
 0xc47   :  { %2850 = vrsqrt.f32 %v1225_v56  ;;  %vm1234_vm4 = vmor %vm1232_vm3, %vm1233_vm2  ;;  %vm1242_vm6 = vweird.f32 %v1225_v56 }
 0xc48   :  { %v1228_v59 = vmul.f32 %v2849_v55, %v1227_v58 }
 0xc4a   :  { %v1229_v60 = vmul.f32 0.5, %v1228_v59 }
 0xc4c   :  { %v1230_v61 = vsub.f32 1.5, %v1229_v60 }
 0xc4d   :  { %v2851_v34 = vpop.eup %2850 }
 0xc4e   :  { %v1231_v38 = vmul.f32 %v2849_v55, %v1230_v61  ;;  %v1237_v28 = vmul.f32 %v2851_v34, %v1225_v56  ;;  %vm1243_vm5 = vweird.f32 %v2851_v34 }
 0xc4f   :  { %vm1244_vm7 = vmor %vm1242_vm6, %vm1243_vm5  ;;  %vm2256_vm5 = vcmask 1040384  }
 0xc50   :  { %v1238_v49 = vmul.f32 %v2851_v34, %v1237_v28  ;;  %v1235_v62 = vsel %vm1234_vm4, %v2849_v55, %v1231_v38 }
 0xc51   :  { %v1246_v0 = vmul.f32 %v1235_v62, %v3622_v14  ;;  %v3696_v14 = vld [vmem:[#allocation8 + $0x2] sm:$0x3] }
 0xc52   :  { %v1239_v63 = vmul.f32 0.5, %v1238_v49  ;;  %v1271_v16 = vperm.slane %v3696_v14, 0  ;;  %v1272_v17 = vperm.slane %v3696_v14, 1 }
 0xc53   :  { %v1251_v4 = vmul.f32 %v2791_v8, %v1246_v0 }
 0xc54   :  { %v1240_v52 = vsub.f32 1.5, %v1239_v63 }
 0xc55   :  { %v3688_v6 = vadd.f32 %v2792_v3, %v1251_v4 }
 0xc56   :  { %v1241_v1 = vmul.f32 %v2851_v34, %v1240_v52 }
 0xc58   :  { %v1245_v2 = vsel %vm1244_vm7, %v2851_v34, %v1241_v1 }
 0xc59   :  { %v1247_v5 = vmul.f32 %v1245_v2, %v3628_v19 }
 0xc5b   :  { %v1252_v7 = vmul.f32 %v2791_v8, %v1247_v5 }
 0xc5d   :  { %v3690_v9 = vadd.f32 %v2792_v3, %v1252_v7 }
 0xc5f   :  { %v1267_v12 = vpack.c.bf16 %v3690_v9, %v3688_v6 }
 0xc61   :  { %2551 = vmatmul.msk.bf16.vlgmr.msra.gmra.mxu3 %vm207_vm0, %v1267_v12  ;;  %2552 = vmatmul.msk.bf16.vlgmr.msrb.gmra.mxu2 %vm207_vm0, %v1267_v12 }
 0xce4   :  { %v1327_v18 = vpop.f32.mrf.mxu3  ;;  %v1341_v20 = vpop.f32.mrf.mxu2 }
 0xce5   :  { %v1328_v19 = vadd.f32 %v1327_v18, %v1271_v16  ;;  %v1342_v57 = vadd.f32 %v1341_v20, %v1272_v17 }
 0xce7   :  { %v3702_v21 = vpack.c.bf16 %v1328_v19, %v1328_v19  ;;  %v3704_v39 = vpack.c.bf16 %v1342_v57, %v1342_v57  ;;  %v2739_v19 = vld [vmem:[%s3935_s6 + $0x30] sm:$0xff]  ;;  %v2737_v57 = vld [vmem:[%s3935_s6 + $0x20] sm:$0xff] }
 0xce9   :  { %1515 = vrot.lane.b32.xlu0 %v3702_v21, %s3965_s5  ;;  %1411 = vrot.lane.b32.xlu2 %v3702_v21, %s3170_s25  ;;  %v1395_v22 = vsel %vm406_vm8, %v3704_v39, 0 }
 0xcea   :  { %1413 = vrot.lane.b32.xlu1 %v3702_v21, %s3169_s1  ;;  %1404 = vmatpush.bf16.msrb.mxu3 %v1395_v22 }
 0xcec   :  { %v3725_v37 = vpop.f32.mrf.mxu2  ;;  %v1329_v47 = vpop.f32.mrf.mxu3 }
 0xced   :  { %v1330_v48 = vadd.f32 %v1329_v47, %v1271_v16  ;;  %v2738_v16 = vld [vmem:[%s3935_s6 + $0x28] sm:$0xff] }
 0xcee   :  { %1485 = vmatpush.bf16.msra.mxu1 %v2738_v16  ;;  %1507 = vmatpush.bf16.msra.mxu3 %v2737_v57 }
 0xcef   :  { %v3733_v27 = vpack.c.bf16 %v1330_v48, %v1330_v48 }
 0xcf1   :  { %1513 = vrot.lane.b32.xlu0 %v3702_v21, %s3168_s8  ;;  %1357 = vrot.lane.b32.xlu2 %v3702_v21, %s3963_s14 }
 0xcf2   :  { %1586 = vmatpush.bf16.msrb.mxu1 %v2739_v19 }
 0xd43   :  { %v1412_v23 = vpop.permute.xlu2 %1411 }
 0xd4b   :  { %v1358_v24 = vpop.permute.xlu2 %1357 }
 0xd4c   :  { %v1363_v25 = vsel %vm369_vm9, %v1358_v24, 0 }
 0xd4d   :  { %1372 = vmatpush.bf16.xpose.msrb.mxu0 %v1363_v25 }
 0xd54   :  { %2561 = vmatmul.msk.bf16.vlgmr.msrb.gmra.mxu0 %vm369_vm9, %v3702_v21 }
 0xd5b   :  { %v1516_v26 = vpop.permute.xlu0 %1515 }
 0xd5c   :  { %v1521_v31 = vsel %vm369_vm9, %v1516_v26, 0  ;;  %v1414_v32 = vpop.permute.xlu1 %1413 }
 0xd5d   :  { %v1419_v33 = vsel %vm369_vm9, %v1414_v32, 0 }
 0xd5e   :  { %1428 = vmatpush.bf16.xpose.msra.mxu2 %v1419_v33 }
 0xd63   :  { %v1514_v35 = vpop.permute.xlu0 %1513 }
 0xd65   :  { %2563 = vmatmul.msk.bf16.vlgmr.msra.gmra.mxu2 %vm369_vm9, %v1412_v23 }
 0xd66   :  { %1530 = vmatpush.bf16.xpose.msrb.mxu2 %v1521_v31 }
 0xd75   :  { %2575 = vmatmul.msk.bf16.vlgmr.msrb.gmra.mxu2 %vm369_vm9, %v1514_v35 }
 0xdd1   :  { %v1374_v15 = vpop.f32.mrf.mxu0 }
 0xdd2   :  { %v1375_v38 = vadd.f32 %v1374_v15, %v3433_v30 }
 0xdd4   :  { %v1378_v62 = vsel %vm389_vm10, %v1375_v38, -inf }
 0xdd9   :  { %v1376_v36 = vpop.f32.mrf.mxu0 }
 0xde8   :  { %v1430_v40 = vpop.f32.mrf.mxu2 }
 0xde9   :  { %v1431_v41 = vadd.f32 %v1430_v40, %v3433_v30 }
 0xdeb   :  { %v1434_v42 = vsel %vm389_vm10, %v1431_v41, -inf }
 0xdec   :  { %1435 = vmax.xlane.f32.xlu1 %v1434_v42 }
 0xdf0   :  { %v1432_v43 = vpop.f32.mrf.mxu2 }
 0xdf8   :  { %v1532_v44 = vpop.f32.mrf.mxu2 }
 0xdf9   :  { %v1533_v46 = vadd.f32 %v1532_v44, %v3433_v30 }
 0xdfb   :  { %v1536_v11 = vsel %vm389_vm10, %v1533_v46, -inf }
 0xdfc   :  { %1537 = vmax.xlane.f32.xlu0 %v1536_v11  ;;  %v1344_v11 = vadd.f32 %v3725_v37, %v1272_v17 }
 0xe00   :  { %v1534_v13 = vpop.f32.mrf.mxu2 }
 0xe01   :  { %v3775_v13 = vpack.c.bf16 %v1344_v11, %v1344_v11 }
 0xe05   :  { %1447 = vrot.lane.b32.xlu1 %v3704_v39, %s3170_s25 }
 0xe0d   :  { %1675 = vrot.lane.b32.xlu1 %v3733_v27, %s3963_s14 }
 0xe10   :  { %1548 = vrot.lane.b32.xlu0 %v3704_v39, %s3168_s8 }
 0xe18   :  { %1595 = vrot.lane.b32.xlu0 %v3702_v21, %s3163_s22 }
 0xe5f   :  { %v1436_v29 = vpop.xlane.xlu1 %1435 }
 0xe60   :  { %v1437_v50 = vsub.f32 %v1431_v41, %v1436_v29 }
 0xe62   :  { %v1438_v51 = vmul.f32 1.442695, %v1437_v50 }
 0xe64   :  { %2852 = vpow2.f32 %v1438_v51  ;;  %v1713_v51 = vsel %vm406_vm8, %v3775_v13, 0 }
 0xe6a   :  { %v2853_v53 = vpop.eup %2852 }
 0xe6b   :  { %v1440_v54 = vsel %vm389_vm10, %v2853_v53, 0.0 }
 0xe6c   :  { %1441 = vadd.xlane.f32.xlu2 %v1440_v54 }
 0xe6f   :  { %v1538_v55 = vpop.xlane.xlu0 %1537 }
 0xe70   :  { %v1539_v56 = vsub.f32 %v1533_v46, %v1538_v55 }
 0xe72   :  { %v1540_v58 = vmul.f32 1.442695, %v1539_v56 }
 0xe74   :  { %2854 = vpow2.f32 %v1540_v58 }
 0xe77   :  { %v1448_v59 = vpop.permute.xlu1 %1447 }
 0xe78   :  { %v1453_v60 = vsel %vm406_vm8, %v1448_v59, 0 }
 0xe79   :  { %1462 = vmatpush.bf16.msra.mxu0 %v1453_v60 }
 0xe7a   :  { %v2855_v61 = vpop.eup %2854 }
 0xe7b   :  { %v1542_v34 = vsel %vm389_vm10, %v2855_v61, 0.0 }
 0xe7c   :  { %1543 = vadd.xlane.f32.xlu2 %v1542_v34 }
 0xe7f   :  { %v1676_v22 = vpop.permute.xlu1 %1675 }
 0xe80   :  { %v1681_v25 = vsel %vm369_vm9, %v1676_v22, 0 }
 0xe82   :  { %v1549_v28 = vpop.permute.xlu0 %1548 }
 0xe83   :  { %v1554_v49 = vsel %vm406_vm8, %v1549_v28, 0 }
 0xe84   :  { %1379 = vmax.xlane.f32.xlu2 %v1378_v62  ;;  %1563 = vmatpush.bf16.msrb.mxu0 %v1554_v49 }
 0xe8a   :  { %v1596_v15 = vpop.permute.xlu0 %1595 }
 0xe8b   :  { %v1601_v41 = vsel %vm369_vm9, %v1596_v15, 0 }
 0xedf   :  { %v1442_v63 = vpop.xlane.xlu2 %1441 }
 0xee0   :  { %2856 = vrcp.f32 %v1442_v63 }
 0xee6   :  { %v2857_v52 = vpop.eup %2856 }
 0xee7   :  { %v1444_v8 = vmul.f32 %v2857_v52, %v2853_v53 }
 0xee9   :  { %v1445_v0 = vpack.c.bf16 %v1444_v8, %v1444_v8 }
 0xeeb   :  { %2564 = vmatmul.msk.bf16.vlgmr.msra.gmra.mxu0 %vm389_vm10, %v1445_v0 }
 0xeef   :  { %v1544_v1 = vpop.xlane.xlu2 %1543 }
 0xef0   :  { %2858 = vrcp.f32 %v1544_v1 }
 0xef6   :  { %v2859_v2 = vpop.eup %2858 }
 0xef7   :  { %v1546_v3 = vmul.f32 %v2859_v2, %v2855_v61  ;;  %v1380_v4 = vpop.xlane.xlu2 %1379 }
 0xef8   :  { %v1381_v5 = vsub.f32 %v1375_v38, %v1380_v4 }
 0xef9   :  { %v1547_v7 = vpack.c.bf16 %v1546_v3, %v1546_v3 }
 0xefa   :  { %v1382_v12 = vmul.f32 1.442695, %v1381_v5 }
 0xefb   :  { %2576 = vmatmul.msk.bf16.vlgmr.msrb.gmra.mxu0 %vm389_vm10, %v1547_v7 }
 0xefc   :  { %2860 = vpow2.f32 %v1382_v12 }
 0xf02   :  { %v2861_v18 = vpop.eup %2860 }
 0xf03   :  { %v1384_v20 = vsel %vm389_vm10, %v2861_v18, 0.0 }
 0xf04   :  { %1385 = vadd.xlane.f32.xlu2 %v1384_v20 }
 0xf1c   :  { %1593 = vrot.lane.b32.xlu2 %v3702_v21, %s3171_s28 }
 0xf68   :  { %v1464_v23 = vpop.f32.mrf.mxu0 }
 0xf69   :  { %v1468_v24 = vpack.c.bf16 %v1464_v23, %v1464_v23 }
 0xf6b   :  { %2569 = vmatmul.msk.bf16.vlgmr.msra.gmra.mxu1 %vm369_vm9, %v1468_v24 }
 0xf6c   :  { %1690 = vmatpush.bf16.xpose.msra.mxu1 %v1681_v25 }
 0xf70   :  { %v1466_v26 = vpop.f32.mrf.mxu0 }
 0xf77   :  { %v1386_v21 = vpop.xlane.xlu2 %1385 }
 0xf78   :  { %2862 = vrcp.f32 %v1386_v21  ;;  %v1565_v31 = vpop.f32.mrf.mxu0 }
 0xf79   :  { %v1569_v32 = vpack.c.bf16 %v1565_v31, %v1565_v31 }
 0xf7b   :  { %2581 = vmatmul.msk.bf16.vlgmr.msrb.gmra.mxu1 %vm369_vm9, %v1569_v32  ;;  %v3816_v32 = vld [vmem:[%s3935_s6 + $0x38] sm:$0xff] }
 0xf7c   :  { %1797 = vmatpush.bf16.msrb.mxu1 %v2738_v16  ;;  %1666 = vmatpush.bf16.msra.mxu0 %v3816_v32 }
 0xf7e   :  { %v2863_v33 = vpop.eup %2862 }
 0xf7f   :  { %v1388_v35 = vmul.f32 %v2863_v33, %v2861_v18  ;;  %v1594_v55 = vpop.permute.xlu2 %1593 }
 0xf80   :  { %v1567_v36 = vpop.f32.mrf.mxu0 }
 0xf81   :  { %v1389_v40 = vpack.c.bf16 %v1388_v35, %v1388_v35 }
 0xf83   :  { %2562 = vmatmul.msk.bf16.vlgmr.msrb.gmra.mxu3 %vm389_vm10, %v1389_v40 }
 0xf84   :  { %1610 = vmatpush.bf16.xpose.msrb.mxu3 %v1601_v41 }
 0xf8b   :  { %2589 = vmatmul.msk.bf16.vlgmr.msra.gmra.mxu1 %vm369_vm9, %v3733_v27 }
 0xf8c   :  { %1886 = vmatpush.bf16.msra.mxu1 %v2739_v19 }
 0xfe8   :  { %v3768_v42 = vpop.f32.mrf.mxu1 }
 0xff0   :  { %v1489_v43 = vpop.f32.mrf.mxu1 }
 0xff8   :  { %v3770_v44 = vpop.f32.mrf.mxu1 }
0x1000   :  { %v1590_v46 = vpop.f32.mrf.mxu1 }
0x1006   :  { %v1406_v47 = vpop.f32.mrf.mxu3 }
0x1007   :  { %v1410_v48 = vpack.c.bf16 %v1406_v47, %v1406_v47 }
0x1008   :  { %v1692_v29 = vpop.f32.mrf.mxu1 }
0x1009   :  { %v1693_v50 = vadd.f32 %v1692_v29, %v3490_v45  ;;  %2574 = vmatmul.msk.bf16.vlgmr.msra.gmra.mxu3 %vm369_vm9, %v1410_v48 }
0x100a   :  { %1722 = vmatpush.bf16.msra.mxu3 %v1713_v51 }
0x100b   :  { %v1696_v53 = vsel %vm389_vm10, %v1693_v50, -inf }
0x100c   :  { %1697 = vmax.xlane.f32.xlu1 %v1696_v53 }
0x100e   :  { %v1408_v54 = vpop.f32.mrf.mxu3 }
0x1010   :  { %v1694_v14 = vpop.f32.mrf.mxu1 }
0x1019   :  { %2582 = vmatmul.msk.bf16.vlgmr.msrb.gmra.mxu3 %vm369_vm9, %v1594_v55 }
0x101a   :  { %1813 = vmatpush.bf16.msrb.mxu3 %v2737_v57 }
0x107f   :  { %v1698_v17 = vpop.xlane.xlu1 %1697 }
0x1080   :  { %v1699_v37 = vsub.f32 %v1693_v50, %v1698_v17 }
0x1082   :  { %v1700_v56 = vmul.f32 1.442695, %v1699_v37  ;;  %v3836_v37 = vld [vmem:[%s3936_s7 + $0x1] ss:$0 sm:$0xff]  ;;  %s3172_s7 = smov [#allocation17]  }
0x1084   :  { %2864 = vpow2.f32 %v1700_v56 }
0x108a   :  { %v2865_v58 = vpop.eup %2864 }
0x108b   :  { %v1702_v59 = vsel %vm389_vm10, %v2865_v58, 0.0 }
0x108c   :  { %v3784_v60 = vpop.f32.mrf.mxu3  ;;  %1703 = vadd.xlane.f32.xlu0 %v1702_v59 }
0x108d   :  { %v1510_v55 = vadd.f32 %v3784_v60, %v3768_v42 }
0x108f   :  { %v1592_v17 = vadd.f32 %v3770_v44, %v1510_v55 }
0x1094   :  { %v1511_v61 = vpop.f32.mrf.mxu3 }
0x109c   :  { %v1612_v34 = vpop.f32.mrf.mxu3 }
0x109d   :  { %v1613_v38 = vadd.f32 %v1612_v34, %v3433_v30 }
0x109f   :  { %v1616_v28 = vsel %vm389_vm10, %v1613_v38, -inf }
0x10a0   :  { %1617 = vmax.xlane.f32.xlu2 %v1616_v28  ;;  %1628 = vrot.lane.b32.xlu0 %v3704_v39, %s3171_s28 }
0x10a4   :  { %v1614_v49 = vpop.f32.mrf.mxu3 }
0x10a8   :  { %1895 = vrot.lane.b32.xlu0 %v3733_v27, %s3163_s22 }
0x10b0   :  { %1821 = vrot.lane.b32.xlu0 %v3733_v27, %s3965_s5 }
0x10b8   :  { %1729 = vrot.lane.b32.xlu2 %v3733_v27, %s3170_s25  ;;  %1819 = vrot.lane.b32.xlu0 %v3733_v27, %s3168_s8 }
0x10ff   :  { %v1704_v30 = vpop.xlane.xlu0 %1703 }
0x1100   :  { %2866 = vrcp.f32 %v1704_v30 }
0x1106   :  { %v2867_v62 = vpop.eup %2866 }
0x1107   :  { %v1706_v63 = vmul.f32 %v2867_v62, %v2865_v58 }
0x1109   :  { %v1707_v52 = vpack.c.bf16 %v1706_v63, %v1706_v63 }
0x110b   :  { %2590 = vmatmul.msk.bf16.vlgmr.msra.gmra.mxu3 %vm389_vm10, %v1707_v52 }
0x1112   :  { %v1629_v39 = vpop.permute.xlu0 %1628 }
0x1113   :  { %v1634_v8 = vsel %vm406_vm8, %v1629_v39, 0  ;;  %v1618_v0 = vpop.xlane.xlu2 %1617 }
0x1114   :  { %v1619_v1 = vsub.f32 %v1613_v38, %v1618_v0  ;;  %1643 = vmatpush.bf16.msra.mxu2 %v1634_v8 }
0x1116   :  { %v1620_v2 = vmul.f32 1.442695, %v1619_v1 }
0x1118   :  { %2868 = vpow2.f32 %v1620_v2 }
0x111a   :  { %v1896_v3 = vpop.permute.xlu0 %1895 }
0x111b   :  { %v1901_v4 = vsel %vm369_vm9, %v1896_v3, 0 }
0x111c   :  { %1910 = vmatpush.bf16.xpose.msra.mxu3 %v1901_v4 }
0x111e   :  { %v2869_v5 = vpop.eup %2868 }
0x111f   :  { %v1622_v7 = vsel %vm389_vm10, %v2869_v5, 0.0 }
0x1120   :  { %1623 = vadd.xlane.f32.xlu1 %v1622_v7 }
0x1122   :  { %v1822_v23 = vpop.permute.xlu0 %1821 }
0x1123   :  { %v1827_v26 = vsel %vm369_vm9, %v1822_v23, 0 }
0x112a   :  { %v1820_v31 = vpop.permute.xlu0 %1819 }
0x1139   :  { %1731 = vrot.lane.b32.xlu1 %v3733_v27, %s3169_s1 }
0x1141   :  { %1893 = vrot.lane.b32.xlu1 %v3733_v27, %s3171_s28  ;;  %v1730_v27 = vpop.permute.xlu2 %1729 }
0x118e   :  { %v1724_v12 = vpop.f32.mrf.mxu3 }
0x118f   :  { %v1728_v16 = vpack.c.bf16 %v1724_v12, %v1724_v12 }
0x1191   :  { %2594 = vmatmul.msk.bf16.vlgmr.msrb.gmra.mxu3 %vm369_vm9, %v1728_v16 }
0x1193   :  { %v1624_v18 = vpop.xlane.xlu1 %1623 }
0x1194   :  { %2870 = vrcp.f32 %v1624_v18 }
0x1196   :  { %v1726_v20 = vpop.f32.mrf.mxu3 }
0x119a   :  { %v2871_v19 = vpop.eup %2870 }
0x119b   :  { %v1626_v57 = vmul.f32 %v2871_v19, %v2869_v5 }
0x119d   :  { %v1627_v22 = vpack.c.bf16 %v1626_v57, %v1626_v57 }
0x119f   :  { %2583 = vmatmul.msk.bf16.vlgmr.msra.gmra.mxu2 %vm389_vm10, %v1627_v22 }
0x11ab   :  { %v1732_v24 = vpop.permute.xlu1 %1731 }
0x11ac   :  { %v1737_v25 = vsel %vm369_vm9, %v1732_v24, 0 }
0x11ad   :  { %1746 = vmatpush.bf16.xpose.msrb.mxu2 %v1737_v25 }
0x11b3   :  { %v1894_v21 = vpop.permute.xlu1 %1893 }
0x11b4   :  { %2591 = vmatmul.msk.bf16.vlgmr.msrb.gmra.mxu2 %vm369_vm9, %v1730_v27  ;;  %2598 = vmatmul.msk.bf16.vlgmr.msra.gmra.mxu3 %vm369_vm9, %v1894_v21 }
0x11b5   :  { %1836 = vmatpush.bf16.xpose.msra.mxu2 %v1827_v26 }
0x11c4   :  { %2595 = vmatmul.msk.bf16.vlgmr.msra.gmra.mxu2 %vm369_vm9, %v1820_v31 }
0x1214   :  { %v3819_v33 = vpop.f32.mrf.mxu3 }
0x121c   :  { %v1817_v35 = vpop.f32.mrf.mxu3 }
0x1222   :  { %v1645_v15 = vpop.f32.mrf.mxu2 }
0x1223   :  { %v1649_v36 = vpack.c.bf16 %v1645_v15, %v1645_v15 }
0x1225   :  { %2588 = vmatmul.msk.bf16.vlgmr.msra.gmra.mxu0 %vm369_vm9, %v1649_v36 }
0x122a   :  { %v1647_v40 = vpop.f32.mrf.mxu2 }
0x1237   :  { %v1748_v41 = vpop.f32.mrf.mxu2  ;;  %v1912_v43 = vpop.f32.mrf.mxu3 }
0x1238   :  { %v1749_v46 = vadd.f32 %v1748_v41, %v3490_v45  ;;  %v1913_v11 = vadd.f32 %v1912_v43, %v3490_v45 }
0x123a   :  { %v1752_v47 = vsel %vm389_vm10, %v1749_v46, -inf  ;;  %v1916_v48 = vsel %vm389_vm10, %v1913_v11, -inf }
0x123b   :  { %1753 = vmax.xlane.f32.xlu1 %v1752_v47  ;;  %1917 = vmax.xlane.f32.xlu2 %v1916_v48 }
0x123f   :  { %v1750_v29 = vpop.f32.mrf.mxu2  ;;  %v1914_v50 = vpop.f32.mrf.mxu3 }
0x1247   :  { %v1838_v51 = vpop.f32.mrf.mxu2 }
0x1248   :  { %v1839_v53 = vadd.f32 %v1838_v51, %v3490_v45 }
0x124a   :  { %v1842_v54 = vsel %vm389_vm10, %v1839_v53, -inf }
0x124b   :  { %1843 = vmax.xlane.f32.xlu0 %v1842_v54 }
0x124f   :  { %v1840_v14 = vpop.f32.mrf.mxu2 }
0x1253   :  { %1765 = vrot.lane.b32.xlu2 %v3775_v13, %s3170_s25 }
0x12a2   :  { %v1668_v56 = vpop.f32.mrf.mxu0 }
0x12a3   :  { %v1672_v58 = vadd.f32 %v1668_v56, %v1592_v17 }
0x12a5   :  { %v1972_v45 = vadd.f32 %v3836_v37, %v1672_v58 }
0x12a7   :  { %v1974_v59 = vadd.f32 %v1972_v45, %v3688_v6 }
0x12a9   :  { %v1980_v61 = vsel %vm207_vm0, %v1974_v59, 0.0 }
0x12aa   :  { %v1670_v34 = vpop.f32.mrf.mxu0  ;;  %1981 = vadd.xlane.f32.xlu2 %v1980_v61 }
0x12ae   :  { %v1918_v38 = vpop.xlane.xlu2 %1917  ;;  %v1754_v28 = vpop.xlane.xlu1 %1753 }
0x12af   :  { %v1919_v42 = vsub.f32 %v1913_v11, %v1918_v38  ;;  %v1755_v60 = vsub.f32 %v1749_v46, %v1754_v28 }
0x12b1   :  { %v1920_v44 = vmul.f32 1.442695, %v1919_v42  ;;  %v1756_v49 = vmul.f32 1.442695, %v1755_v60 }
0x12b3   :  { %2872 = vpow2.f32 %v1920_v44 }
0x12b4   :  { %2874 = vpow2.f32 %v1756_v49 }
0x12b6   :  { %v1766_v30 = vpop.permute.xlu2 %1765 }
0x12b7   :  { %v1771_v62 = vsel %vm406_vm8, %v1766_v30, 0  ;;  %v2744_v30 = vld [vmem:[#allocation11 + $0x38] sm:$0xff] }
0x12b8   :  { %1780 = vmatpush.bf16.msrb.mxu0 %v1771_v62 }
0x12b9   :  { %v2873_v63 = vpop.eup %2872 }
0x12ba   :  { %v2875_v52 = vpop.eup %2874  ;;  %v1922_v6 = vsel %vm389_vm10, %v2873_v63, 0.0 }
0x12bb   :  { %1923 = vadd.xlane.f32.xlu0 %v1922_v6  ;;  %v1758_v39 = vsel %vm389_vm10, %v2875_v52, 0.0 }
0x12bc   :  { %1759 = vadd.xlane.f32.xlu1 %v1758_v39 }
0x12be   :  { %v1844_v8 = vpop.xlane.xlu0 %1843 }
0x12bf   :  { %v1845_v0 = vsub.f32 %v1839_v53, %v1844_v8 }
0x12c1   :  { %v1846_v1 = vmul.f32 1.442695, %v1845_v0 }
0x12c3   :  { %2876 = vpow2.f32 %v1846_v1 }
0x12c9   :  { %v2877_v2 = vpop.eup %2876 }
0x12ca   :  { %v1848_v3 = vsel %vm389_vm10, %v2877_v2, 0.0 }
0x12cb   :  { %1849 = vadd.xlane.f32.xlu1 %v1848_v3 }
0x12cf   :  { %1928 = vrot.lane.b32.xlu0 %v3775_v13, %s3171_s28 }
0x12e4   :  { %1854 = vrot.lane.b32.xlu1 %v3775_v13, %s3168_s8  ;;  %s2372_s8 = sshll.u32 %s3172_s7, 4  ;;  %s2373_s8 = int_to_ptr.vmem [resolvable:$true] %s2372_s8 }
0x131d   :  { %v1982_v4 = vpop.xlane.xlu2 %1981 }
0x131e   :  { %v1986_v5 = vmul.f32 %v1982_v4, %v3322_v10 }
0x1320   :  { %v3850_v7 = vsub.f32 %v1974_v59, %v1986_v5 }
0x1322   :  { %v1990_v12 = vmul.f32 %v3850_v7, %v3850_v7 }
0x1324   :  { %v1992_v16 = vsel %vm207_vm0, %v1990_v12, 0.0 }
0x1325   :  { %1993 = vadd.xlane.f32.xlu1 %v1992_v16 }
0x132e   :  { %v1924_v20 = vpop.xlane.xlu0 %1923 }
0x132f   :  { %v1760_v18 = vpop.xlane.xlu1 %1759 }
0x1330   :  { %2878 = vrcp.f32 %v1760_v18 }
0x1331   :  { %2880 = vrcp.f32 %v1924_v20 }
0x1336   :  { %v2879_v19 = vpop.eup %2878 }
0x1337   :  { %v1762_v57 = vmul.f32 %v2879_v19, %v2875_v52  ;;  %v2881_v13 = vpop.eup %2880  ;;  %v2794_v19 = vld [vmem:[#allocation10 + $0x1] ss:$0 sm:$0xff] }
0x1338   :  { %v1926_v23 = vmul.f32 %v2881_v13, %v2873_v63  ;;  %v2741_v63 = vld [vmem:[#allocation11 + $0x20] sm:$0xff] }
0x1339   :  { %v1763_v22 = vpack.c.bf16 %v1762_v57, %v1762_v57 }
0x133a   :  { %v1927_v26 = vpack.c.bf16 %v1926_v23, %v1926_v23  ;;  %v2795_v23 = vld [vmem:[%s3938_s9 + $0x1] ss:$0 sm:$0xff] }
0x133b   :  { %2592 = vmatmul.msk.bf16.vlgmr.msrb.gmra.mxu0 %vm389_vm10, %v1763_v22 }
0x133e   :  { %v1850_v27 = vpop.xlane.xlu1 %1849 }
0x133f   :  { %2882 = vrcp.f32 %v1850_v27 }
0x1341   :  { %v1929_v24 = vpop.permute.xlu0 %1928 }
0x1342   :  { %v1934_v25 = vsel %vm406_vm8, %v1929_v24, 0 }
0x1343   :  { %1943 = vmatpush.bf16.msrb.mxu2 %v1934_v25 }
0x1345   :  { %v2883_v21 = vpop.eup %2882 }
0x1346   :  { %2599 = vmatmul.msk.bf16.vlgmr.msrb.gmra.mxu2 %vm389_vm10, %v1927_v26  ;;  %v1852_v31 = vmul.f32 %v2883_v21, %v2877_v2 }
0x1348   :  { %v1853_v36 = vpack.c.bf16 %v1852_v31, %v1852_v31 }
0x1356   :  { %v1855_v35 = vpop.permute.xlu1 %1854 }
0x1357   :  { %v1860_v15 = vsel %vm406_vm8, %v1855_v35, 0  ;;  %v2751_v35 = vld [vmem:[%s3941_s12 + $0x70] sm:$0xff] }
0x1358   :  { %1869 = vmatpush.bf16.msra.mxu0 %v1860_v15  ;;  %v2750_v15 = vld [vmem:[%s3941_s12 + $0x68] sm:$0xff] }
0x135b   :  { %2596 = vmatmul.msk.bf16.vlgmr.msra.gmra.mxu0 %vm389_vm10, %v1853_v36  ;;  %v2749_v36 = vld [vmem:[%s3941_s12 + $0x60] sm:$0xff] }
0x135c   :  { %1960 = vmatpush.bf16.msrb.mxu0 %v3816_v32 }
0x13b8   :  { %v1782_v40 = vpop.f32.mrf.mxu0 }
0x13b9   :  { %v1786_v41 = vpack.c.bf16 %v1782_v40, %v1782_v40  ;;  %v2748_v40 = vld [vmem:[%s3941_s12 + $0x58] sm:$0xff] }
0x13bb   :  { %2593 = vmatmul.msk.bf16.vlgmr.msrb.gmra.mxu1 %vm369_vm9, %v1786_v41  ;;  %v2747_v41 = vld [vmem:[%s3941_s12 + $0x50] sm:$0xff] }
0x13bc   :  { %2080 = vmatpush.bf16.msrb.mxu1 %v2744_v30 }
0x13c0   :  { %v1784_v43 = vpop.f32.mrf.mxu0 }
0x13c1   :  { %v2746_v43 = vld [vmem:[%s3941_s12 + $0x48] sm:$0xff] }
0x13c9   :  { %v1945_v46 = vpop.f32.mrf.mxu2 }
0x13ca   :  { %v1949_v11 = vpack.c.bf16 %v1945_v46, %v1945_v46  ;;  %v2745_v46 = vld [vmem:[%s3941_s12 + $0x40] sm:$0xff] }
0x13cc   :  { %2600 = vmatmul.msk.bf16.vlgmr.msrb.gmra.mxu0 %vm369_vm9, %v1949_v11  ;;  %v2796_v11 = vld [vmem:[%s3940_s11 + $0x1] ss:$0 sm:$0xff] }
0x13d1   :  { %v1947_v47 = vpop.f32.mrf.mxu2 }
0x13d8   :  { %v1871_v48 = vpop.f32.mrf.mxu0 }
0x13d9   :  { %v1875_v29 = vpack.c.bf16 %v1871_v48, %v1871_v48 }
0x13db   :  { %2597 = vmatmul.msk.bf16.vlgmr.msra.gmra.mxu1 %vm369_vm9, %v1875_v29 }
0x13e0   :  { %v1873_v50 = vpop.f32.mrf.mxu0 }
0x1438   :  { %v1799_v51 = vpop.f32.mrf.mxu1 }
0x1439   :  { %v1816_v14 = vadd.f32 %v3819_v33, %v1799_v51  ;;  %v1994_v33 = vpop.xlane.xlu1 %1993 }
0x143a   :  { %v1998_v44 = vmul.f32 %v1994_v33, %v3322_v10 }
0x143c   :  { %v2000_v49 = vadd.f32 1e-05, %v1998_v44 }
0x143e   :  { %2884 = vrsqrt.f32 %v2000_v49  ;;  %vm2008_vm9 = vweird.f32 %v2000_v49 }
0x1440   :  { %v1801_v53 = vpop.f32.mrf.mxu1 }
0x1444   :  { %v2885_v62 = vpop.eup %2884 }
0x1445   :  { %v2003_v52 = vmul.f32 %v2885_v62, %v2000_v49  ;;  %vm2009_vm8 = vweird.f32 %v2885_v62  ;;  %v2797_v49 = vld [vmem:[%s3942_s13 + $0x1] ss:$0 sm:$0xff] }
0x1446   :  { %vm2010_vm10 = vmor %vm2008_vm9, %vm2009_vm8 }
0x1447   :  { %v2004_v6 = vmul.f32 %v2885_v62, %v2003_v52 }
0x1449   :  { %v1962_v32 = vpop.f32.mrf.mxu0  ;;  %v2005_v1 = vmul.f32 0.5, %v2004_v6 }
0x144b   :  { %v2006_v2 = vsub.f32 1.5, %v2005_v1 }
0x144d   :  { %v2007_v4 = vmul.f32 %v2885_v62, %v2006_v2 }
0x144f   :  { %v2011_v16 = vsel %vm2010_vm10, %v2885_v62, %v2007_v4 }
0x1450   :  { %v2022_v57 = vmul.f32 %v2011_v16, %v3850_v7  ;;  %v2752_v7 = vld [vmem:[%s3941_s12 + $0x78] sm:$0xff] }
0x1451   :  { %v1964_v54 = vpop.f32.mrf.mxu0  ;;  %2179 = vmatpush.bf16.msrb.mxu3 %v2752_v7 }
0x1452   :  { %v2027_v24 = vmul.f32 %v2794_v19, %v2022_v57 }
0x1454   :  { %v2032_v27 = vadd.f32 %v2795_v23, %v2027_v24  ;;  %v2753_v24 = vld [vmem:[#allocation14] sm:$0xff] }
0x1455   :  { %2180 = vmatpush.bf16.msrb.mxu3 %v2751_v35 }
0x1458   :  { %v1888_v55 = vpop.f32.mrf.mxu1 }
0x1459   :  { %v1892_v17 = vadd.f32 %v1888_v55, %v1816_v14  ;;  %2181 = vmatpush.bf16.msrb.mxu3 %v2750_v15 }
0x145b   :  { %v1966_v56 = vadd.f32 %v1962_v32, %v1892_v17 }
0x145d   :  { %v1973_v58 = vadd.f32 %v3836_v37, %v1966_v56  ;;  %v2742_v37 = vld [vmem:[#allocation11 + $0x28] sm:$0xff]  ;;  %2182 = vmatpush.bf16.msrb.mxu3 %v2749_v36 }
0x145f   :  { %v1975_v45 = vadd.f32 %v1973_v58, %v3690_v9  ;;  %v2743_v9 = vld [vmem:[#allocation11 + $0x30] sm:$0xff] }
0x1460   :  { %v1890_v59 = vpop.f32.mrf.mxu1  ;;  %2081 = vmatpush.bf16.msrb.mxu1 %v2743_v9 }
0x1461   :  { %v1983_v61 = vsel %vm207_vm0, %v1975_v45, 0.0  ;;  %2183 = vmatpush.bf16.msrb.mxu3 %v2748_v40 }
0x1462   :  { %1984 = vadd.xlane.f32.xlu0 %v1983_v61 }
0x1464   :  { %2082 = vmatpush.bf16.msrb.mxu1 %v2742_v37 }
0x1465   :  { %2184 = vmatpush.bf16.msrb.mxu3 %v2747_v41 }
0x1468   :  { %2083 = vmatpush.bf16.msrb.mxu1 %v2741_v63 }
0x1469   :  { %2185 = vmatpush.bf16.msrb.mxu3 %v2746_v43 }
0x146d   :  { %2186 = vmatpush.bf16.msrb.mxu3 %v2745_v46 }
0x14d5   :  { %v1985_v34 = vpop.xlane.xlu0 %1984 }
0x14d6   :  { %v1987_v38 = vmul.f32 %v1985_v34, %v3322_v10 }
0x14d8   :  { %v1989_v28 = vsub.f32 %v1975_v45, %v1987_v38 }
0x14da   :  { %v1991_v42 = vmul.f32 %v1989_v28, %v1989_v28 }
0x14dc   :  { %v1995_v60 = vsel %vm207_vm0, %v1991_v42, 0.0 }
0x14dd   :  { %1996 = vadd.xlane.f32.xlu2 %v1995_v60 }
0x1550   :  { %v1997_v39 = vpop.xlane.xlu2 %1996 }
0x1551   :  { %v1999_v8 = vmul.f32 %v1997_v39, %v3322_v10 }
0x1553   :  { %v2001_v0 = vadd.f32 1e-05, %v1999_v8 }
0x1555   :  { %2886 = vrsqrt.f32 %v2001_v0  ;;  %vm2018_vm12 = vweird.f32 %v2001_v0 }
0x155b   :  { %v2887_v3 = vpop.eup %2886 }
0x155c   :  { %v2013_v5 = vmul.f32 %v2887_v3, %v2001_v0  ;;  %vm2019_vm11 = vweird.f32 %v2887_v3 }
0x155d   :  { %vm2020_vm13 = vmor %vm2018_vm12, %vm2019_vm11 }
0x155e   :  { %v2014_v12 = vmul.f32 %v2887_v3, %v2013_v5 }
0x1560   :  { %v2015_v18 = vmul.f32 0.5, %v2014_v12 }
0x1562   :  { %v2016_v20 = vsub.f32 1.5, %v2015_v18 }
0x1564   :  { %v2017_v22 = vmul.f32 %v2887_v3, %v2016_v20  ;;  %v2756_v20 = vld [vmem:[#allocation14 + $0x18] sm:$0xff] }
0x1565   :  { %2302 = vmatpush.bf16.msra.mxu2 %v2756_v20 }
0x1566   :  { %v2021_v13 = vsel %vm2020_vm13, %v2887_v3, %v2017_v22 }
0x1567   :  { %v2023_v25 = vmul.f32 %v2021_v13, %v1989_v28  ;;  %v2754_v13 = vld [vmem:[#allocation14 + $0x8] sm:$0xff] }
0x1569   :  { %v2028_v26 = vmul.f32 %v2794_v19, %v2023_v25  ;;  %v2755_v19 = vld [vmem:[#allocation14 + $0x10] sm:$0xff] }
0x156a   :  { %2303 = vmatpush.bf16.msra.mxu2 %v2755_v19 }
0x156b   :  { %v2033_v21 = vadd.f32 %v2795_v23, %v2028_v26 }
0x156d   :  { %v2043_v31 = vpack.c.bf16 %v2033_v21, %v2032_v27 }
0x156e   :  { %2304 = vmatpush.bf16.msra.mxu2 %v2754_v13 }
0x156f   :  { %2620 = vmatmul.msk.bf16.vlgmr.msrb.gmra.mxu1 %vm207_vm0, %v2043_v31 }
0x1572   :  { %2305 = vmatpush.bf16.msra.mxu2 %v2753_v24 }
0x15ec   :  { %v2085_v47 = vpop.f32.mrf.mxu1 }
0x15ed   :  { %v2086_v48 = vadd.f32 %v2796_v11, %v2085_v47 }
0x15ef   :  { %v2092_v29 = vmul.f32 0.044715, %v2086_v48  ;;  %v2090_v38 = vmul.f32 0.5, %v2086_v48 }
0x15f1   :  { %v2094_v50 = vmul.f32 %v2092_v29, %v2086_v48  ;;  %v2798_v29 = vld [vmem:[#allocation13 + $0x1] ss:$0 sm:$0xff] }
0x15f3   :  { %v2096_v51 = vmul.f32 %v2094_v50, %v2086_v48 }
0x15f4   :  { %v2087_v53 = vpop.f32.mrf.mxu1 }
0x15f5   :  { %v2098_v32 = vadd.f32 %v2096_v51, %v2086_v48  ;;  %v2088_v54 = vadd.f32 %v2796_v11, %v2087_v53 }
0x15f7   :  { %v2093_v14 = vmul.f32 0.044715, %v2088_v54  ;;  %v2100_v55 = vmul.f32 0.7978846, %v2098_v32  ;;  %v2091_v28 = vmul.f32 0.5, %v2088_v54 }
0x15f8   :  { %v2799_v32 = vld [vmem:[%s3944_s15 + $0x1] ss:$0 sm:$0xff] }
0x15f9   :  { %v2095_v17 = vmul.f32 %v2093_v14, %v2088_v54  ;;  %2888 = vtanh.f32 %v2100_v55 }
0x15fb   :  { %v2097_v56 = vmul.f32 %v2095_v17, %v2088_v54 }
0x15fd   :  { %v2099_v58 = vadd.f32 %v2097_v56, %v2088_v54 }
0x15ff   :  { %v2101_v45 = vmul.f32 0.7978846, %v2099_v58  ;;  %v2889_v59 = vpop.eup %2888 }
0x1600   :  { %v2104_v61 = vadd.f32 1.0, %v2889_v59  ;;  %v2759_v59 = vld [vmem:[#allocation16 + $0x10] sm:$0xff] }
0x1601   :  { %2890 = vtanh.f32 %v2101_v45 }
0x1602   :  { %v2106_v60 = vmul.f32 %v2104_v61, %v2090_v38  ;;  %v2758_v61 = vld [vmem:[#allocation16 + $0x8] sm:$0xff]  ;;  %v2800_v38 = vld [vmem:[%s3946_s17] ss:$0 sm:$0xff] }
0x1607   :  { %v2891_v34 = vpop.eup %2890 }
0x1608   :  { %v2105_v42 = vadd.f32 1.0, %v2891_v34  ;;  %v2757_v34 = vld [vmem:[#allocation16] sm:$0xff] }
0x160a   :  { %v2107_v33 = vmul.f32 %v2105_v42, %v2091_v28 }
0x160c   :  { %v2125_v44 = vpack.c.bf16 %v2107_v33, %v2106_v60 }
0x160e   :  { %2187 = vmatmul.bf16.vlgmr.msrb.gmra.mxu3 %v2125_v44 }
0x1691   :  { %v2188_v30 = vpop.f32.mrf.mxu3 }
0x1692   :  { %v2189_v9 = vadd.f32 %v2797_v49, %v2188_v30  ;;  %v2801_v30 = vld [vmem:[%s3948_s19] ss:$0 sm:$0xff] }
0x1694   :  { %v2193_v37 = vadd.f32 %v2189_v9, %v2032_v27  ;;  %v2760_v27 = vld [vmem:[#allocation16 + $0x18] sm:$0xff] }
0x1695   :  { %2357 = vmatpush.bf16.msra.mxu0 %v2760_v27 }
0x1696   :  { %v2199_v62 = vsel %vm207_vm0, %v2193_v37, 0.0 }
0x1697   :  { %2200 = vadd.xlane.f32.xlu2 %v2199_v62 }
0x1699   :  { %v2190_v63 = vpop.f32.mrf.mxu3  ;;  %2358 = vmatpush.bf16.msra.mxu0 %v2759_v59 }
0x169a   :  { %v2191_v52 = vadd.f32 %v2797_v49, %v2190_v63 }
0x169c   :  { %v2194_v6 = vadd.f32 %v2191_v52, %v2033_v21 }
0x169d   :  { %2359 = vmatpush.bf16.msra.mxu0 %v2758_v61 }
0x169e   :  { %v2202_v39 = vsel %vm207_vm0, %v2194_v6, 0.0 }
0x169f   :  { %2203 = vadd.xlane.f32.xlu0 %v2202_v39 }
0x16a1   :  { %2360 = vmatpush.bf16.msra.mxu0 %v2757_v34 }
0x170a   :  { %v2201_v8 = vpop.xlane.xlu2 %2200 }
0x170b   :  { %v2205_v0 = vmul.f32 %v2201_v8, %v3322_v10 }
0x170d   :  { %v2207_v1 = vsub.f32 %v2193_v37, %v2205_v0 }
0x170f   :  { %v2209_v2 = vmul.f32 %v2207_v1, %v2207_v1 }
0x1711   :  { %v2211_v3 = vsel %vm207_vm0, %v2209_v2, 0.0 }
0x1712   :  { %v2204_v4 = vpop.xlane.xlu0 %2203  ;;  %2212 = vadd.xlane.f32.xlu1 %v2211_v3 }
0x1713   :  { %v2206_v5 = vmul.f32 %v2204_v4, %v3322_v10 }
0x1715   :  { %v2208_v12 = vsub.f32 %v2194_v6, %v2206_v5 }
0x1717   :  { %v2210_v16 = vmul.f32 %v2208_v12, %v2208_v12 }
0x1719   :  { %v2214_v18 = vsel %vm207_vm0, %v2210_v16, 0.0 }
0x171a   :  { %2215 = vadd.xlane.f32.xlu0 %v2214_v18 }
0x1785   :  { %v2213_v57 = vpop.xlane.xlu1 %2212 }
0x1786   :  { %v2217_v22 = vmul.f32 %v2213_v57, %v3322_v10 }
0x1788   :  { %v2219_v23 = vadd.f32 1e-05, %v2217_v22 }
0x178a   :  { %2892 = vrsqrt.f32 %v2219_v23  ;;  %vm2227_vm15 = vweird.f32 %v2219_v23 }
0x178d   :  { %v2216_v25 = vpop.xlane.xlu0 %2215 }
0x178e   :  { %v2218_v26 = vmul.f32 %v2216_v25, %v3322_v10 }
0x1790   :  { %v2893_v21 = vpop.eup %2892  ;;  %v2220_v31 = vadd.f32 1e-05, %v2218_v26 }
0x1791   :  { %v2222_v7 = vmul.f32 %v2893_v21, %v2219_v23  ;;  %vm2228_vm14 = vweird.f32 %v2893_v21 }
0x1792   :  { %2894 = vrsqrt.f32 %v2220_v31  ;;  %vm2229_vm1 = vmor %vm2227_vm15, %vm2228_vm14  ;;  %vm2237_vm3 = vweird.f32 %v2220_v31 }
0x1793   :  { %v2223_v35 = vmul.f32 %v2893_v21, %v2222_v7 }
0x1795   :  { %v2224_v15 = vmul.f32 0.5, %v2223_v35 }
0x1797   :  { %v2225_v36 = vsub.f32 1.5, %v2224_v15 }
0x1798   :  { %v2895_v40 = vpop.eup %2894 }
0x1799   :  { %v2232_v41 = vmul.f32 %v2895_v40, %v2220_v31  ;;  %v2226_v43 = vmul.f32 %v2893_v21, %v2225_v36  ;;  %vm2238_vm2 = vweird.f32 %v2895_v40 }
0x179a   :  { %vm2239_vm4 = vmor %vm2237_vm3, %vm2238_vm2 }
0x179b   :  { %v2233_v46 = vmul.f32 %v2895_v40, %v2232_v41  ;;  %v2230_v47 = vsel %vm2229_vm1, %v2893_v21, %v2226_v43 }
0x179c   :  { %v2241_v50 = vmul.f32 %v2230_v47, %v2207_v1 }
0x179d   :  { %v2234_v11 = vmul.f32 0.5, %v2233_v46 }
0x179e   :  { %v2246_v54 = vmul.f32 %v2798_v29, %v2241_v50 }
0x179f   :  { %v2235_v48 = vsub.f32 1.5, %v2234_v11 }
0x17a0   :  { %v2251_v17 = vadd.f32 %v2799_v32, %v2246_v54 }
0x17a1   :  { %v2236_v10 = vmul.f32 %v2895_v40, %v2235_v48 }
0x17a3   :  { %v2240_v51 = vsel %vm2239_vm4, %v2895_v40, %v2236_v10 }
0x17a4   :  { %v2242_v53 = vmul.f32 %v2240_v51, %v2208_v12 }
0x17a6   :  { %v2247_v14 = vmul.f32 %v2798_v29, %v2242_v53 }
0x17a8   :  { %v2252_v55 = vadd.f32 %v2799_v32, %v2247_v14 }
0x17aa   :  { %v2254_v56 = vrot.slane %v2252_v55, 7 }
0x17ac   :  { %v2257_v58 = vsel %vm2256_vm5, %v2251_v17, %v2254_v56 }
0x17ad   :  { %v2266_v45 = vpack.c.bf16 %v2257_v58, %v2257_v58 }
0x17af   :  { %2687 = vmatmul.msk.bf16.vlgmr.msra.gmra.mxu2 %vm207_vm0, %v2266_v45 }
0x1832   :  { %v2307_v28 = vpop.f32.mrf.mxu2 }
0x1833   :  { %v2308_v42 = vadd.f32 %v2800_v38, %v2307_v28 }
0x1835   :  { %2896 = vtanh.f32 %v2308_v42 }
0x183a   :  { %v2309_v60 = vpop.f32.mrf.mxu2 }
0x183b   :  { %v2897_v33 = vpop.eup %2896 }
0x183c   :  { %v2312_v44 = vmax.f32 %v2897_v33, 0.0 }
0x183e   :  { %v2321_v49 = vpack.c.bf16 %v2312_v44, %v2312_v44 }
0x1840   :  { %2704 = vmatmul.msk.bf16.vlgmr.msra.gmra.mxu0 %vm207_vm0, %v2321_v49 }
0x18bd   :  { %v2362_v9 = vpop.f32.mrf.mxu0 }
0x18be   :  { %v2363_v37 = vadd.f32 %v2801_v30, %v2362_v9 }
0x18c0   :  { %2366 = vst [vmem:[#allocation17] sm:$0x3] %v2363_v37 }
0x18c1   :  { %2377 = dma.vmem_to_hbm [thread:$0]  %s2373_s8, 32, %s2375_s21, [#allocation4]  }
0x18c5   :  { %v2364_v62 = vpop.f32.mrf.mxu0 }
0x18c6   :  { %3148 = dma.done.wait [#allocation4], 32  }
0x18c7   :  { %3149 = vsyncadd [#allocation4], 4294967264 }
0x18c8   :  { %2382 = vsyncpa [#allocation3], 1 }
0x18c9   :  { %2383 = vsyncpa [#allocation6], 1 }
0x18ca   :  { %2384 = vsyncpa [#allocation9], 1 }
0x18cb   :  { %2385 = vsyncpa [#allocation12], 1 }
0x18cc   :  { %2386 = vsyncpa [#allocation15], 1 }
0x18cd   :  { %2387 = vsyncpa [#allocation4], 1 }

</bundles_post_ra>
